<compile_context>
chip_gen: v7x
topology: tpu7x:2x2x1
jax: 0.10.0
libtpu: 0.0.40
codegen_flags: <defaults>
</compile_context>

<pallas_src>
import jax
import jax.numpy as jnp
from jax.experimental import pallas as pl
from jax.experimental.pallas import tpu as pltpu

_VMEM = pl.BlockSpec(memory_space=pltpu.MemorySpace.VMEM)


# ------------------------------ in-kernel helpers ------------------------------

def _shift_lanes(a, d):
    """S[:, p] = a[:, p + d], zero-filled at the ends; d may be negative."""
    if d == 0:
        return a
    c, n = a.shape
    z = jnp.zeros((c, abs(d)), a.dtype)
    if d > 0:
        return jnp.concatenate([a[:, d:], z], axis=1)
    return jnp.concatenate([z, a[:, :n + d]], axis=1)


def _tap_rows(a, width, masks):
    """3x3 / stride-1 / pad-1 im2col in the flat-spatial layout.

    a     : (C, B*H*W)   channel-major activation, lane = (b, y*W + x)
    masks : (9, B*H*W)   0/1 validity of tap shift (ky-1, kx-1)
    out   : (9*C, B*H*W) patch rows ordered (ky, kx, c)
    """
    rows = []
    for ky in range(3):
        for kx in range(3):
            d = (ky - 1) * width + (kx - 1)
            t = ky * 3 + kx
            rows.append(_shift_lanes(a, d) * masks[t:t + 1, :])
    return jnp.concatenate(rows, axis=0)


def _pool2x2(conv, width, sel, batch, hw_in):
    """2x2 / stride-2 max-pool in the flat-spatial layout.

    Max over the 4 window offsets is computed at every position (non-anchor
    positions are don't-care), then the even/even anchors are selected exactly
    with the constant 0/1 matrix `sel` on the MXU.
    """
    m = jnp.maximum(jnp.maximum(conv, _shift_lanes(conv, 1)),
                    jnp.maximum(_shift_lanes(conv, width),
                                _shift_lanes(conv, width + 1)))
    outs = [jnp.dot(m[:, b * hw_in:(b + 1) * hw_in], sel,
                    preferred_element_type=jnp.float32)
            for b in range(batch)]
    return outs[0] if batch == 1 else jnp.concatenate(outs, axis=1)


def _tile_lanes(m, batch):
    return m if batch == 1 else jnp.concatenate([m] * batch, axis=1)


# ---------------------------------- the kernel ---------------------------------

def _vae_kernel(x_ref, eps_ref,
                cw1_ref, cb1_ref, cw2_ref, cb2_ref,
                f1w_ref, f1b_ref, f21w_ref, f21b_ref, f3w_ref, f3b_ref,
                f4w_ref, f4b_ref, f5w_ref, f5b_ref,
                dw1_ref, db1_ref, dw2_ref, db2_ref,
                m28_ref, m14_ref, m7_ref, s1_ref, s2_ref,
                ml_ref, rec_ref):
    f32 = jnp.float32
    B = eps_ref.shape[0]
    L = eps_ref.shape[1]

    m28 = _tile_lanes(m28_ref[...], B)          # (9, B*784)
    m14 = _tile_lanes(m14_ref[...], B)          # (9, B*196)
    m7 = _tile_lanes(m7_ref[...], B)            # (9, B*49)
    sel1 = s1_ref[...].astype(f32)              # (784, 196) exact 0/1
    sel2 = s2_ref[...].astype(f32)              # (196, 49)

    # ----- encoder: conv1+pool1, conv2+pool2 (no ReLU after convs, per spec) ---
    x = x_ref[...]                                                  # (1, B*784)
    c1 = jnp.dot(cw1_ref[...], _tap_rows(x, 28, m28),
                 preferred_element_type=f32)                        # (8, B*784)
    p1 = _pool2x2(c1, 28, sel1, B, 784) + cb1_ref[...]              # (8, B*196)

    c2 = jnp.dot(cw2_ref[...], _tap_rows(p1, 14, m14),
                 preferred_element_type=f32)                        # (16, B*196)
    p2 = _pool2x2(c2, 14, sel2, B, 196) + cb2_ref[...]              # (16, B*49)

    # ----- FC stack + reparameterization (NCHW-flat feature order) -------------
    feat = jnp.concatenate(
        [jnp.concatenate([p2[c:c + 1, bi * 49:(bi + 1) * 49] for c in range(16)],
                         axis=1)
         for bi in range(B)], axis=0)                               # (B, 784)

    h = jnp.maximum(jnp.dot(feat, f1w_ref[...], preferred_element_type=f32)
                    + f1b_ref[...], 0.0)                            # (B, 32)
    ml = jnp.dot(h, f21w_ref[...], preferred_element_type=f32) + f21b_ref[...]
    ml_ref[...] = ml                                                # (B, 2L)
    mu = ml[:, :L]
    logvar = ml[:, L:]
    z = mu + jnp.exp(0.5 * logvar) * eps_ref[...]                   # (B, L)
    h = jnp.maximum(jnp.dot(z, f3w_ref[...], preferred_element_type=f32)
                    + f3b_ref[...], 0.0)
    h = jnp.maximum(jnp.dot(h, f4w_ref[...], preferred_element_type=f32)
                    + f4b_ref[...], 0.0)
    h5 = jnp.maximum(jnp.dot(h, f5w_ref[...], preferred_element_type=f32)
                     + f5b_ref[...], 0.0)                           # (B, 784)

    # ----- decoder: deconv1, deconv2 + sigmoid ----------------------------------
    t = jnp.concatenate(
        [jnp.concatenate([h5[bi:bi + 1, c * 49:(c + 1) * 49] for c in range(16)],
                         axis=0)
         for bi in range(B)], axis=1)                               # (16, B*49)

    y1 = jnp.dot(dw1_ref[...], _tap_rows(t, 7, m7),
                 preferred_element_type=f32) + db1_ref[...]         # (32, B*49)
    # y1 rows are (ph, pw, co): deconv1's 14x14 output as 4 stride-phase planes.
    plane = [[y1[0:8, :], y1[8:16, :]], [y1[16:24, :], y1[24:32, :]]]

    # deconv2 consumes the phase planes directly: for input-grid parity (pa, pb)
    # its 3x3 patch rows are {-1,0,+1} shifts of the planes (the interleaved
    # 14x14 image is never materialized).
    blocks = []
    for pa in range(2):
        for pb in range(2):
            rows = []
            for ky in range(3):
                mv = pa + ky - 1
                phs, ou = mv % 2, mv // 2
                for kx in range(3):
                    mh = pb + kx - 1
                    pws, ov = mh % 2, mh // 2
                    mrow = (ou + 1) * 3 + (ov + 1)
                    rows.append(_shift_lanes(plane[phs][pws], ou * 7 + ov)
                                * m7[mrow:mrow + 1, :])
            p_ab = jnp.concatenate(rows, axis=0)                    # (72, B*49)
            z_ab = jnp.dot(dw2_ref[...], p_ab,
                           preferred_element_type=f32) + db2_ref[...]  # (4, B*49)
            blocks.append(1.0 / (1.0 + jnp.exp(-z_ab)))             # exact sigmoid
    # Rows ordered (pa, pb, qh, qw); recon pixel = (4u + 2*pa + qh, 4v + 2*pb + qw).
    rec_ref[...] = jnp.concatenate(blocks, axis=0)                  # (16, B*49)


# --------------------------------- forward pass --------------------------------

def digit_vae_forward(packed, x_nchw, eps):
    """DigitVae.forward: x (B,1,28,28) -> (recon (B,1,28,28), mu, logvar)."""
    B = x_nchw.shape[0]
    L = eps.shape[1]
    x_flat = x_nchw.reshape(1, B * 784)          # lane index = b*784 + y*28 + x (free)

    ml, rec = pl.pallas_call(
        _vae_kernel,
        out_shape=(jax.ShapeDtypeStruct((B, 2 * L), jnp.float32),
                   jax.ShapeDtypeStruct((16, B * 49), jnp.float32)),
        in_specs=[_VMEM] * 25,
        out_specs=(_VMEM, _VMEM),
    )(x_flat, eps,
      packed["conv1_w"], packed["conv1_b"], packed["conv2_w"], packed["conv2_b"],
      packed["fc1_w"], packed["fc1_b"], packed["fc21_22_w"], packed["fc21_22_b"],
      packed["fc3_w"], packed["fc3_b"], packed["fc4_w"], packed["fc4_b"],
      packed["fc5_w"], packed["fc5_b"],
      packed["deconv1_w"], packed["deconv1_b"],
      packed["deconv2_w"], packed["deconv2_b"],
      packed["mask28"], packed["mask14"], packed["mask7"],
      packed["pool_sel1"], packed["pool_sel2"])

    mu, logvar = ml[:, :L], ml[:, L:]
    # Final 6 KB polyphase -> NCHW interleave stays in the wrapper (output must
    # leave the kernel anyway; this is one cheap XLA transpose).
    r = rec.reshape(2, 2, 2, 2, B, 7, 7)          # (pa, pb, qh, qw, img, u, v)
    recon = jnp.transpose(r, (4, 5, 0, 2, 6, 1, 3)).reshape(B, 1, 28, 28)
    return recon, mu, logvar


# ----------------------------- one-time weight packing --------------------------

def pack_params(p):
    """Repack PyTorch parameters into transposed-GEMM layouts + constant tables."""

    def conv_w(w):                     # (Cout, Cin, 3, 3) -> (Cout, 9*Cin), cols (ky, kx, c)
        cout, cin = w.shape[0], w.shape[1]
        return jnp.transpose(w, (0, 2, 3, 1)).reshape(cout, 9 * cin)

    def deconv_w(wt):                  # (Cin, Cout, 4, 4) -> (4*Cout, 9*Cin), stride-phase packed
        cin, cout = wt.shape[0], wt.shape[1]
        wp = jnp.zeros((4 * cout, 9 * cin), jnp.float32)
        for ph in range(2):
            for pw in range(2):
                for ky in range(3):
                    for kx in range(3):
                        kh, kw = ph + 3 - 2 * ky, pw + 3 - 2 * kx
                        if 0 <= kh < 4 and 0 <= kw < 4:
                            wp = wp.at[(ph * 2 + pw) * cout:(ph * 2 + pw + 1) * cout,
                                       (ky * 3 + kx) * cin:(ky * 3 + kx + 1) * cin
                                       ].set(jnp.transpose(wt[:, :, kh, kw]))
        return wp

    def tap_masks(g):                  # (9, g*g): validity of tap shift (ky-1, kx-1)
        y = jnp.arange(g).reshape(g, 1)
        x = jnp.arange(g).reshape(1, g)
        rows = []
        for ky in range(3):
            for kx in range(3):
                ok = ((y + ky - 1 >= 0) & (y + ky - 1 < g) &
                      (x + kx - 1 >= 0) & (x + kx - 1 < g))
                rows.append(ok.reshape(1, g * g))
        return jnp.concatenate(rows, axis=0).astype(jnp.float32)

    def pool_sel(g):                   # (g*g, (g//2)^2): exact 0/1 stride-2 anchor selector
        go = g // 2
        q = jnp.arange(go * go)
        anchors = 2 * (q // go) * g + 2 * (q % go)
        return (jnp.arange(g * g)[:, None] == anchors[None, :]).astype(jnp.bfloat16)

    return {
        "conv1_w": conv_w(p["conv1_w"]), "conv1_b": p["conv1_b"].reshape(-1, 1),
        "conv2_w": conv_w(p["conv2_w"]), "conv2_b": p["conv2_b"].reshape(-1, 1),
        # feat / h5 keep PyTorch's NCHW-flat (c, y, x) order -> plain transposes.
        "fc1_w": p["fc1_w"].T, "fc1_b": p["fc1_b"].reshape(1, -1),
        "fc21_22_w": jnp.concatenate([p["fc21_w"].T, p["fc22_w"].T], axis=1),
        "fc21_22_b": jnp.concatenate([p["fc21_b"], p["fc22_b"]]).reshape(1, -1),
        "fc3_w": p["fc3_w"].T, "fc3_b": p["fc3_b"].reshape(1, -1),
        "fc4_w": p["fc4_w"].T, "fc4_b": p["fc4_b"].reshape(1, -1),
        "fc5_w": p["fc5_w"].T, "fc5_b": p["fc5_b"].reshape(1, -1),
        "deconv1_w": deconv_w(p["deconv1_w"]),
        "deconv1_b": jnp.tile(p["deconv1_b"], 4).reshape(-1, 1),
        "deconv2_w": deconv_w(p["deconv2_w"]),
        "deconv2_b": jnp.tile(p["deconv2_b"], 4).reshape(-1, 1),
        "mask28": tap_masks(28), "mask14": tap_masks(14), "mask7": tap_masks(7),
        "pool_sel1": pool_sel(28), "pool_sel2": pool_sel(14),
    }


# ----------------------------- deterministic param setup ------------------------

def init_params(key, ldim):
    def uniform(k, shape, fan_in):
        bound = 1.0 / float(fan_in) ** 0.5
        return jax.random.uniform(k, shape, jnp.float32, -bound, bound)

    spec = [
        ("conv1_w", (8, 1, 3, 3), 9),      ("conv1_b", (8,), 9),
        ("conv2_w", (16, 8, 3, 3), 72),    ("conv2_b", (16,), 72),
        ("fc1_w", (32, 784), 784),         ("fc1_b", (32,), 784),
        ("fc21_w", (ldim, 32), 32),        ("fc21_b", (ldim,), 32),
        ("fc22_w", (ldim, 32), 32),        ("fc22_b", (ldim,), 32),
        ("fc3_w", (32, ldim), ldim),       ("fc3_b", (32,), ldim),
        ("fc4_w", (64, 32), 32),           ("fc4_b", (64,), 32),
        ("fc5_w", (784, 64), 64),          ("fc5_b", (784,), 64),
        ("deconv1_w", (16, 8, 4, 4), 128), ("deconv1_b", (8,), 128),
        ("deconv2_w", (8, 1, 4, 4), 16),   ("deconv2_b", (1,), 16),
    ]
    keys = jax.random.split(key, len(spec))
    return {name: uniform(k, shape, fan_in)
            for k, (name, shape, fan_in) in zip(keys, spec)}


if __name__ == "__main__":
    key = jax.random.PRNGKey(0)
    pkey, xkey, ekey = jax.random.split(key, 3)
    B, ldim = 2, 8

    params = init_params(pkey, ldim)
    packed = pack_params(params)                 # one-time GEMM-layout repack
    # MNIST-like input (the module's fc1 hard-codes the 28x28 spatial size).
    x = jax.random.uniform(xkey, (B, 1, 28, 28), jnp.float32)
    # TODO(synk): torch.randn_like's RNG stream has no JAX equivalent; the Gaussian
    # noise for the reparameterization is drawn with jax.random and fed in explicitly.
    eps = jax.random.normal(ekey, (B, ldim), jnp.float32)

    fwd = jax.jit(digit_vae_forward)
    recon, mu, logvar = fwd(packed, x, eps)
    jax.block_until_ready((recon, mu, logvar))

    assert recon.shape == (B, 1, 28, 28)
    assert mu.shape == (B, ldim) and logvar.shape == (B, ldim)
    assert bool(jnp.all(jnp.isfinite(recon)))
    assert bool(jnp.all(jnp.isfinite(mu))) and bool(jnp.all(jnp.isfinite(logvar)))
    print("KERNEL_OK")
</pallas_src>

<mosaic_0001>
module attributes {stable_mosaic.version = 11 : i64} {
  func.func @_vae_kernel(%arg0: memref<1x1568xf32, #tpu.memory_space<vmem>>, %arg1: memref<2x8xf32, #tpu.memory_space<vmem>>, %arg2: memref<8x9xf32, #tpu.memory_space<vmem>>, %arg3: memref<8x1xf32, #tpu.memory_space<vmem>>, %arg4: memref<16x72xf32, #tpu.memory_space<vmem>>, %arg5: memref<16x1xf32, #tpu.memory_space<vmem>>, %arg6: memref<784x32xf32, #tpu.memory_space<vmem>>, %arg7: memref<1x32xf32, #tpu.memory_space<vmem>>, %arg8: memref<32x16xf32, #tpu.memory_space<vmem>>, %arg9: memref<1x16xf32, #tpu.memory_space<vmem>>, %arg10: memref<8x32xf32, #tpu.memory_space<vmem>>, %arg11: memref<1x32xf32, #tpu.memory_space<vmem>>, %arg12: memref<32x64xf32, #tpu.memory_space<vmem>>, %arg13: memref<1x64xf32, #tpu.memory_space<vmem>>, %arg14: memref<64x784xf32, #tpu.memory_space<vmem>>, %arg15: memref<1x784xf32, #tpu.memory_space<vmem>>, %arg16: memref<32x144xf32, #tpu.memory_space<vmem>>, %arg17: memref<32x1xf32, #tpu.memory_space<vmem>>, %arg18: memref<4x72xf32, #tpu.memory_space<vmem>>, %arg19: memref<4x1xf32, #tpu.memory_space<vmem>>, %arg20: memref<9x784xf32, #tpu.memory_space<vmem>>, %arg21: memref<9x196xf32, #tpu.memory_space<vmem>>, %arg22: memref<9x49xf32, #tpu.memory_space<vmem>>, %arg23: memref<784x196xbf16, #tpu.memory_space<vmem>>, %arg24: memref<196x49xbf16, #tpu.memory_space<vmem>>, %arg25: memref<2x16xf32, #tpu.memory_space<vmem>>, %arg26: memref<16x98xf32, #tpu.memory_space<vmem>>) attributes {dimension_semantics = [], scalar_prefetch = 0 : i64, scratch_operands = 0 : i64, tpu.core_type = #tpu.core_type<tc>} {
    %c0 = arith.constant 0 : index
    %c0_0 = arith.constant 0 : index
    %0 = vector.load %arg20[%c0, %c0_0] : memref<9x784xf32, #tpu.memory_space<vmem>>, vector<9x784xf32>
    %1 = tpu.concatenate %0, %0 in 1 : vector<9x784xf32>, vector<9x784xf32> -> vector<9x1568xf32>
    %c0_1 = arith.constant 0 : index
    %c0_2 = arith.constant 0 : index
    %2 = vector.load %arg21[%c0_1, %c0_2] : memref<9x196xf32, #tpu.memory_space<vmem>>, vector<9x196xf32>
    %3 = tpu.concatenate %2, %2 in 1 : vector<9x196xf32>, vector<9x196xf32> -> vector<9x392xf32>
    %c0_3 = arith.constant 0 : index
    %c0_4 = arith.constant 0 : index
    %4 = vector.load %arg22[%c0_3, %c0_4] : memref<9x49xf32, #tpu.memory_space<vmem>>, vector<9x49xf32>
    %5 = tpu.concatenate %4, %4 in 1 : vector<9x49xf32>, vector<9x49xf32> -> vector<9x98xf32>
    %c0_5 = arith.constant 0 : index
    %c0_6 = arith.constant 0 : index
    %6 = vector.load %arg23[%c0_5, %c0_6] : memref<784x196xbf16, #tpu.memory_space<vmem>>, vector<784x196xbf16>
    %7 = arith.extf %6 : vector<784x196xbf16> to vector<784x196xf32>
    %c0_7 = arith.constant 0 : index
    %c0_8 = arith.constant 0 : index
    %8 = vector.load %arg24[%c0_7, %c0_8] : memref<196x49xbf16, #tpu.memory_space<vmem>>, vector<196x49xbf16>
    %9 = arith.extf %8 : vector<196x49xbf16> to vector<196x49xf32>
    %c0_9 = arith.constant 0 : index
    %c0_10 = arith.constant 0 : index
    %10 = vector.load %arg0[%c0_9, %c0_10] : memref<1x1568xf32, #tpu.memory_space<vmem>>, vector<1x1568xf32>
    %c0_11 = arith.constant 0 : index
    %c0_12 = arith.constant 0 : index
    %11 = vector.load %arg2[%c0_11, %c0_12] : memref<8x9xf32, #tpu.memory_space<vmem>>, vector<8x9xf32>
    %cst = arith.constant 0.000000e+00 : f32
    %12 = vector.broadcast %cst : f32 to vector<1x29xf32>
    %13 = vector.extract_strided_slice %10 {offsets = [0, 0], sizes = [1, 1539], strides = [1, 1]} : vector<1x1568xf32> to vector<1x1539xf32>
    %14 = tpu.concatenate %12, %13 in 1 : vector<1x29xf32>, vector<1x1539xf32> -> vector<1x1568xf32>
    %15 = vector.extract_strided_slice %1 {offsets = [0, 0], sizes = [1, 1568], strides = [1, 1]} : vector<9x1568xf32> to vector<1x1568xf32>
    %16 = arith.mulf %14, %15 : vector<1x1568xf32>
    %cst_13 = arith.constant 0.000000e+00 : f32
    %17 = vector.broadcast %cst_13 : f32 to vector<1x28xf32>
    %18 = vector.extract_strided_slice %10 {offsets = [0, 0], sizes = [1, 1540], strides = [1, 1]} : vector<1x1568xf32> to vector<1x1540xf32>
    %19 = tpu.concatenate %17, %18 in 1 : vector<1x28xf32>, vector<1x1540xf32> -> vector<1x1568xf32>
    %20 = vector.extract_strided_slice %1 {offsets = [1, 0], sizes = [1, 1568], strides = [1, 1]} : vector<9x1568xf32> to vector<1x1568xf32>
    %21 = arith.mulf %19, %20 : vector<1x1568xf32>
    %cst_14 = arith.constant 0.000000e+00 : f32
    %22 = vector.broadcast %cst_14 : f32 to vector<1x27xf32>
    %23 = vector.extract_strided_slice %10 {offsets = [0, 0], sizes = [1, 1541], strides = [1, 1]} : vector<1x1568xf32> to vector<1x1541xf32>
    %24 = tpu.concatenate %22, %23 in 1 : vector<1x27xf32>, vector<1x1541xf32> -> vector<1x1568xf32>
    %25 = vector.extract_strided_slice %1 {offsets = [2, 0], sizes = [1, 1568], strides = [1, 1]} : vector<9x1568xf32> to vector<1x1568xf32>
    %26 = arith.mulf %24, %25 : vector<1x1568xf32>
    %cst_15 = arith.constant 0.000000e+00 : f32
    %27 = vector.broadcast %cst_15 : f32 to vector<1x1xf32>
    %28 = vector.extract_strided_slice %10 {offsets = [0, 0], sizes = [1, 1567], strides = [1, 1]} : vector<1x1568xf32> to vector<1x1567xf32>
    %29 = tpu.concatenate %27, %28 in 1 : vector<1x1xf32>, vector<1x1567xf32> -> vector<1x1568xf32>
    %30 = vector.extract_strided_slice %1 {offsets = [3, 0], sizes = [1, 1568], strides = [1, 1]} : vector<9x1568xf32> to vector<1x1568xf32>
    %31 = arith.mulf %29, %30 : vector<1x1568xf32>
    %32 = vector.extract_strided_slice %1 {offsets = [4, 0], sizes = [1, 1568], strides = [1, 1]} : vector<9x1568xf32> to vector<1x1568xf32>
    %33 = arith.mulf %10, %32 : vector<1x1568xf32>
    %cst_16 = arith.constant 0.000000e+00 : f32
    %34 = vector.broadcast %cst_16 : f32 to vector<1x1xf32>
    %35 = vector.extract_strided_slice %10 {offsets = [0, 1], sizes = [1, 1567], strides = [1, 1]} : vector<1x1568xf32> to vector<1x1567xf32>
    %36 = tpu.concatenate %35, %34 in 1 : vector<1x1567xf32>, vector<1x1xf32> -> vector<1x1568xf32>
    %37 = vector.extract_strided_slice %1 {offsets = [5, 0], sizes = [1, 1568], strides = [1, 1]} : vector<9x1568xf32> to vector<1x1568xf32>
    %38 = arith.mulf %36, %37 : vector<1x1568xf32>
    %cst_17 = arith.constant 0.000000e+00 : f32
    %39 = vector.broadcast %cst_17 : f32 to vector<1x27xf32>
    %40 = vector.extract_strided_slice %10 {offsets = [0, 27], sizes = [1, 1541], strides = [1, 1]} : vector<1x1568xf32> to vector<1x1541xf32>
    %41 = tpu.concatenate %40, %39 in 1 : vector<1x1541xf32>, vector<1x27xf32> -> vector<1x1568xf32>
    %42 = vector.extract_strided_slice %1 {offsets = [6, 0], sizes = [1, 1568], strides = [1, 1]} : vector<9x1568xf32> to vector<1x1568xf32>
    %43 = arith.mulf %41, %42 : vector<1x1568xf32>
    %cst_18 = arith.constant 0.000000e+00 : f32
    %44 = vector.broadcast %cst_18 : f32 to vector<1x28xf32>
    %45 = vector.extract_strided_slice %10 {offsets = [0, 28], sizes = [1, 1540], strides = [1, 1]} : vector<1x1568xf32> to vector<1x1540xf32>
    %46 = tpu.concatenate %45, %44 in 1 : vector<1x1540xf32>, vector<1x28xf32> -> vector<1x1568xf32>
    %47 = vector.extract_strided_slice %1 {offsets = [7, 0], sizes = [1, 1568], strides = [1, 1]} : vector<9x1568xf32> to vector<1x1568xf32>
    %48 = arith.mulf %46, %47 : vector<1x1568xf32>
    %cst_19 = arith.constant 0.000000e+00 : f32
    %49 = vector.broadcast %cst_19 : f32 to vector<1x29xf32>
    %50 = vector.extract_strided_slice %10 {offsets = [0, 29], sizes = [1, 1539], strides = [1, 1]} : vector<1x1568xf32> to vector<1x1539xf32>
    %51 = tpu.concatenate %50, %49 in 1 : vector<1x1539xf32>, vector<1x29xf32> -> vector<1x1568xf32>
    %52 = vector.extract_strided_slice %1 {offsets = [8, 0], sizes = [1, 1568], strides = [1, 1]} : vector<9x1568xf32> to vector<1x1568xf32>
    %53 = arith.mulf %51, %52 : vector<1x1568xf32>
    %54 = tpu.concatenate %16, %21, %26, %31, %33, %38, %43, %48, %53 in 0 : vector<1x1568xf32>, vector<1x1568xf32>, vector<1x1568xf32>, vector<1x1568xf32>, vector<1x1568xf32>, vector<1x1568xf32>, vector<1x1568xf32>, vector<1x1568xf32>, vector<1x1568xf32> -> vector<9x1568xf32>
    %cst_20 = arith.constant dense<0.000000e+00> : vector<8x1568xf32>
    %55 = tpu.matmul %11, %54, %cst_20 {dimension_numbers = #tpu.dot_dimension_numbers<[1], [0], [0], [1], [0, 0, 1, 1], [], []>} : vector<8x9xf32>, vector<9x1568xf32>, vector<8x1568xf32> -> vector<8x1568xf32>
    %cst_21 = arith.constant 0.000000e+00 : f32
    %56 = vector.broadcast %cst_21 : f32 to vector<8x1xf32>
    %57 = vector.extract_strided_slice %55 {offsets = [0, 1], sizes = [8, 1567], strides = [1, 1]} : vector<8x1568xf32> to vector<8x1567xf32>
    %58 = tpu.concatenate %57, %56 in 1 : vector<8x1567xf32>, vector<8x1xf32> -> vector<8x1568xf32>
    %59 = arith.maximumf %55, %58 : vector<8x1568xf32>
    %cst_22 = arith.constant 0.000000e+00 : f32
    %60 = vector.broadcast %cst_22 : f32 to vector<8x28xf32>
    %61 = vector.extract_strided_slice %55 {offsets = [0, 28], sizes = [8, 1540], strides = [1, 1]} : vector<8x1568xf32> to vector<8x1540xf32>
    %62 = tpu.concatenate %61, %60 in 1 : vector<8x1540xf32>, vector<8x28xf32> -> vector<8x1568xf32>
    %cst_23 = arith.constant 0.000000e+00 : f32
    %63 = vector.broadcast %cst_23 : f32 to vector<8x29xf32>
    %64 = vector.extract_strided_slice %55 {offsets = [0, 29], sizes = [8, 1539], strides = [1, 1]} : vector<8x1568xf32> to vector<8x1539xf32>
    %65 = tpu.concatenate %64, %63 in 1 : vector<8x1539xf32>, vector<8x29xf32> -> vector<8x1568xf32>
    %66 = arith.maximumf %62, %65 : vector<8x1568xf32>
    %67 = arith.maximumf %59, %66 : vector<8x1568xf32>
    %68 = vector.extract_strided_slice %67 {offsets = [0, 0], sizes = [8, 784], strides = [1, 1]} : vector<8x1568xf32> to vector<8x784xf32>
    %cst_24 = arith.constant dense<0.000000e+00> : vector<8x196xf32>
    %69 = tpu.matmul %68, %7, %cst_24 {dimension_numbers = #tpu.dot_dimension_numbers<[1], [0], [0], [1], [0, 0, 1, 1], [], []>} : vector<8x784xf32>, vector<784x196xf32>, vector<8x196xf32> -> vector<8x196xf32>
    %70 = vector.extract_strided_slice %67 {offsets = [0, 784], sizes = [8, 784], strides = [1, 1]} : vector<8x1568xf32> to vector<8x784xf32>
    %cst_25 = arith.constant dense<0.000000e+00> : vector<8x196xf32>
    %71 = tpu.matmul %70, %7, %cst_25 {dimension_numbers = #tpu.dot_dimension_numbers<[1], [0], [0], [1], [0, 0, 1, 1], [], []>} : vector<8x784xf32>, vector<784x196xf32>, vector<8x196xf32> -> vector<8x196xf32>
    %72 = tpu.concatenate %69, %71 in 1 : vector<8x196xf32>, vector<8x196xf32> -> vector<8x392xf32>
    %c0_26 = arith.constant 0 : index
    %c0_27 = arith.constant 0 : index
    %73 = vector.load %arg3[%c0_26, %c0_27] : memref<8x1xf32, #tpu.memory_space<vmem>>, vector<8x1xf32>
    %74 = vector.broadcast %73 : vector<8x1xf32> to vector<8x392xf32>
    %75 = arith.addf %72, %74 : vector<8x392xf32>
    %c0_28 = arith.constant 0 : index
    %c0_29 = arith.constant 0 : index
    %76 = vector.load %arg4[%c0_28, %c0_29] : memref<16x72xf32, #tpu.memory_space<vmem>>, vector<16x72xf32>
    %cst_30 = arith.constant 0.000000e+00 : f32
    %77 = vector.broadcast %cst_30 : f32 to vector<8x15xf32>
    %78 = vector.extract_strided_slice %75 {offsets = [0, 0], sizes = [8, 377], strides = [1, 1]} : vector<8x392xf32> to vector<8x377xf32>
    %79 = tpu.concatenate %77, %78 in 1 : vector<8x15xf32>, vector<8x377xf32> -> vector<8x392xf32>
    %80 = vector.extract_strided_slice %3 {offsets = [0, 0], sizes = [1, 392], strides = [1, 1]} : vector<9x392xf32> to vector<1x392xf32>
    %81 = vector.broadcast %80 : vector<1x392xf32> to vector<8x392xf32>
    %82 = arith.mulf %79, %81 : vector<8x392xf32>
    %cst_31 = arith.constant 0.000000e+00 : f32
    %83 = vector.broadcast %cst_31 : f32 to vector<8x14xf32>
    %84 = vector.extract_strided_slice %75 {offsets = [0, 0], sizes = [8, 378], strides = [1, 1]} : vector<8x392xf32> to vector<8x378xf32>
    %85 = tpu.concatenate %83, %84 in 1 : vector<8x14xf32>, vector<8x378xf32> -> vector<8x392xf32>
    %86 = vector.extract_strided_slice %3 {offsets = [1, 0], sizes = [1, 392], strides = [1, 1]} : vector<9x392xf32> to vector<1x392xf32>
    %87 = vector.broadcast %86 : vector<1x392xf32> to vector<8x392xf32>
    %88 = arith.mulf %85, %87 : vector<8x392xf32>
    %cst_32 = arith.constant 0.000000e+00 : f32
    %89 = vector.broadcast %cst_32 : f32 to vector<8x13xf32>
    %90 = vector.extract_strided_slice %75 {offsets = [0, 0], sizes = [8, 379], strides = [1, 1]} : vector<8x392xf32> to vector<8x379xf32>
    %91 = tpu.concatenate %89, %90 in 1 : vector<8x13xf32>, vector<8x379xf32> -> vector<8x392xf32>
    %92 = vector.extract_strided_slice %3 {offsets = [2, 0], sizes = [1, 392], strides = [1, 1]} : vector<9x392xf32> to vector<1x392xf32>
    %93 = vector.broadcast %92 : vector<1x392xf32> to vector<8x392xf32>
    %94 = arith.mulf %91, %93 : vector<8x392xf32>
    %cst_33 = arith.constant 0.000000e+00 : f32
    %95 = vector.broadcast %cst_33 : f32 to vector<8x1xf32>
    %96 = vector.extract_strided_slice %75 {offsets = [0, 0], sizes = [8, 391], strides = [1, 1]} : vector<8x392xf32> to vector<8x391xf32>
    %97 = tpu.concatenate %95, %96 in 1 : vector<8x1xf32>, vector<8x391xf32> -> vector<8x392xf32>
    %98 = vector.extract_strided_slice %3 {offsets = [3, 0], sizes = [1, 392], strides = [1, 1]} : vector<9x392xf32> to vector<1x392xf32>
    %99 = vector.broadcast %98 : vector<1x392xf32> to vector<8x392xf32>
    %100 = arith.mulf %97, %99 : vector<8x392xf32>
    %101 = vector.extract_strided_slice %3 {offsets = [4, 0], sizes = [1, 392], strides = [1, 1]} : vector<9x392xf32> to vector<1x392xf32>
    %102 = vector.broadcast %101 : vector<1x392xf32> to vector<8x392xf32>
    %103 = arith.mulf %75, %102 : vector<8x392xf32>
    %cst_34 = arith.constant 0.000000e+00 : f32
    %104 = vector.broadcast %cst_34 : f32 to vector<8x1xf32>
    %105 = vector.extract_strided_slice %75 {offsets = [0, 1], sizes = [8, 391], strides = [1, 1]} : vector<8x392xf32> to vector<8x391xf32>
    %106 = tpu.concatenate %105, %104 in 1 : vector<8x391xf32>, vector<8x1xf32> -> vector<8x392xf32>
    %107 = vector.extract_strided_slice %3 {offsets = [5, 0], sizes = [1, 392], strides = [1, 1]} : vector<9x392xf32> to vector<1x392xf32>
    %108 = vector.broadcast %107 : vector<1x392xf32> to vector<8x392xf32>
    %109 = arith.mulf %106, %108 : vector<8x392xf32>
    %cst_35 = arith.constant 0.000000e+00 : f32
    %110 = vector.broadcast %cst_35 : f32 to vector<8x13xf32>
    %111 = vector.extract_strided_slice %75 {offsets = [0, 13], sizes = [8, 379], strides = [1, 1]} : vector<8x392xf32> to vector<8x379xf32>
    %112 = tpu.concatenate %111, %110 in 1 : vector<8x379xf32>, vector<8x13xf32> -> vector<8x392xf32>
    %113 = vector.extract_strided_slice %3 {offsets = [6, 0], sizes = [1, 392], strides = [1, 1]} : vector<9x392xf32> to vector<1x392xf32>
    %114 = vector.broadcast %113 : vector<1x392xf32> to vector<8x392xf32>
    %115 = arith.mulf %112, %114 : vector<8x392xf32>
    %cst_36 = arith.constant 0.000000e+00 : f32
    %116 = vector.broadcast %cst_36 : f32 to vector<8x14xf32>
    %117 = vector.extract_strided_slice %75 {offsets = [0, 14], sizes = [8, 378], strides = [1, 1]} : vector<8x392xf32> to vector<8x378xf32>
    %118 = tpu.concatenate %117, %116 in 1 : vector<8x378xf32>, vector<8x14xf32> -> vector<8x392xf32>
    %119 = vector.extract_strided_slice %3 {offsets = [7, 0], sizes = [1, 392], strides = [1, 1]} : vector<9x392xf32> to vector<1x392xf32>
    %120 = vector.broadcast %119 : vector<1x392xf32> to vector<8x392xf32>
    %121 = arith.mulf %118, %120 : vector<8x392xf32>
    %cst_37 = arith.constant 0.000000e+00 : f32
    %122 = vector.broadcast %cst_37 : f32 to vector<8x15xf32>
    %123 = vector.extract_strided_slice %75 {offsets = [0, 15], sizes = [8, 377], strides = [1, 1]} : vector<8x392xf32> to vector<8x377xf32>
    %124 = tpu.concatenate %123, %122 in 1 : vector<8x377xf32>, vector<8x15xf32> -> vector<8x392xf32>
    %125 = vector.extract_strided_slice %3 {offsets = [8, 0], sizes = [1, 392], strides = [1, 1]} : vector<9x392xf32> to vector<1x392xf32>
    %126 = vector.broadcast %125 : vector<1x392xf32> to vector<8x392xf32>
    %127 = arith.mulf %124, %126 : vector<8x392xf32>
    %128 = tpu.concatenate %82, %88, %94, %100, %103, %109, %115, %121, %127 in 0 : vector<8x392xf32>, vector<8x392xf32>, vector<8x392xf32>, vector<8x392xf32>, vector<8x392xf32>, vector<8x392xf32>, vector<8x392xf32>, vector<8x392xf32>, vector<8x392xf32> -> vector<72x392xf32>
    %cst_38 = arith.constant dense<0.000000e+00> : vector<16x392xf32>
    %129 = tpu.matmul %76, %128, %cst_38 {dimension_numbers = #tpu.dot_dimension_numbers<[1], [0], [0], [1], [0, 0, 1, 1], [], []>} : vector<16x72xf32>, vector<72x392xf32>, vector<16x392xf32> -> vector<16x392xf32>
    %cst_39 = arith.constant 0.000000e+00 : f32
    %130 = vector.broadcast %cst_39 : f32 to vector<16x1xf32>
    %131 = vector.extract_strided_slice %129 {offsets = [0, 1], sizes = [16, 391], strides = [1, 1]} : vector<16x392xf32> to vector<16x391xf32>
    %132 = tpu.concatenate %131, %130 in 1 : vector<16x391xf32>, vector<16x1xf32> -> vector<16x392xf32>
    %133 = arith.maximumf %129, %132 : vector<16x392xf32>
    %cst_40 = arith.constant 0.000000e+00 : f32
    %134 = vector.broadcast %cst_40 : f32 to vector<16x14xf32>
    %135 = vector.extract_strided_slice %129 {offsets = [0, 14], sizes = [16, 378], strides = [1, 1]} : vector<16x392xf32> to vector<16x378xf32>
    %136 = tpu.concatenate %135, %134 in 1 : vector<16x378xf32>, vector<16x14xf32> -> vector<16x392xf32>
    %cst_41 = arith.constant 0.000000e+00 : f32
    %137 = vector.broadcast %cst_41 : f32 to vector<16x15xf32>
    %138 = vector.extract_strided_slice %129 {offsets = [0, 15], sizes = [16, 377], strides = [1, 1]} : vector<16x392xf32> to vector<16x377xf32>
    %139 = tpu.concatenate %138, %137 in 1 : vector<16x377xf32>, vector<16x15xf32> -> vector<16x392xf32>
    %140 = arith.maximumf %136, %139 : vector<16x392xf32>
    %141 = arith.maximumf %133, %140 : vector<16x392xf32>
    %142 = vector.extract_strided_slice %141 {offsets = [0, 0], sizes = [16, 196], strides = [1, 1]} : vector<16x392xf32> to vector<16x196xf32>
    %cst_42 = arith.constant dense<0.000000e+00> : vector<16x49xf32>
    %143 = tpu.matmul %142, %9, %cst_42 {dimension_numbers = #tpu.dot_dimension_numbers<[1], [0], [0], [1], [0, 0, 1, 1], [], []>} : vector<16x196xf32>, vector<196x49xf32>, vector<16x49xf32> -> vector<16x49xf32>
    %144 = vector.extract_strided_slice %141 {offsets = [0, 196], sizes = [16, 196], strides = [1, 1]} : vector<16x392xf32> to vector<16x196xf32>
    %cst_43 = arith.constant dense<0.000000e+00> : vector<16x49xf32>
    %145 = tpu.matmul %144, %9, %cst_43 {dimension_numbers = #tpu.dot_dimension_numbers<[1], [0], [0], [1], [0, 0, 1, 1], [], []>} : vector<16x196xf32>, vector<196x49xf32>, vector<16x49xf32> -> vector<16x49xf32>
    %146 = tpu.concatenate %143, %145 in 1 : vector<16x49xf32>, vector<16x49xf32> -> vector<16x98xf32>
    %c0_44 = arith.constant 0 : index
    %c0_45 = arith.constant 0 : index
    %147 = vector.load %arg5[%c0_44, %c0_45] : memref<16x1xf32, #tpu.memory_space<vmem>>, vector<16x1xf32>
    %148 = vector.broadcast %147 : vector<16x1xf32> to vector<16x98xf32>
    %149 = arith.addf %146, %148 : vector<16x98xf32>
    %150 = vector.extract_strided_slice %149 {offsets = [0, 0], sizes = [1, 49], strides = [1, 1]} : vector<16x98xf32> to vector<1x49xf32>
    %151 = vector.extract_strided_slice %149 {offsets = [1, 0], sizes = [1, 49], strides = [1, 1]} : vector<16x98xf32> to vector<1x49xf32>
    %152 = vector.extract_strided_slice %149 {offsets = [2, 0], sizes = [1, 49], strides = [1, 1]} : vector<16x98xf32> to vector<1x49xf32>
    %153 = vector.extract_strided_slice %149 {offsets = [3, 0], sizes = [1, 49], strides = [1, 1]} : vector<16x98xf32> to vector<1x49xf32>
    %154 = vector.extract_strided_slice %149 {offsets = [4, 0], sizes = [1, 49], strides = [1, 1]} : vector<16x98xf32> to vector<1x49xf32>
    %155 = vector.extract_strided_slice %149 {offsets = [5, 0], sizes = [1, 49], strides = [1, 1]} : vector<16x98xf32> to vector<1x49xf32>
    %156 = vector.extract_strided_slice %149 {offsets = [6, 0], sizes = [1, 49], strides = [1, 1]} : vector<16x98xf32> to vector<1x49xf32>
    %157 = vector.extract_strided_slice %149 {offsets = [7, 0], sizes = [1, 49], strides = [1, 1]} : vector<16x98xf32> to vector<1x49xf32>
    %158 = vector.extract_strided_slice %149 {offsets = [8, 0], sizes = [1, 49], strides = [1, 1]} : vector<16x98xf32> to vector<1x49xf32>
    %159 = vector.extract_strided_slice %149 {offsets = [9, 0], sizes = [1, 49], strides = [1, 1]} : vector<16x98xf32> to vector<1x49xf32>
    %160 = vector.extract_strided_slice %149 {offsets = [10, 0], sizes = [1, 49], strides = [1, 1]} : vector<16x98xf32> to vector<1x49xf32>
    %161 = vector.extract_strided_slice %149 {offsets = [11, 0], sizes = [1, 49], strides = [1, 1]} : vector<16x98xf32> to vector<1x49xf32>
    %162 = vector.extract_strided_slice %149 {offsets = [12, 0], sizes = [1, 49], strides = [1, 1]} : vector<16x98xf32> to vector<1x49xf32>
    %163 = vector.extract_strided_slice %149 {offsets = [13, 0], sizes = [1, 49], strides = [1, 1]} : vector<16x98xf32> to vector<1x49xf32>
    %164 = vector.extract_strided_slice %149 {offsets = [14, 0], sizes = [1, 49], strides = [1, 1]} : vector<16x98xf32> to vector<1x49xf32>
    %165 = vector.extract_strided_slice %149 {offsets = [15, 0], sizes = [1, 49], strides = [1, 1]} : vector<16x98xf32> to vector<1x49xf32>
    %166 = tpu.concatenate %150, %151, %152, %153, %154, %155, %156, %157, %158, %159, %160, %161, %162, %163, %164, %165 in 1 : vector<1x49xf32>, vector<1x49xf32>, vector<1x49xf32>, vector<1x49xf32>, vector<1x49xf32>, vector<1x49xf32>, vector<1x49xf32>, vector<1x49xf32>, vector<1x49xf32>, vector<1x49xf32>, vector<1x49xf32>, vector<1x49xf32>, vector<1x49xf32>, vector<1x49xf32>, vector<1x49xf32>, vector<1x49xf32> -> vector<1x784xf32>
    %167 = vector.extract_strided_slice %149 {offsets = [0, 49], sizes = [1, 49], strides = [1, 1]} : vector<16x98xf32> to vector<1x49xf32>
    %168 = vector.extract_strided_slice %149 {offsets = [1, 49], sizes = [1, 49], strides = [1, 1]} : vector<16x98xf32> to vector<1x49xf32>
    %169 = vector.extract_strided_slice %149 {offsets = [2, 49], sizes = [1, 49], strides = [1, 1]} : vector<16x98xf32> to vector<1x49xf32>
    %170 = vector.extract_strided_slice %149 {offsets = [3, 49], sizes = [1, 49], strides = [1, 1]} : vector<16x98xf32> to vector<1x49xf32>
    %171 = vector.extract_strided_slice %149 {offsets = [4, 49], sizes = [1, 49], strides = [1, 1]} : vector<16x98xf32> to vector<1x49xf32>
    %172 = vector.extract_strided_slice %149 {offsets = [5, 49], sizes = [1, 49], strides = [1, 1]} : vector<16x98xf32> to vector<1x49xf32>
    %173 = vector.extract_strided_slice %149 {offsets = [6, 49], sizes = [1, 49], strides = [1, 1]} : vector<16x98xf32> to vector<1x49xf32>
    %174 = vector.extract_strided_slice %149 {offsets = [7, 49], sizes = [1, 49], strides = [1, 1]} : vector<16x98xf32> to vector<1x49xf32>
    %175 = vector.extract_strided_slice %149 {offsets = [8, 49], sizes = [1, 49], strides = [1, 1]} : vector<16x98xf32> to vector<1x49xf32>
    %176 = vector.extract_strided_slice %149 {offsets = [9, 49], sizes = [1, 49], strides = [1, 1]} : vector<16x98xf32> to vector<1x49xf32>
    %177 = vector.extract_strided_slice %149 {offsets = [10, 49], sizes = [1, 49], strides = [1, 1]} : vector<16x98xf32> to vector<1x49xf32>
    %178 = vector.extract_strided_slice %149 {offsets = [11, 49], sizes = [1, 49], strides = [1, 1]} : vector<16x98xf32> to vector<1x49xf32>
    %179 = vector.extract_strided_slice %149 {offsets = [12, 49], sizes = [1, 49], strides = [1, 1]} : vector<16x98xf32> to vector<1x49xf32>
    %180 = vector.extract_strided_slice %149 {offsets = [13, 49], sizes = [1, 49], strides = [1, 1]} : vector<16x98xf32> to vector<1x49xf32>
    %181 = vector.extract_strided_slice %149 {offsets = [14, 49], sizes = [1, 49], strides = [1, 1]} : vector<16x98xf32> to vector<1x49xf32>
    %182 = vector.extract_strided_slice %149 {offsets = [15, 49], sizes = [1, 49], strides = [1, 1]} : vector<16x98xf32> to vector<1x49xf32>
    %183 = tpu.concatenate %167, %168, %169, %170, %171, %172, %173, %174, %175, %176, %177, %178, %179, %180, %181, %182 in 1 : vector<1x49xf32>, vector<1x49xf32>, vector<1x49xf32>, vector<1x49xf32>, vector<1x49xf32>, vector<1x49xf32>, vector<1x49xf32>, vector<1x49xf32>, vector<1x49xf32>, vector<1x49xf32>, vector<1x49xf32>, vector<1x49xf32>, vector<1x49xf32>, vector<1x49xf32>, vector<1x49xf32>, vector<1x49xf32> -> vector<1x784xf32>
    %184 = tpu.concatenate %166, %183 in 0 : vector<1x784xf32>, vector<1x784xf32> -> vector<2x784xf32>
    %c0_46 = arith.constant 0 : index
    %c0_47 = arith.constant 0 : index
    %185 = vector.load %arg6[%c0_46, %c0_47] : memref<784x32xf32, #tpu.memory_space<vmem>>, vector<784x32xf32>
    %cst_48 = arith.constant dense<0.000000e+00> : vector<2x32xf32>
    %186 = tpu.matmul %184, %185, %cst_48 {dimension_numbers = #tpu.dot_dimension_numbers<[1], [0], [0], [1], [0, 0, 1, 1], [], []>} : vector<2x784xf32>, vector<784x32xf32>, vector<2x32xf32> -> vector<2x32xf32>
    %c0_49 = arith.constant 0 : index
    %c0_50 = arith.constant 0 : index
    %187 = vector.load %arg7[%c0_49, %c0_50] : memref<1x32xf32, #tpu.memory_space<vmem>>, vector<1x32xf32>
    %188 = vector.broadcast %187 : vector<1x32xf32> to vector<2x32xf32>
    %189 = arith.addf %186, %188 : vector<2x32xf32>
    %cst_51 = arith.constant 0.000000e+00 : f32
    %190 = vector.broadcast %cst_51 : f32 to vector<2x32xf32>
    %191 = arith.maximumf %189, %190 : vector<2x32xf32>
    %c0_52 = arith.constant 0 : index
    %c0_53 = arith.constant 0 : index
    %192 = vector.load %arg8[%c0_52, %c0_53] : memref<32x16xf32, #tpu.memory_space<vmem>>, vector<32x16xf32>
    %cst_54 = arith.constant dense<0.000000e+00> : vector<2x16xf32>
    %193 = tpu.matmul %191, %192, %cst_54 {dimension_numbers = #tpu.dot_dimension_numbers<[1], [0], [0], [1], [0, 0, 1, 1], [], []>} : vector<2x32xf32>, vector<32x16xf32>, vector<2x16xf32> -> vector<2x16xf32>
    %c0_55 = arith.constant 0 : index
    %c0_56 = arith.constant 0 : index
    %194 = vector.load %arg9[%c0_55, %c0_56] : memref<1x16xf32, #tpu.memory_space<vmem>>, vector<1x16xf32>
    %195 = vector.broadcast %194 : vector<1x16xf32> to vector<2x16xf32>
    %196 = arith.addf %193, %195 : vector<2x16xf32>
    %c0_57 = arith.constant 0 : index
    %c0_58 = arith.constant 0 : index
    %197 = vector.load %arg25[%c0_57, %c0_58] : memref<2x16xf32, #tpu.memory_space<vmem>>, vector<2x16xf32>
    tpu.vector_store %arg25[%c0_57, %c0_58], %196 {strides = array<i32>} : memref<2x16xf32, #tpu.memory_space<vmem>>, vector<2x16xf32>,
    %198 = vector.extract_strided_slice %196 {offsets = [0, 0], sizes = [2, 8], strides = [1, 1]} : vector<2x16xf32> to vector<2x8xf32>
    %199 = vector.extract_strided_slice %196 {offsets = [0, 8], sizes = [2, 8], strides = [1, 1]} : vector<2x16xf32> to vector<2x8xf32>
    %cst_59 = arith.constant 5.000000e-01 : f32
    %200 = vector.broadcast %cst_59 : f32 to vector<2x8xf32>
    %201 = arith.mulf %200, %199 : vector<2x8xf32>
    %202 = math.exp %201 : vector<2x8xf32>
    %c0_60 = arith.constant 0 : index
    %c0_61 = arith.constant 0 : index
    %203 = vector.load %arg1[%c0_60, %c0_61] : memref<2x8xf32, #tpu.memory_space<vmem>>, vector<2x8xf32>
    %204 = arith.mulf %202, %203 : vector<2x8xf32>
    %205 = arith.addf %198, %204 : vector<2x8xf32>
    %c0_62 = arith.constant 0 : index
    %c0_63 = arith.constant 0 : index
    %206 = vector.load %arg10[%c0_62, %c0_63] : memref<8x32xf32, #tpu.memory_space<vmem>>, vector<8x32xf32>
    %cst_64 = arith.constant dense<0.000000e+00> : vector<2x32xf32>
    %207 = tpu.matmul %205, %206, %cst_64 {dimension_numbers = #tpu.dot_dimension_numbers<[1], [0], [0], [1], [0, 0, 1, 1], [], []>} : vector<2x8xf32>, vector<8x32xf32>, vector<2x32xf32> -> vector<2x32xf32>
    %c0_65 = arith.constant 0 : index
    %c0_66 = arith.constant 0 : index
    %208 = vector.load %arg11[%c0_65, %c0_66] : memref<1x32xf32, #tpu.memory_space<vmem>>, vector<1x32xf32>
    %209 = vector.broadcast %208 : vector<1x32xf32> to vector<2x32xf32>
    %210 = arith.addf %207, %209 : vector<2x32xf32>
    %cst_67 = arith.constant 0.000000e+00 : f32
    %211 = vector.broadcast %cst_67 : f32 to vector<2x32xf32>
    %212 = arith.maximumf %210, %211 : vector<2x32xf32>
    %c0_68 = arith.constant 0 : index
    %c0_69 = arith.constant 0 : index
    %213 = vector.load %arg12[%c0_68, %c0_69] : memref<32x64xf32, #tpu.memory_space<vmem>>, vector<32x64xf32>
    %cst_70 = arith.constant dense<0.000000e+00> : vector<2x64xf32>
    %214 = tpu.matmul %212, %213, %cst_70 {dimension_numbers = #tpu.dot_dimension_numbers<[1], [0], [0], [1], [0, 0, 1, 1], [], []>} : vector<2x32xf32>, vector<32x64xf32>, vector<2x64xf32> -> vector<2x64xf32>
    %c0_71 = arith.constant 0 : index
    %c0_72 = arith.constant 0 : index
    %215 = vector.load %arg13[%c0_71, %c0_72] : memref<1x64xf32, #tpu.memory_space<vmem>>, vector<1x64xf32>
    %216 = vector.broadcast %215 : vector<1x64xf32> to vector<2x64xf32>
    %217 = arith.addf %214, %216 : vector<2x64xf32>
    %cst_73 = arith.constant 0.000000e+00 : f32
    %218 = vector.broadcast %cst_73 : f32 to vector<2x64xf32>
    %219 = arith.maximumf %217, %218 : vector<2x64xf32>
    %c0_74 = arith.constant 0 : index
    %c0_75 = arith.constant 0 : index
    %220 = vector.load %arg14[%c0_74, %c0_75] : memref<64x784xf32, #tpu.memory_space<vmem>>, vector<64x784xf32>
    %cst_76 = arith.constant dense<0.000000e+00> : vector<2x784xf32>
    %221 = tpu.matmul %219, %220, %cst_76 {dimension_numbers = #tpu.dot_dimension_numbers<[1], [0], [0], [1], [0, 0, 1, 1], [], []>} : vector<2x64xf32>, vector<64x784xf32>, vector<2x784xf32> -> vector<2x784xf32>
    %c0_77 = arith.constant 0 : index
    %c0_78 = arith.constant 0 : index
    %222 = vector.load %arg15[%c0_77, %c0_78] : memref<1x784xf32, #tpu.memory_space<vmem>>, vector<1x784xf32>
    %223 = vector.broadcast %222 : vector<1x784xf32> to vector<2x784xf32>
    %224 = arith.addf %221, %223 : vector<2x784xf32>
    %cst_79 = arith.constant 0.000000e+00 : f32
    %225 = vector.broadcast %cst_79 : f32 to vector<2x784xf32>
    %226 = arith.maximumf %224, %225 : vector<2x784xf32>
    %227 = vector.extract_strided_slice %226 {offsets = [0, 0], sizes = [1, 49], strides = [1, 1]} : vector<2x784xf32> to vector<1x49xf32>
    %228 = vector.extract_strided_slice %226 {offsets = [0, 49], sizes = [1, 49], strides = [1, 1]} : vector<2x784xf32> to vector<1x49xf32>
    %229 = vector.extract_strided_slice %226 {offsets = [0, 98], sizes = [1, 49], strides = [1, 1]} : vector<2x784xf32> to vector<1x49xf32>
    %230 = vector.extract_strided_slice %226 {offsets = [0, 147], sizes = [1, 49], strides = [1, 1]} : vector<2x784xf32> to vector<1x49xf32>
    %231 = vector.extract_strided_slice %226 {offsets = [0, 196], sizes = [1, 49], strides = [1, 1]} : vector<2x784xf32> to vector<1x49xf32>
    %232 = vector.extract_strided_slice %226 {offsets = [0, 245], sizes = [1, 49], strides = [1, 1]} : vector<2x784xf32> to vector<1x49xf32>
    %233 = vector.extract_strided_slice %226 {offsets = [0, 294], sizes = [1, 49], strides = [1, 1]} : vector<2x784xf32> to vector<1x49xf32>
    %234 = vector.extract_strided_slice %226 {offsets = [0, 343], sizes = [1, 49], strides = [1, 1]} : vector<2x784xf32> to vector<1x49xf32>
    %235 = vector.extract_strided_slice %226 {offsets = [0, 392], sizes = [1, 49], strides = [1, 1]} : vector<2x784xf32> to vector<1x49xf32>
    %236 = vector.extract_strided_slice %226 {offsets = [0, 441], sizes = [1, 49], strides = [1, 1]} : vector<2x784xf32> to vector<1x49xf32>
    %237 = vector.extract_strided_slice %226 {offsets = [0, 490], sizes = [1, 49], strides = [1, 1]} : vector<2x784xf32> to vector<1x49xf32>
    %238 = vector.extract_strided_slice %226 {offsets = [0, 539], sizes = [1, 49], strides = [1, 1]} : vector<2x784xf32> to vector<1x49xf32>
    %239 = vector.extract_strided_slice %226 {offsets = [0, 588], sizes = [1, 49], strides = [1, 1]} : vector<2x784xf32> to vector<1x49xf32>
    %240 = vector.extract_strided_slice %226 {offsets = [0, 637], sizes = [1, 49], strides = [1, 1]} : vector<2x784xf32> to vector<1x49xf32>
    %241 = vector.extract_strided_slice %226 {offsets = [0, 686], sizes = [1, 49], strides = [1, 1]} : vector<2x784xf32> to vector<1x49xf32>
    %242 = vector.extract_strided_slice %226 {offsets = [0, 735], sizes = [1, 49], strides = [1, 1]} : vector<2x784xf32> to vector<1x49xf32>
    %243 = tpu.concatenate %227, %228, %229, %230, %231, %232, %233, %234, %235, %236, %237, %238, %239, %240, %241, %242 in 0 : vector<1x49xf32>, vector<1x49xf32>, vector<1x49xf32>, vector<1x49xf32>, vector<1x49xf32>, vector<1x49xf32>, vector<1x49xf32>, vector<1x49xf32>, vector<1x49xf32>, vector<1x49xf32>, vector<1x49xf32>, vector<1x49xf32>, vector<1x49xf32>, vector<1x49xf32>, vector<1x49xf32>, vector<1x49xf32> -> vector<16x49xf32>
    %244 = vector.extract_strided_slice %226 {offsets = [1, 0], sizes = [1, 49], strides = [1, 1]} : vector<2x784xf32> to vector<1x49xf32>
    %245 = vector.extract_strided_slice %226 {offsets = [1, 49], sizes = [1, 49], strides = [1, 1]} : vector<2x784xf32> to vector<1x49xf32>
    %246 = vector.extract_strided_slice %226 {offsets = [1, 98], sizes = [1, 49], strides = [1, 1]} : vector<2x784xf32> to vector<1x49xf32>
    %247 = vector.extract_strided_slice %226 {offsets = [1, 147], sizes = [1, 49], strides = [1, 1]} : vector<2x784xf32> to vector<1x49xf32>
    %248 = vector.extract_strided_slice %226 {offsets = [1, 196], sizes = [1, 49], strides = [1, 1]} : vector<2x784xf32> to vector<1x49xf32>
    %249 = vector.extract_strided_slice %226 {offsets = [1, 245], sizes = [1, 49], strides = [1, 1]} : vector<2x784xf32> to vector<1x49xf32>
    %250 = vector.extract_strided_slice %226 {offsets = [1, 294], sizes = [1, 49], strides = [1, 1]} : vector<2x784xf32> to vector<1x49xf32>
    %251 = vector.extract_strided_slice %226 {offsets = [1, 343], sizes = [1, 49], strides = [1, 1]} : vector<2x784xf32> to vector<1x49xf32>
    %252 = vector.extract_strided_slice %226 {offsets = [1, 392], sizes = [1, 49], strides = [1, 1]} : vector<2x784xf32> to vector<1x49xf32>
    %253 = vector.extract_strided_slice %226 {offsets = [1, 441], sizes = [1, 49], strides = [1, 1]} : vector<2x784xf32> to vector<1x49xf32>
    %254 = vector.extract_strided_slice %226 {offsets = [1, 490], sizes = [1, 49], strides = [1, 1]} : vector<2x784xf32> to vector<1x49xf32>
    %255 = vector.extract_strided_slice %226 {offsets = [1, 539], sizes = [1, 49], strides = [1, 1]} : vector<2x784xf32> to vector<1x49xf32>
    %256 = vector.extract_strided_slice %226 {offsets = [1, 588], sizes = [1, 49], strides = [1, 1]} : vector<2x784xf32> to vector<1x49xf32>
    %257 = vector.extract_strided_slice %226 {offsets = [1, 637], sizes = [1, 49], strides = [1, 1]} : vector<2x784xf32> to vector<1x49xf32>
    %258 = vector.extract_strided_slice %226 {offsets = [1, 686], sizes = [1, 49], strides = [1, 1]} : vector<2x784xf32> to vector<1x49xf32>
    %259 = vector.extract_strided_slice %226 {offsets = [1, 735], sizes = [1, 49], strides = [1, 1]} : vector<2x784xf32> to vector<1x49xf32>
    %260 = tpu.concatenate %244, %245, %246, %247, %248, %249, %250, %251, %252, %253, %254, %255, %256, %257, %258, %259 in 0 : vector<1x49xf32>, vector<1x49xf32>, vector<1x49xf32>, vector<1x49xf32>, vector<1x49xf32>, vector<1x49xf32>, vector<1x49xf32>, vector<1x49xf32>, vector<1x49xf32>, vector<1x49xf32>, vector<1x49xf32>, vector<1x49xf32>, vector<1x49xf32>, vector<1x49xf32>, vector<1x49xf32>, vector<1x49xf32> -> vector<16x49xf32>
    %261 = tpu.concatenate %243, %260 in 1 : vector<16x49xf32>, vector<16x49xf32> -> vector<16x98xf32>
    %c0_80 = arith.constant 0 : index
    %c0_81 = arith.constant 0 : index
    %262 = vector.load %arg16[%c0_80, %c0_81] : memref<32x144xf32, #tpu.memory_space<vmem>>, vector<32x144xf32>
    %cst_82 = arith.constant 0.000000e+00 : f32
    %263 = vector.broadcast %cst_82 : f32 to vector<16x8xf32>
    %264 = vector.extract_strided_slice %261 {offsets = [0, 0], sizes = [16, 90], strides = [1, 1]} : vector<16x98xf32> to vector<16x90xf32>
    %265 = tpu.concatenate %263, %264 in 1 : vector<16x8xf32>, vector<16x90xf32> -> vector<16x98xf32>
    %266 = vector.extract_strided_slice %5 {offsets = [0, 0], sizes = [1, 98], strides = [1, 1]} : vector<9x98xf32> to vector<1x98xf32>
    %267 = vector.broadcast %266 : vector<1x98xf32> to vector<16x98xf32>
    %268 = arith.mulf %265, %267 : vector<16x98xf32>
    %cst_83 = arith.constant 0.000000e+00 : f32
    %269 = vector.broadcast %cst_83 : f32 to vector<16x7xf32>
    %270 = vector.extract_strided_slice %261 {offsets = [0, 0], sizes = [16, 91], strides = [1, 1]} : vector<16x98xf32> to vector<16x91xf32>
    %271 = tpu.concatenate %269, %270 in 1 : vector<16x7xf32>, vector<16x91xf32> -> vector<16x98xf32>
    %272 = vector.extract_strided_slice %5 {offsets = [1, 0], sizes = [1, 98], strides = [1, 1]} : vector<9x98xf32> to vector<1x98xf32>
    %273 = vector.broadcast %272 : vector<1x98xf32> to vector<16x98xf32>
    %274 = arith.mulf %271, %273 : vector<16x98xf32>
    %cst_84 = arith.constant 0.000000e+00 : f32
    %275 = vector.broadcast %cst_84 : f32 to vector<16x6xf32>
    %276 = vector.extract_strided_slice %261 {offsets = [0, 0], sizes = [16, 92], strides = [1, 1]} : vector<16x98xf32> to vector<16x92xf32>
    %277 = tpu.concatenate %275, %276 in 1 : vector<16x6xf32>, vector<16x92xf32> -> vector<16x98xf32>
    %278 = vector.extract_strided_slice %5 {offsets = [2, 0], sizes = [1, 98], strides = [1, 1]} : vector<9x98xf32> to vector<1x98xf32>
    %279 = vector.broadcast %278 : vector<1x98xf32> to vector<16x98xf32>
    %280 = arith.mulf %277, %279 : vector<16x98xf32>
    %cst_85 = arith.constant 0.000000e+00 : f32
    %281 = vector.broadcast %cst_85 : f32 to vector<16x1xf32>
    %282 = vector.extract_strided_slice %261 {offsets = [0, 0], sizes = [16, 97], strides = [1, 1]} : vector<16x98xf32> to vector<16x97xf32>
    %283 = tpu.concatenate %281, %282 in 1 : vector<16x1xf32>, vector<16x97xf32> -> vector<16x98xf32>
    %284 = vector.extract_strided_slice %5 {offsets = [3, 0], sizes = [1, 98], strides = [1, 1]} : vector<9x98xf32> to vector<1x98xf32>
    %285 = vector.broadcast %284 : vector<1x98xf32> to vector<16x98xf32>
    %286 = arith.mulf %283, %285 : vector<16x98xf32>
    %287 = vector.extract_strided_slice %5 {offsets = [4, 0], sizes = [1, 98], strides = [1, 1]} : vector<9x98xf32> to vector<1x98xf32>
    %288 = vector.broadcast %287 : vector<1x98xf32> to vector<16x98xf32>
    %289 = arith.mulf %261, %288 : vector<16x98xf32>
    %cst_86 = arith.constant 0.000000e+00 : f32
    %290 = vector.broadcast %cst_86 : f32 to vector<16x1xf32>
    %291 = vector.extract_strided_slice %261 {offsets = [0, 1], sizes = [16, 97], strides = [1, 1]} : vector<16x98xf32> to vector<16x97xf32>
    %292 = tpu.concatenate %291, %290 in 1 : vector<16x97xf32>, vector<16x1xf32> -> vector<16x98xf32>
    %293 = vector.extract_strided_slice %5 {offsets = [5, 0], sizes = [1, 98], strides = [1, 1]} : vector<9x98xf32> to vector<1x98xf32>
    %294 = vector.broadcast %293 : vector<1x98xf32> to vector<16x98xf32>
    %295 = arith.mulf %292, %294 : vector<16x98xf32>
    %cst_87 = arith.constant 0.000000e+00 : f32
    %296 = vector.broadcast %cst_87 : f32 to vector<16x6xf32>
    %297 = vector.extract_strided_slice %261 {offsets = [0, 6], sizes = [16, 92], strides = [1, 1]} : vector<16x98xf32> to vector<16x92xf32>
    %298 = tpu.concatenate %297, %296 in 1 : vector<16x92xf32>, vector<16x6xf32> -> vector<16x98xf32>
    %299 = vector.extract_strided_slice %5 {offsets = [6, 0], sizes = [1, 98], strides = [1, 1]} : vector<9x98xf32> to vector<1x98xf32>
    %300 = vector.broadcast %299 : vector<1x98xf32> to vector<16x98xf32>
    %301 = arith.mulf %298, %300 : vector<16x98xf32>
    %cst_88 = arith.constant 0.000000e+00 : f32
    %302 = vector.broadcast %cst_88 : f32 to vector<16x7xf32>
    %303 = vector.extract_strided_slice %261 {offsets = [0, 7], sizes = [16, 91], strides = [1, 1]} : vector<16x98xf32> to vector<16x91xf32>
    %304 = tpu.concatenate %303, %302 in 1 : vector<16x91xf32>, vector<16x7xf32> -> vector<16x98xf32>
    %305 = vector.extract_strided_slice %5 {offsets = [7, 0], sizes = [1, 98], strides = [1, 1]} : vector<9x98xf32> to vector<1x98xf32>
    %306 = vector.broadcast %305 : vector<1x98xf32> to vector<16x98xf32>
    %307 = arith.mulf %304, %306 : vector<16x98xf32>
    %cst_89 = arith.constant 0.000000e+00 : f32
    %308 = vector.broadcast %cst_89 : f32 to vector<16x8xf32>
    %309 = vector.extract_strided_slice %261 {offsets = [0, 8], sizes = [16, 90], strides = [1, 1]} : vector<16x98xf32> to vector<16x90xf32>
    %310 = tpu.concatenate %309, %308 in 1 : vector<16x90xf32>, vector<16x8xf32> -> vector<16x98xf32>
    %311 = vector.extract_strided_slice %5 {offsets = [8, 0], sizes = [1, 98], strides = [1, 1]} : vector<9x98xf32> to vector<1x98xf32>
    %312 = vector.broadcast %311 : vector<1x98xf32> to vector<16x98xf32>
    %313 = arith.mulf %310, %312 : vector<16x98xf32>
    %314 = tpu.concatenate %268, %274, %280, %286, %289, %295, %301, %307, %313 in 0 : vector<16x98xf32>, vector<16x98xf32>, vector<16x98xf32>, vector<16x98xf32>, vector<16x98xf32>, vector<16x98xf32>, vector<16x98xf32>, vector<16x98xf32>, vector<16x98xf32> -> vector<144x98xf32>
    %cst_90 = arith.constant dense<0.000000e+00> : vector<32x98xf32>
    %315 = tpu.matmul %262, %314, %cst_90 {dimension_numbers = #tpu.dot_dimension_numbers<[1], [0], [0], [1], [0, 0, 1, 1], [], []>} : vector<32x144xf32>, vector<144x98xf32>, vector<32x98xf32> -> vector<32x98xf32>
    %c0_91 = arith.constant 0 : index
    %c0_92 = arith.constant 0 : index
    %316 = vector.load %arg17[%c0_91, %c0_92] : memref<32x1xf32, #tpu.memory_space<vmem>>, vector<32x1xf32>
    %317 = vector.broadcast %316 : vector<32x1xf32> to vector<32x98xf32>
    %318 = arith.addf %315, %317 : vector<32x98xf32>
    %319 = vector.extract_strided_slice %318 {offsets = [0, 0], sizes = [8, 98], strides = [1, 1]} : vector<32x98xf32> to vector<8x98xf32>
    %320 = vector.extract_strided_slice %318 {offsets = [8, 0], sizes = [8, 98], strides = [1, 1]} : vector<32x98xf32> to vector<8x98xf32>
    %321 = vector.extract_strided_slice %318 {offsets = [16, 0], sizes = [8, 98], strides = [1, 1]} : vector<32x98xf32> to vector<8x98xf32>
    %322 = vector.extract_strided_slice %318 {offsets = [24, 0], sizes = [8, 98], strides = [1, 1]} : vector<32x98xf32> to vector<8x98xf32>
    %cst_93 = arith.constant 0.000000e+00 : f32
    %323 = vector.broadcast %cst_93 : f32 to vector<8x8xf32>
    %324 = vector.extract_strided_slice %322 {offsets = [0, 0], sizes = [8, 90], strides = [1, 1]} : vector<8x98xf32> to vector<8x90xf32>
    %325 = tpu.concatenate %323, %324 in 1 : vector<8x8xf32>, vector<8x90xf32> -> vector<8x98xf32>
    %326 = vector.extract_strided_slice %5 {offsets = [0, 0], sizes = [1, 98], strides = [1, 1]} : vector<9x98xf32> to vector<1x98xf32>
    %327 = vector.broadcast %326 : vector<1x98xf32> to vector<8x98xf32>
    %328 = arith.mulf %325, %327 : vector<8x98xf32>
    %cst_94 = arith.constant 0.000000e+00 : f32
    %329 = vector.broadcast %cst_94 : f32 to vector<8x7xf32>
    %330 = vector.extract_strided_slice %321 {offsets = [0, 0], sizes = [8, 91], strides = [1, 1]} : vector<8x98xf32> to vector<8x91xf32>
    %331 = tpu.concatenate %329, %330 in 1 : vector<8x7xf32>, vector<8x91xf32> -> vector<8x98xf32>
    %332 = vector.extract_strided_slice %5 {offsets = [1, 0], sizes = [1, 98], strides = [1, 1]} : vector<9x98xf32> to vector<1x98xf32>
    %333 = vector.broadcast %332 : vector<1x98xf32> to vector<8x98xf32>
    %334 = arith.mulf %331, %333 : vector<8x98xf32>
    %cst_95 = arith.constant 0.000000e+00 : f32
    %335 = vector.broadcast %cst_95 : f32 to vector<8x7xf32>
    %336 = vector.extract_strided_slice %322 {offsets = [0, 0], sizes = [8, 91], strides = [1, 1]} : vector<8x98xf32> to vector<8x91xf32>
    %337 = tpu.concatenate %335, %336 in 1 : vector<8x7xf32>, vector<8x91xf32> -> vector<8x98xf32>
    %338 = vector.extract_strided_slice %5 {offsets = [1, 0], sizes = [1, 98], strides = [1, 1]} : vector<9x98xf32> to vector<1x98xf32>
    %339 = vector.broadcast %338 : vector<1x98xf32> to vector<8x98xf32>
    %340 = arith.mulf %337, %339 : vector<8x98xf32>
    %cst_96 = arith.constant 0.000000e+00 : f32
    %341 = vector.broadcast %cst_96 : f32 to vector<8x1xf32>
    %342 = vector.extract_strided_slice %320 {offsets = [0, 0], sizes = [8, 97], strides = [1, 1]} : vector<8x98xf32> to vector<8x97xf32>
    %343 = tpu.concatenate %341, %342 in 1 : vector<8x1xf32>, vector<8x97xf32> -> vector<8x98xf32>
    %344 = vector.extract_strided_slice %5 {offsets = [3, 0], sizes = [1, 98], strides = [1, 1]} : vector<9x98xf32> to vector<1x98xf32>
    %345 = vector.broadcast %344 : vector<1x98xf32> to vector<8x98xf32>
    %346 = arith.mulf %343, %345 : vector<8x98xf32>
    %347 = vector.extract_strided_slice %5 {offsets = [4, 0], sizes = [1, 98], strides = [1, 1]} : vector<9x98xf32> to vector<1x98xf32>
    %348 = vector.broadcast %347 : vector<1x98xf32> to vector<8x98xf32>
    %349 = arith.mulf %319, %348 : vector<8x98xf32>
    %350 = vector.extract_strided_slice %5 {offsets = [4, 0], sizes = [1, 98], strides = [1, 1]} : vector<9x98xf32> to vector<1x98xf32>
    %351 = vector.broadcast %350 : vector<1x98xf32> to vector<8x98xf32>
    %352 = arith.mulf %320, %351 : vector<8x98xf32>
    %cst_97 = arith.constant 0.000000e+00 : f32
    %353 = vector.broadcast %cst_97 : f32 to vector<8x1xf32>
    %354 = vector.extract_strided_slice %322 {offsets = [0, 0], sizes = [8, 97], strides = [1, 1]} : vector<8x98xf32> to vector<8x97xf32>
    %355 = tpu.concatenate %353, %354 in 1 : vector<8x1xf32>, vector<8x97xf32> -> vector<8x98xf32>
    %356 = vector.extract_strided_slice %5 {offsets = [3, 0], sizes = [1, 98], strides = [1, 1]} : vector<9x98xf32> to vector<1x98xf32>
    %357 = vector.broadcast %356 : vector<1x98xf32> to vector<8x98xf32>
    %358 = arith.mulf %355, %357 : vector<8x98xf32>
    %359 = vector.extract_strided_slice %5 {offsets = [4, 0], sizes = [1, 98], strides = [1, 1]} : vector<9x98xf32> to vector<1x98xf32>
    %360 = vector.broadcast %359 : vector<1x98xf32> to vector<8x98xf32>
    %361 = arith.mulf %321, %360 : vector<8x98xf32>
    %362 = vector.extract_strided_slice %5 {offsets = [4, 0], sizes = [1, 98], strides = [1, 1]} : vector<9x98xf32> to vector<1x98xf32>
    %363 = vector.broadcast %362 : vector<1x98xf32> to vector<8x98xf32>
    %364 = arith.mulf %322, %363 : vector<8x98xf32>
    %365 = tpu.concatenate %328, %334, %340, %346, %349, %352, %358, %361, %364 in 0 : vector<8x98xf32>, vector<8x98xf32>, vector<8x98xf32>, vector<8x98xf32>, vector<8x98xf32>, vector<8x98xf32>, vector<8x98xf32>, vector<8x98xf32>, vector<8x98xf32> -> vector<72x98xf32>
    %c0_98 = arith.constant 0 : index
    %c0_99 = arith.constant 0 : index
    %366 = vector.load %arg18[%c0_98, %c0_99] : memref<4x72xf32, #tpu.memory_space<vmem>>, vector<4x72xf32>
    %cst_100 = arith.constant dense<0.000000e+00> : vector<4x98xf32>
    %367 = tpu.matmul %366, %365, %cst_100 {dimension_numbers = #tpu.dot_dimension_numbers<[1], [0], [0], [1], [0, 0, 1, 1], [], []>} : vector<4x72xf32>, vector<72x98xf32>, vector<4x98xf32> -> vector<4x98xf32>
    %c0_101 = arith.constant 0 : index
    %c0_102 = arith.constant 0 : index
    %368 = vector.load %arg19[%c0_101, %c0_102] : memref<4x1xf32, #tpu.memory_space<vmem>>, vector<4x1xf32>
    %369 = vector.broadcast %368 : vector<4x1xf32> to vector<4x98xf32>
    %370 = arith.addf %367, %369 : vector<4x98xf32>
    %cst_103 = arith.constant 0.000000e+00 : f32
    %371 = vector.broadcast %cst_103 : f32 to vector<4x98xf32>
    %372 = arith.subf %371, %370 : vector<4x98xf32>
    %373 = math.exp %372 : vector<4x98xf32>
    %cst_104 = arith.constant 1.000000e+00 : f32
    %374 = vector.broadcast %cst_104 : f32 to vector<4x98xf32>
    %375 = arith.addf %374, %373 : vector<4x98xf32>
    %cst_105 = arith.constant 1.000000e+00 : f32
    %376 = vector.broadcast %cst_105 : f32 to vector<4x98xf32>
    %377 = arith.divf %376, %375 : vector<4x98xf32>
    %cst_106 = arith.constant 0.000000e+00 : f32
    %378 = vector.broadcast %cst_106 : f32 to vector<8x7xf32>
    %379 = vector.extract_strided_slice %321 {offsets = [0, 0], sizes = [8, 91], strides = [1, 1]} : vector<8x98xf32> to vector<8x91xf32>
    %380 = tpu.concatenate %378, %379 in 1 : vector<8x7xf32>, vector<8x91xf32> -> vector<8x98xf32>
    %381 = vector.extract_strided_slice %5 {offsets = [1, 0], sizes = [1, 98], strides = [1, 1]} : vector<9x98xf32> to vector<1x98xf32>
    %382 = vector.broadcast %381 : vector<1x98xf32> to vector<8x98xf32>
    %383 = arith.mulf %380, %382 : vector<8x98xf32>
    %cst_107 = arith.constant 0.000000e+00 : f32
    %384 = vector.broadcast %cst_107 : f32 to vector<8x7xf32>
    %385 = vector.extract_strided_slice %322 {offsets = [0, 0], sizes = [8, 91], strides = [1, 1]} : vector<8x98xf32> to vector<8x91xf32>
    %386 = tpu.concatenate %384, %385 in 1 : vector<8x7xf32>, vector<8x91xf32> -> vector<8x98xf32>
    %387 = vector.extract_strided_slice %5 {offsets = [1, 0], sizes = [1, 98], strides = [1, 1]} : vector<9x98xf32> to vector<1x98xf32>
    %388 = vector.broadcast %387 : vector<1x98xf32> to vector<8x98xf32>
    %389 = arith.mulf %386, %388 : vector<8x98xf32>
    %cst_108 = arith.constant 0.000000e+00 : f32
    %390 = vector.broadcast %cst_108 : f32 to vector<8x6xf32>
    %391 = vector.extract_strided_slice %321 {offsets = [0, 0], sizes = [8, 92], strides = [1, 1]} : vector<8x98xf32> to vector<8x92xf32>
    %392 = tpu.concatenate %390, %391 in 1 : vector<8x6xf32>, vector<8x92xf32> -> vector<8x98xf32>
    %393 = vector.extract_strided_slice %5 {offsets = [2, 0], sizes = [1, 98], strides = [1, 1]} : vector<9x98xf32> to vector<1x98xf32>
    %394 = vector.broadcast %393 : vector<1x98xf32> to vector<8x98xf32>
    %395 = arith.mulf %392, %394 : vector<8x98xf32>
    %396 = vector.extract_strided_slice %5 {offsets = [4, 0], sizes = [1, 98], strides = [1, 1]} : vector<9x98xf32> to vector<1x98xf32>
    %397 = vector.broadcast %396 : vector<1x98xf32> to vector<8x98xf32>
    %398 = arith.mulf %319, %397 : vector<8x98xf32>
    %399 = vector.extract_strided_slice %5 {offsets = [4, 0], sizes = [1, 98], strides = [1, 1]} : vector<9x98xf32> to vector<1x98xf32>
    %400 = vector.broadcast %399 : vector<1x98xf32> to vector<8x98xf32>
    %401 = arith.mulf %320, %400 : vector<8x98xf32>
    %cst_109 = arith.constant 0.000000e+00 : f32
    %402 = vector.broadcast %cst_109 : f32 to vector<8x1xf32>
    %403 = vector.extract_strided_slice %319 {offsets = [0, 1], sizes = [8, 97], strides = [1, 1]} : vector<8x98xf32> to vector<8x97xf32>
    %404 = tpu.concatenate %403, %402 in 1 : vector<8x97xf32>, vector<8x1xf32> -> vector<8x98xf32>
    %405 = vector.extract_strided_slice %5 {offsets = [5, 0], sizes = [1, 98], strides = [1, 1]} : vector<9x98xf32> to vector<1x98xf32>
    %406 = vector.broadcast %405 : vector<1x98xf32> to vector<8x98xf32>
    %407 = arith.mulf %404, %406 : vector<8x98xf32>
    %408 = vector.extract_strided_slice %5 {offsets = [4, 0], sizes = [1, 98], strides = [1, 1]} : vector<9x98xf32> to vector<1x98xf32>
    %409 = vector.broadcast %408 : vector<1x98xf32> to vector<8x98xf32>
    %410 = arith.mulf %321, %409 : vector<8x98xf32>
    %411 = vector.extract_strided_slice %5 {offsets = [4, 0], sizes = [1, 98], strides = [1, 1]} : vector<9x98xf32> to vector<1x98xf32>
    %412 = vector.broadcast %411 : vector<1x98xf32> to vector<8x98xf32>
    %413 = arith.mulf %322, %412 : vector<8x98xf32>
    %cst_110 = arith.constant 0.000000e+00 : f32
    %414 = vector.broadcast %cst_110 : f32 to vector<8x1xf32>
    %415 = vector.extract_strided_slice %321 {offsets = [0, 1], sizes = [8, 97], strides = [1, 1]} : vector<8x98xf32> to vector<8x97xf32>
    %416 = tpu.concatenate %415, %414 in 1 : vector<8x97xf32>, vector<8x1xf32> -> vector<8x98xf32>
    %417 = vector.extract_strided_slice %5 {offsets = [5, 0], sizes = [1, 98], strides = [1, 1]} : vector<9x98xf32> to vector<1x98xf32>
    %418 = vector.broadcast %417 : vector<1x98xf32> to vector<8x98xf32>
    %419 = arith.mulf %416, %418 : vector<8x98xf32>
    %420 = tpu.concatenate %383, %389, %395, %398, %401, %407, %410, %413, %419 in 0 : vector<8x98xf32>, vector<8x98xf32>, vector<8x98xf32>, vector<8x98xf32>, vector<8x98xf32>, vector<8x98xf32>, vector<8x98xf32>, vector<8x98xf32>, vector<8x98xf32> -> vector<72x98xf32>
    %c0_111 = arith.constant 0 : index
    %c0_112 = arith.constant 0 : index
    %421 = vector.load %arg18[%c0_111, %c0_112] : memref<4x72xf32, #tpu.memory_space<vmem>>, vector<4x72xf32>
    %cst_113 = arith.constant dense<0.000000e+00> : vector<4x98xf32>
    %422 = tpu.matmul %421, %420, %cst_113 {dimension_numbers = #tpu.dot_dimension_numbers<[1], [0], [0], [1], [0, 0, 1, 1], [], []>} : vector<4x72xf32>, vector<72x98xf32>, vector<4x98xf32> -> vector<4x98xf32>
    %c0_114 = arith.constant 0 : index
    %c0_115 = arith.constant 0 : index
    %423 = vector.load %arg19[%c0_114, %c0_115] : memref<4x1xf32, #tpu.memory_space<vmem>>, vector<4x1xf32>
    %424 = vector.broadcast %423 : vector<4x1xf32> to vector<4x98xf32>
    %425 = arith.addf %422, %424 : vector<4x98xf32>
    %cst_116 = arith.constant 0.000000e+00 : f32
    %426 = vector.broadcast %cst_116 : f32 to vector<4x98xf32>
    %427 = arith.subf %426, %425 : vector<4x98xf32>
    %428 = math.exp %427 : vector<4x98xf32>
    %cst_117 = arith.constant 1.000000e+00 : f32
    %429 = vector.broadcast %cst_117 : f32 to vector<4x98xf32>
    %430 = arith.addf %429, %428 : vector<4x98xf32>
    %cst_118 = arith.constant 1.000000e+00 : f32
    %431 = vector.broadcast %cst_118 : f32 to vector<4x98xf32>
    %432 = arith.divf %431, %430 : vector<4x98xf32>
    %cst_119 = arith.constant 0.000000e+00 : f32
    %433 = vector.broadcast %cst_119 : f32 to vector<8x1xf32>
    %434 = vector.extract_strided_slice %320 {offsets = [0, 0], sizes = [8, 97], strides = [1, 1]} : vector<8x98xf32> to vector<8x97xf32>
    %435 = tpu.concatenate %433, %434 in 1 : vector<8x1xf32>, vector<8x97xf32> -> vector<8x98xf32>
    %436 = vector.extract_strided_slice %5 {offsets = [3, 0], sizes = [1, 98], strides = [1, 1]} : vector<9x98xf32> to vector<1x98xf32>
    %437 = vector.broadcast %436 : vector<1x98xf32> to vector<8x98xf32>
    %438 = arith.mulf %435, %437 : vector<8x98xf32>
    %439 = vector.extract_strided_slice %5 {offsets = [4, 0], sizes = [1, 98], strides = [1, 1]} : vector<9x98xf32> to vector<1x98xf32>
    %440 = vector.broadcast %439 : vector<1x98xf32> to vector<8x98xf32>
    %441 = arith.mulf %319, %440 : vector<8x98xf32>
    %442 = vector.extract_strided_slice %5 {offsets = [4, 0], sizes = [1, 98], strides = [1, 1]} : vector<9x98xf32> to vector<1x98xf32>
    %443 = vector.broadcast %442 : vector<1x98xf32> to vector<8x98xf32>
    %444 = arith.mulf %320, %443 : vector<8x98xf32>
    %cst_120 = arith.constant 0.000000e+00 : f32
    %445 = vector.broadcast %cst_120 : f32 to vector<8x1xf32>
    %446 = vector.extract_strided_slice %322 {offsets = [0, 0], sizes = [8, 97], strides = [1, 1]} : vector<8x98xf32> to vector<8x97xf32>
    %447 = tpu.concatenate %445, %446 in 1 : vector<8x1xf32>, vector<8x97xf32> -> vector<8x98xf32>
    %448 = vector.extract_strided_slice %5 {offsets = [3, 0], sizes = [1, 98], strides = [1, 1]} : vector<9x98xf32> to vector<1x98xf32>
    %449 = vector.broadcast %448 : vector<1x98xf32> to vector<8x98xf32>
    %450 = arith.mulf %447, %449 : vector<8x98xf32>
    %451 = vector.extract_strided_slice %5 {offsets = [4, 0], sizes = [1, 98], strides = [1, 1]} : vector<9x98xf32> to vector<1x98xf32>
    %452 = vector.broadcast %451 : vector<1x98xf32> to vector<8x98xf32>
    %453 = arith.mulf %321, %452 : vector<8x98xf32>
    %454 = vector.extract_strided_slice %5 {offsets = [4, 0], sizes = [1, 98], strides = [1, 1]} : vector<9x98xf32> to vector<1x98xf32>
    %455 = vector.broadcast %454 : vector<1x98xf32> to vector<8x98xf32>
    %456 = arith.mulf %322, %455 : vector<8x98xf32>
    %cst_121 = arith.constant 0.000000e+00 : f32
    %457 = vector.broadcast %cst_121 : f32 to vector<8x6xf32>
    %458 = vector.extract_strided_slice %320 {offsets = [0, 6], sizes = [8, 92], strides = [1, 1]} : vector<8x98xf32> to vector<8x92xf32>
    %459 = tpu.concatenate %458, %457 in 1 : vector<8x92xf32>, vector<8x6xf32> -> vector<8x98xf32>
    %460 = vector.extract_strided_slice %5 {offsets = [6, 0], sizes = [1, 98], strides = [1, 1]} : vector<9x98xf32> to vector<1x98xf32>
    %461 = vector.broadcast %460 : vector<1x98xf32> to vector<8x98xf32>
    %462 = arith.mulf %459, %461 : vector<8x98xf32>
    %cst_122 = arith.constant 0.000000e+00 : f32
    %463 = vector.broadcast %cst_122 : f32 to vector<8x7xf32>
    %464 = vector.extract_strided_slice %319 {offsets = [0, 7], sizes = [8, 91], strides = [1, 1]} : vector<8x98xf32> to vector<8x91xf32>
    %465 = tpu.concatenate %464, %463 in 1 : vector<8x91xf32>, vector<8x7xf32> -> vector<8x98xf32>
    %466 = vector.extract_strided_slice %5 {offsets = [7, 0], sizes = [1, 98], strides = [1, 1]} : vector<9x98xf32> to vector<1x98xf32>
    %467 = vector.broadcast %466 : vector<1x98xf32> to vector<8x98xf32>
    %468 = arith.mulf %465, %467 : vector<8x98xf32>
    %cst_123 = arith.constant 0.000000e+00 : f32
    %469 = vector.broadcast %cst_123 : f32 to vector<8x7xf32>
    %470 = vector.extract_strided_slice %320 {offsets = [0, 7], sizes = [8, 91], strides = [1, 1]} : vector<8x98xf32> to vector<8x91xf32>
    %471 = tpu.concatenate %470, %469 in 1 : vector<8x91xf32>, vector<8x7xf32> -> vector<8x98xf32>
    %472 = vector.extract_strided_slice %5 {offsets = [7, 0], sizes = [1, 98], strides = [1, 1]} : vector<9x98xf32> to vector<1x98xf32>
    %473 = vector.broadcast %472 : vector<1x98xf32> to vector<8x98xf32>
    %474 = arith.mulf %471, %473 : vector<8x98xf32>
    %475 = tpu.concatenate %438, %441, %444, %450, %453, %456, %462, %468, %474 in 0 : vector<8x98xf32>, vector<8x98xf32>, vector<8x98xf32>, vector<8x98xf32>, vector<8x98xf32>, vector<8x98xf32>, vector<8x98xf32>, vector<8x98xf32>, vector<8x98xf32> -> vector<72x98xf32>
    %c0_124 = arith.constant 0 : index
    %c0_125 = arith.constant 0 : index
    %476 = vector.load %arg18[%c0_124, %c0_125] : memref<4x72xf32, #tpu.memory_space<vmem>>, vector<4x72xf32>
    %cst_126 = arith.constant dense<0.000000e+00> : vector<4x98xf32>
    %477 = tpu.matmul %476, %475, %cst_126 {dimension_numbers = #tpu.dot_dimension_numbers<[1], [0], [0], [1], [0, 0, 1, 1], [], []>} : vector<4x72xf32>, vector<72x98xf32>, vector<4x98xf32> -> vector<4x98xf32>
    %c0_127 = arith.constant 0 : index
    %c0_128 = arith.constant 0 : index
    %478 = vector.load %arg19[%c0_127, %c0_128] : memref<4x1xf32, #tpu.memory_space<vmem>>, vector<4x1xf32>
    %479 = vector.broadcast %478 : vector<4x1xf32> to vector<4x98xf32>
    %480 = arith.addf %477, %479 : vector<4x98xf32>
    %cst_129 = arith.constant 0.000000e+00 : f32
    %481 = vector.broadcast %cst_129 : f32 to vector<4x98xf32>
    %482 = arith.subf %481, %480 : vector<4x98xf32>
    %483 = math.exp %482 : vector<4x98xf32>
    %cst_130 = arith.constant 1.000000e+00 : f32
    %484 = vector.broadcast %cst_130 : f32 to vector<4x98xf32>
    %485 = arith.addf %484, %483 : vector<4x98xf32>
    %cst_131 = arith.constant 1.000000e+00 : f32
    %486 = vector.broadcast %cst_131 : f32 to vector<4x98xf32>
    %487 = arith.divf %486, %485 : vector<4x98xf32>
    %488 = vector.extract_strided_slice %5 {offsets = [4, 0], sizes = [1, 98], strides = [1, 1]} : vector<9x98xf32> to vector<1x98xf32>
    %489 = vector.broadcast %488 : vector<1x98xf32> to vector<8x98xf32>
    %490 = arith.mulf %319, %489 : vector<8x98xf32>
    %491 = vector.extract_strided_slice %5 {offsets = [4, 0], sizes = [1, 98], strides = [1, 1]} : vector<9x98xf32> to vector<1x98xf32>
    %492 = vector.broadcast %491 : vector<1x98xf32> to vector<8x98xf32>
    %493 = arith.mulf %320, %492 : vector<8x98xf32>
    %cst_132 = arith.constant 0.000000e+00 : f32
    %494 = vector.broadcast %cst_132 : f32 to vector<8x1xf32>
    %495 = vector.extract_strided_slice %319 {offsets = [0, 1], sizes = [8, 97], strides = [1, 1]} : vector<8x98xf32> to vector<8x97xf32>
    %496 = tpu.concatenate %495, %494 in 1 : vector<8x97xf32>, vector<8x1xf32> -> vector<8x98xf32>
    %497 = vector.extract_strided_slice %5 {offsets = [5, 0], sizes = [1, 98], strides = [1, 1]} : vector<9x98xf32> to vector<1x98xf32>
    %498 = vector.broadcast %497 : vector<1x98xf32> to vector<8x98xf32>
    %499 = arith.mulf %496, %498 : vector<8x98xf32>
    %500 = vector.extract_strided_slice %5 {offsets = [4, 0], sizes = [1, 98], strides = [1, 1]} : vector<9x98xf32> to vector<1x98xf32>
    %501 = vector.broadcast %500 : vector<1x98xf32> to vector<8x98xf32>
    %502 = arith.mulf %321, %501 : vector<8x98xf32>
    %503 = vector.extract_strided_slice %5 {offsets = [4, 0], sizes = [1, 98], strides = [1, 1]} : vector<9x98xf32> to vector<1x98xf32>
    %504 = vector.broadcast %503 : vector<1x98xf32> to vector<8x98xf32>
    %505 = arith.mulf %322, %504 : vector<8x98xf32>
    %cst_133 = arith.constant 0.000000e+00 : f32
    %506 = vector.broadcast %cst_133 : f32 to vector<8x1xf32>
    %507 = vector.extract_strided_slice %321 {offsets = [0, 1], sizes = [8, 97], strides = [1, 1]} : vector<8x98xf32> to vector<8x97xf32>
    %508 = tpu.concatenate %507, %506 in 1 : vector<8x97xf32>, vector<8x1xf32> -> vector<8x98xf32>
    %509 = vector.extract_strided_slice %5 {offsets = [5, 0], sizes = [1, 98], strides = [1, 1]} : vector<9x98xf32> to vector<1x98xf32>
    %510 = vector.broadcast %509 : vector<1x98xf32> to vector<8x98xf32>
    %511 = arith.mulf %508, %510 : vector<8x98xf32>
    %cst_134 = arith.constant 0.000000e+00 : f32
    %512 = vector.broadcast %cst_134 : f32 to vector<8x7xf32>
    %513 = vector.extract_strided_slice %319 {offsets = [0, 7], sizes = [8, 91], strides = [1, 1]} : vector<8x98xf32> to vector<8x91xf32>
    %514 = tpu.concatenate %513, %512 in 1 : vector<8x91xf32>, vector<8x7xf32> -> vector<8x98xf32>
    %515 = vector.extract_strided_slice %5 {offsets = [7, 0], sizes = [1, 98], strides = [1, 1]} : vector<9x98xf32> to vector<1x98xf32>
    %516 = vector.broadcast %515 : vector<1x98xf32> to vector<8x98xf32>
    %517 = arith.mulf %514, %516 : vector<8x98xf32>
    %cst_135 = arith.constant 0.000000e+00 : f32
    %518 = vector.broadcast %cst_135 : f32 to vector<8x7xf32>
    %519 = vector.extract_strided_slice %320 {offsets = [0, 7], sizes = [8, 91], strides = [1, 1]} : vector<8x98xf32> to vector<8x91xf32>
    %520 = tpu.concatenate %519, %518 in 1 : vector<8x91xf32>, vector<8x7xf32> -> vector<8x98xf32>
    %521 = vector.extract_strided_slice %5 {offsets = [7, 0], sizes = [1, 98], strides = [1, 1]} : vector<9x98xf32> to vector<1x98xf32>
    %522 = vector.broadcast %521 : vector<1x98xf32> to vector<8x98xf32>
    %523 = arith.mulf %520, %522 : vector<8x98xf32>
    %cst_136 = arith.constant 0.000000e+00 : f32
    %524 = vector.broadcast %cst_136 : f32 to vector<8x8xf32>
    %525 = vector.extract_strided_slice %319 {offsets = [0, 8], sizes = [8, 90], strides = [1, 1]} : vector<8x98xf32> to vector<8x90xf32>
    %526 = tpu.concatenate %525, %524 in 1 : vector<8x90xf32>, vector<8x8xf32> -> vector<8x98xf32>
    %527 = vector.extract_strided_slice %5 {offsets = [8, 0], sizes = [1, 98], strides = [1, 1]} : vector<9x98xf32> to vector<1x98xf32>
    %528 = vector.broadcast %527 : vector<1x98xf32> to vector<8x98xf32>
    %529 = arith.mulf %526, %528 : vector<8x98xf32>
    %530 = tpu.concatenate %490, %493, %499, %502, %505, %511, %517, %523, %529 in 0 : vector<8x98xf32>, vector<8x98xf32>, vector<8x98xf32>, vector<8x98xf32>, vector<8x98xf32>, vector<8x98xf32>, vector<8x98xf32>, vector<8x98xf32>, vector<8x98xf32> -> vector<72x98xf32>
    %c0_137 = arith.constant 0 : index
    %c0_138 = arith.constant 0 : index
    %531 = vector.load %arg18[%c0_137, %c0_138] : memref<4x72xf32, #tpu.memory_space<vmem>>, vector<4x72xf32>
    %cst_139 = arith.constant dense<0.000000e+00> : vector<4x98xf32>
    %532 = tpu.matmul %531, %530, %cst_139 {dimension_numbers = #tpu.dot_dimension_numbers<[1], [0], [0], [1], [0, 0, 1, 1], [], []>} : vector<4x72xf32>, vector<72x98xf32>, vector<4x98xf32> -> vector<4x98xf32>
    %c0_140 = arith.constant 0 : index
    %c0_141 = arith.constant 0 : index
    %533 = vector.load %arg19[%c0_140, %c0_141] : memref<4x1xf32, #tpu.memory_space<vmem>>, vector<4x1xf32>
    %534 = vector.broadcast %533 : vector<4x1xf32> to vector<4x98xf32>
    %535 = arith.addf %532, %534 : vector<4x98xf32>
    %cst_142 = arith.constant 0.000000e+00 : f32
    %536 = vector.broadcast %cst_142 : f32 to vector<4x98xf32>
    %537 = arith.subf %536, %535 : vector<4x98xf32>
    %538 = math.exp %537 : vector<4x98xf32>
    %cst_143 = arith.constant 1.000000e+00 : f32
    %539 = vector.broadcast %cst_143 : f32 to vector<4x98xf32>
    %540 = arith.addf %539, %538 : vector<4x98xf32>
    %cst_144 = arith.constant 1.000000e+00 : f32
    %541 = vector.broadcast %cst_144 : f32 to vector<4x98xf32>
    %542 = arith.divf %541, %540 : vector<4x98xf32>
    %543 = tpu.concatenate %377, %432, %487, %542 in 0 : vector<4x98xf32>, vector<4x98xf32>, vector<4x98xf32>, vector<4x98xf32> -> vector<16x98xf32>
    %c0_145 = arith.constant 0 : index
    %c0_146 = arith.constant 0 : index
    %544 = vector.load %arg26[%c0_145, %c0_146] : memref<16x98xf32, #tpu.memory_space<vmem>>, vector<16x98xf32>
    tpu.vector_store %arg26[%c0_145, %c0_146], %543 {strides = array<i32>} : memref<16x98xf32, #tpu.memory_space<vmem>>, vector<16x98xf32>,
    return
  }
}

</mosaic_0001>

<bundles_post_ra>
// kernel: digit_vae_forward.1
= control target key start
LH: loop header
LB: loop body
LE: loop exit
PB: predicated region body
PF: predicated region fallthrough
CT: control target
= control target key end

     0   :  { %v556_v0 = vlaneseq  ;;  %s7820_s29 = smov 29   ;;  %v11490_v53 = vmov 0.0   ;;  %vm11524_vm0 = vcmask 130048   ;;  %vm11557_vm1 = vcmask 228352   ;;  %s7831_s28 = smov 112   ;;  %s11452_s20 = inlined_call_operand.vmem [shape: f32[9,784], index: 20, kind: input, shape index: {}]   ;;  %s11453_s0 = inlined_call_operand.vmem [shape: f32[1,1568], index: 0, kind: input, shape index: {}]   ;;  %s11454_s2 = inlined_call_operand.vmem [shape: f32[8,9], index: 2, kind: input, shape index: {}]   ;;  %s11455_s23 = inlined_call_operand.vmem [shape: bf16[784,196], index: 23, kind: input, shape index: {}]   ;;  %s11456_s3 = inlined_call_operand.vmem [shape: f32[8,1], index: 3, kind: input, shape index: {}]   ;;  %s11457_s21 = inlined_call_operand.vmem [shape: f32[9,196], index: 21, kind: input, shape index: {}]   ;;  %s11458_s4 = inlined_call_operand.vmem [shape: f32[16,72], index: 4, kind: input, shape index: {}]   ;;  %s11459_s24 = inlined_call_operand.vmem [shape: bf16[196,49], index: 24, kind: input, shape index: {}]   ;;  %s11460_s5 = inlined_call_operand.vmem [shape: f32[16,1], index: 5, kind: input, shape index: {}]   ;;  %s11461_s6 = inlined_call_operand.vmem [shape: f32[784,32], index: 6, kind: input, shape index: {}]   ;;  %s11462_s8 = inlined_call_operand.vmem [shape: f32[32,16], index: 8, kind: input, shape index: {}]   ;;  %s11463_s1 = inlined_call_operand.vmem [shape: f32[2,8], index: 1, kind: input, shape index: {}]   ;;  %s11464_s7 = inlined_call_operand.vmem [shape: f32[1,32], index: 7, kind: input, shape index: {}]   ;;  %s11465_s10 = inlined_call_operand.vmem [shape: f32[8,32], index: 10, kind: input, shape index: {}]   ;;  %s11466_s9 = inlined_call_operand.vmem [shape: f32[1,16], index: 9, kind: input, shape index: {}]   ;;  %s11467_s25 = inlined_call_operand.vmem [shape: f32[2,16], index: 25, kind: output, shape index: {0}]   ;;  %s11468_s12 = inlined_call_operand.vmem [shape: f32[32,64], index: 12, kind: input, shape index: {}]   ;;  %s11469_s14 = inlined_call_operand.vmem [shape: f32[64,784], index: 14, kind: input, shape index: {}]   ;;  %s11470_s11 = inlined_call_operand.vmem [shape: f32[1,32], index: 11, kind: input, shape index: {}]   ;;  %s11471_s13 = inlined_call_operand.vmem [shape: f32[1,64], index: 13, kind: input, shape index: {}]   ;;  %s11472_s15 = inlined_call_operand.vmem [shape: f32[1,784], index: 15, kind: input, shape index: {}]   ;;  %s11473_s22 = inlined_call_operand.vmem [shape: f32[9,49], index: 22, kind: input, shape index: {}]   ;;  %s11474_s17 = inlined_call_operand.vmem [shape: f32[32,1], index: 17, kind: input, shape index: {}]   ;;  %s11475_s16 = inlined_call_operand.vmem [shape: f32[32,144], index: 16, kind: input, shape index: {}]   ;;  %s11476_s19 = inlined_call_operand.vmem [shape: f32[4,1], index: 19, kind: input, shape index: {}]   ;;  %s11477_s18 = inlined_call_operand.vmem [shape: f32[4,72], index: 18, kind: input, shape index: {}]   ;;  %s11478_s26 = inlined_call_operand.vmem [shape: f32[16,98], index: 26, kind: output, shape index: {1}]  }
   0x1   :  { %11572 = sst [smem:[#allocation53_spill]] %s11452_s20  ;;  %s11488_s20 = smov 101   ;;  %1896 = vmatprep.mubr.f32.mxu0 %v11490_v53  ;;  %1967 = vmatprep.mubr.f32.mxu1 %v11490_v53  ;;  %v7827_v53 = vmov 1966171168   ;;  %vm11556_vm2 = vcmask 220160   ;;  %vm11558_vm3 = vcmask 236544  }
   0x2   :  { %11573 = sst [smem:[#allocation54_spill]] %s11453_s0  ;;  %v8020_v3 = vshrl.u32 %v556_v0, 7  ;;  %s7824_s0 = smov 100   ;;  %vm11547_vm4 = vcmask 7168   ;;  %vm1070_vm5 = vcmask 1039360   ;;  %vm1163_vm6 = vcmask 826368  }
   0x3   :  { %11574 = sst [smem:[#allocation55_spill]] %s11454_s2  ;;  %s11564_s2 = smov 1   ;;  %vm1691_vm7 = vcmask 1040384   ;;  %vm1256_vm8 = vcmask 818176   ;;  %vm1705_vm9 = vcmask 1041408   ;;  %vm1719_vm10 = vcmask 1042432  }
   0x4   :  { %11575 = sst [smem:[#allocation56_spill]] %s11455_s23  ;;  %v8033_v6 = vsub.s32 0, %v8020_v3  ;;  %v8036_v7 = vsub.s32 1, %v8020_v3  ;;  %v8082_v13 = vsub.s32 2, %v8020_v3  ;;  %v8087_v14 = vsub.s32 3, %v8020_v3  ;;  %s11818_s30 = smov 27  }
   0x5   :  { %11576 = sst [smem:[#allocation57_spill]] %s11456_s3  ;;  %s7817_s3 = smov 16   ;;  %v8099_v17 = vsub.s32 4, %v8020_v3  ;;  %v8108_v19 = vsub.s32 5, %v8020_v3  ;;  %v8157_v22 = vsub.s32 6, %v8020_v3  ;;  %v8162_v23 = vsub.s32 7, %v8020_v3 }
   0x6   :  { %11577 = sst [smem:[#allocation58_spill]] %s11457_s21  ;;  %11585 = vst [vmem:[#allocation2_spill] sm:$0xff] %v8033_v6  ;;  %11586 = vst [vmem:[#allocation3_spill] sm:$0xff] %v8036_v7  ;;  %s11562_s21 = smov 127   ;;  %vm1747_vm11 = vcmask 1044480   ;;  %vm11525_vm12 = vcmask 809984  }
   0x7   :  { %11578 = sst [smem:[#allocation59_spill]] %s11458_s4  ;;  %s7818_s4 = smov 28   ;;  %11587 = vst [vmem:[#allocation4_spill] sm:$0xff] %v8082_v13  ;;  %11588 = vst [vmem:[#allocation5_spill] sm:$0xff] %v8087_v14  ;;  %vm1733_vm13 = vcmask 1043456   ;;  %vm1761_vm14 = vcmask 1045504  }
   0x8   :  { %11579 = sst [smem:[#allocation60_spill]] %s11459_s24  ;;  %s11583_s24 = sld [smem:[#allocation53_spill]]  ;;  %11589 = vst [vmem:[#allocation6_spill] sm:$0xff] %v8099_v17  ;;  %11590 = vst [vmem:[#allocation7_spill] sm:$0xff] %v8108_v19  ;;  %vm1775_vm15 = vcmask 1046528  }
   0x9   :  { %11580 = sst [smem:[#allocation61_spill]] %s11460_s5  ;;  %s11568_s5 = smov 27   ;;  %11591 = vst [vmem:[#allocation8_spill] sm:$0xff] %v8157_v22  ;;  %11592 = vst [vmem:[#allocation9_spill] sm:$0xff] %v8162_v23 }
   0xa   :  { %11581 = sst [smem:[#allocation62_spill]] %s11461_s6  ;;  %s11689_s6 = sld [smem:[#allocation55_spill]] }
   0xb   :  { %11582 = sst [smem:[#allocation63_spill]] %s11462_s8  ;;  %s11584_s8 = sld [smem:[#allocation54_spill]] }
   0xc   :  { %s11793_s23 = sld [smem:[#allocation56_spill]]  ;;  %s11815_s27 = sld [smem:[#allocation60_spill]] }
   0xe   :  { %v8009_v1 = vld [vmem:[%s11583_s24] sm:$0xff]  ;;  %v8014_v2 = vld [vmem:[%s11583_s24 + $0x18] sm:$0xff]  ;;  %v8025_v4 = vld [vmem:[%s11583_s24 + $0x8] sm:$0xff] }
   0xf   :  { %110 = vrot.lane.b32.xlu0 %v8009_v1, %s7817_s3  ;;  %116 = vrot.lane.b32.xlu1 %v8014_v2, %s7817_s3  ;;  %v8047_v9 = vld [vmem:[%s11583_s24 + $0x10] sm:$0xff]  ;;  %v8060_v11 = vld [vmem:[%s11583_s24 + $0x20] sm:$0xff] }
  0x10   :  { %v8067_v12 = vld [vmem:[%s11583_s24 + $0x28] sm:$0xff]  ;;  %v8092_v15 = vld [vmem:[%s11583_s24 + $0x30] sm:$0xff]  ;;  %v8346_v60 = vld [vmem:[%s11583_s24 + $0x38] sm:$0x1] }
  0x11   :  { %v8030_v5 = vld [vmem:[%s11584_s8] sm:$0xff]  ;;  %v8172_v25 = vld [vmem:[%s11584_s8 + $0x8] sm:$0x1f]  ;;  %s7825_s8 = smov 99   ;;  %11600 = vst [vmem:[#allocation17_spill] sm:$0xff] %v8346_v60 }
  0x12   :  { %v8042_v8 = vrot.slane %v8030_v5, %v8033_v6  ;;  %v8053_v10 = vrot.slane %v8030_v5, %v8036_v7  ;;  %v567_v16 = vrot.slane %v8030_v5, %v8082_v13  ;;  %v8105_v18 = vrot.slane %v8030_v5, %v8087_v14  ;;  %v8355_v62 = vld [vmem:[%s11583_s24 + $0x40] sm:$0x1]  ;;  %v8364_v0 = vld [vmem:[%s11583_s24 + $0x48] sm:$0x1] }
  0x13   :  { %112 = vrot.lane.b32.xlu0 %v8025_v4, %s7817_s3  ;;  %v8113_v20 = vrot.slane %v8030_v5, %v8099_v17  ;;  %v8119_v21 = vrot.slane %v8030_v5, %v8108_v19  ;;  %v8167_v24 = vrot.slane %v8030_v5, %v8157_v22  ;;  %v8178_v26 = vrot.slane %v8030_v5, %v8162_v23 }
  0x14   :  { %674 = vrot.lane.b32.xlu1 %v8042_v8, %s7818_s4  ;;  %v8184_v27 = vrot.slane %v8172_v25, %v8033_v6  ;;  %v8190_v28 = vrot.slane %v8172_v25, %v8036_v7  ;;  %v8287_v45 = vrot.slane %v8172_v25, %v8082_v13  ;;  %11603 = vst [vmem:[#allocation20_spill] sm:$0xff] %v8364_v0 }
  0x17   :  { %114 = vrot.lane.b32.xlu0 %v8047_v9, %s7817_s3 }
  0x18   :  { %676 = vrot.lane.b32.xlu1 %v8053_v10, %s7818_s4 }
  0x1b   :  { %118 = vrot.lane.b32.xlu0 %v8060_v11, %s7817_s3 }
  0x1c   :  { %120 = vrot.lane.b32.xlu1 %v8067_v12, %s7817_s3 }
  0x1f   :  { %767 = vrot.lane.b32.xlu0 %v8042_v8, %s11568_s5 }
  0x20   :  { %769 = vrot.lane.b32.xlu1 %v8053_v10, %s11568_s5 }
  0x23   :  { %608 = vrot.lane.b32.xlu0 %v8042_v8, %s7820_s29 }
  0x24   :  { %610 = vrot.lane.b32.xlu1 %v8053_v10, %s7820_s29 }
  0x27   :  { %859 = vrot.lane.b32.xlu0 %v8042_v8, %s11564_s2 }
  0x28   :  { %861 = vrot.lane.b32.xlu1 %v8053_v10, %s11564_s2 }
  0x2b   :  { %122 = vrot.lane.b32.xlu0 %v8092_v15, %s7817_s3 }
  0x2c   :  { %678 = vrot.lane.b32.xlu1 %v567_v16, %s7818_s4 }
  0x2f   :  { %680 = vrot.lane.b32.xlu0 %v8105_v18, %s7818_s4 }
  0x30   :  { %682 = vrot.lane.b32.xlu1 %v8113_v20, %s7818_s4 }
  0x33   :  { %684 = vrot.lane.b32.xlu0 %v8119_v21, %s7818_s4 }
  0x34   :  { %1046 = vrot.lane.b32.xlu1 %v8053_v10, %s11562_s21 }
  0x37   :  { %1048 = vrot.lane.b32.xlu0 %v567_v16, %s11562_s21 }
  0x38   :  { %771 = vrot.lane.b32.xlu1 %v567_v16, %s11568_s5 }
  0x3b   :  { %773 = vrot.lane.b32.xlu0 %v8105_v18, %s11568_s5 }
  0x3c   :  { %775 = vrot.lane.b32.xlu1 %v8113_v20, %s11568_s5 }
  0x3f   :  { %777 = vrot.lane.b32.xlu0 %v8119_v21, %s11568_s5 }
  0x40   :  { %1044 = vrot.lane.b32.xlu1 %v8042_v8, %s11562_s21 }
  0x43   :  { %1139 = vrot.lane.b32.xlu0 %v8053_v10, %s11488_s20 }
  0x44   :  { %1141 = vrot.lane.b32.xlu1 %v567_v16, %s11488_s20 }
  0x47   :  { %612 = vrot.lane.b32.xlu0 %v567_v16, %s7820_s29 }
  0x48   :  { %614 = vrot.lane.b32.xlu1 %v8105_v18, %s7820_s29 }
  0x4b   :  { %616 = vrot.lane.b32.xlu0 %v8113_v20, %s7820_s29 }
  0x4c   :  { %618 = vrot.lane.b32.xlu1 %v8119_v21, %s7820_s29 }
  0x4f   :  { %863 = vrot.lane.b32.xlu0 %v567_v16, %s11564_s2 }
  0x50   :  { %865 = vrot.lane.b32.xlu1 %v8105_v18, %s11564_s2 }
  0x53   :  { %867 = vrot.lane.b32.xlu0 %v8113_v20, %s11564_s2 }
  0x54   :  { %869 = vrot.lane.b32.xlu1 %v8119_v21, %s11564_s2 }
  0x57   :  { %1137 = vrot.lane.b32.xlu0 %v8042_v8, %s11488_s20 }
  0x58   :  { %1232 = vrot.lane.b32.xlu1 %v8053_v10, %s7824_s0 }
  0x5b   :  { %1234 = vrot.lane.b32.xlu0 %v567_v16, %s7824_s0 }
  0x5c   :  { %1230 = vrot.lane.b32.xlu1 %v8042_v8, %s7824_s0 }
  0x5f   :  { %686 = vrot.lane.b32.xlu0 %v8167_v24, %s7818_s4 }
  0x60   :  { %688 = vrot.lane.b32.xlu1 %v8178_v26, %s7818_s4 }
  0x63   :  { %690 = vrot.lane.b32.xlu0 %v8184_v27, %s7818_s4 }
  0x64   :  { %692 = vrot.lane.b32.xlu1 %v8190_v28, %s7818_s4 }
  0x67   :  { %1050 = vrot.lane.b32.xlu0 %v8105_v18, %s11562_s21 }
  0x68   :  { %1052 = vrot.lane.b32.xlu1 %v8113_v20, %s11562_s21 }
  0x6b   :  { %1054 = vrot.lane.b32.xlu0 %v8119_v21, %s11562_s21 }
  0x6c   :  { %1056 = vrot.lane.b32.xlu1 %v8167_v24, %s11562_s21 }
  0x6f   :  { %779 = vrot.lane.b32.xlu0 %v8167_v24, %s11568_s5 }
  0x70   :  { %781 = vrot.lane.b32.xlu1 %v8178_v26, %s11568_s5 }
  0x73   :  { %783 = vrot.lane.b32.xlu0 %v8184_v27, %s11568_s5 }
  0x74   :  { %785 = vrot.lane.b32.xlu1 %v8190_v28, %s11568_s5 }
  0x77   :  { %1143 = vrot.lane.b32.xlu0 %v8105_v18, %s11488_s20 }
  0x78   :  { %1145 = vrot.lane.b32.xlu1 %v8113_v20, %s11488_s20 }
  0x7b   :  { %1147 = vrot.lane.b32.xlu0 %v8119_v21, %s11488_s20 }
  0x7c   :  { %1149 = vrot.lane.b32.xlu1 %v8167_v24, %s11488_s20 }
  0x7f   :  { %1325 = vrot.lane.b32.xlu0 %v8053_v10, %s7825_s8  ;;  %v8373_v10 = vld [vmem:[%s11583_s24 + $0x50] sm:$0x1] }
  0x80   :  { %1327 = vrot.lane.b32.xlu1 %v567_v16, %s7825_s8  ;;  %11605 = vst [vmem:[#allocation22_spill] sm:$0xff] %v8373_v10 }
  0x81   :  { %v8222_v29 = vpop.permute.xlu0 %110  ;;  %v8225_v30 = vpop.permute.xlu1 %116 }
  0x83   :  { %620 = vrot.lane.b32.xlu0 %v8167_v24, %s7820_s29 }
  0x84   :  { %622 = vrot.lane.b32.xlu1 %v8178_v26, %s7820_s29 }
  0x85   :  { %v8229_v31 = vpop.permute.xlu0 %112 }
  0x86   :  { %v8235_v32 = vpop.permute.xlu1 %674 }
  0x87   :  { %624 = vrot.lane.b32.xlu0 %v8184_v27, %s7820_s29 }
  0x88   :  { %626 = vrot.lane.b32.xlu1 %v8190_v28, %s7820_s29 }
  0x89   :  { %v8237_v33 = vpop.permute.xlu0 %114 }
  0x8a   :  { %v8243_v34 = vpop.permute.xlu1 %676 }
  0x8b   :  { %871 = vrot.lane.b32.xlu0 %v8167_v24, %s11564_s2 }
  0x8c   :  { %873 = vrot.lane.b32.xlu1 %v8178_v26, %s11564_s2 }
  0x8d   :  { %v8245_v35 = vpop.permute.xlu0 %118 }
  0x8e   :  { %v8251_v36 = vpop.permute.xlu1 %120 }
  0x8f   :  { %875 = vrot.lane.b32.xlu0 %v8184_v27, %s11564_s2 }
  0x90   :  { %877 = vrot.lane.b32.xlu1 %v8190_v28, %s11564_s2 }
  0x91   :  { %v8253_v37 = vpop.permute.xlu0 %767 }
  0x92   :  { %v8259_v38 = vpop.permute.xlu1 %769 }
  0x93   :  { %1236 = vrot.lane.b32.xlu0 %v8105_v18, %s7824_s0 }
  0x94   :  { %1238 = vrot.lane.b32.xlu1 %v8113_v20, %s7824_s0 }
  0x95   :  { %v8261_v39 = vpop.permute.xlu0 %608 }
  0x96   :  { %v8267_v40 = vpop.permute.xlu1 %610 }
  0x97   :  { %1240 = vrot.lane.b32.xlu0 %v8119_v21, %s7824_s0  ;;  %11593 = vst [vmem:[#allocation10_spill] sm:$0xff] %v8267_v40 }
  0x98   :  { %1242 = vrot.lane.b32.xlu1 %v8167_v24, %s7824_s0 }
  0x99   :  { %v8269_v41 = vpop.permute.xlu0 %859 }
  0x9a   :  { %v8275_v42 = vpop.permute.xlu1 %861 }
  0x9b   :  { %1323 = vrot.lane.b32.xlu0 %v8042_v8, %s7825_s8  ;;  %11594 = vst [vmem:[#allocation11_spill] sm:$0xff] %v8275_v42 }
  0x9c   :  { %1058 = vrot.lane.b32.xlu1 %v8178_v26, %s11562_s21 }
  0x9d   :  { %v8277_v43 = vpop.permute.xlu0 %122 }
  0x9e   :  { %v8283_v44 = vpop.permute.xlu1 %678 }
  0x9f   :  { %1060 = vrot.lane.b32.xlu0 %v8184_v27, %s11562_s21 }
  0xa0   :  { %1062 = vrot.lane.b32.xlu1 %v8190_v28, %s11562_s21 }
  0xa1   :  { %v8289_v46 = vpop.permute.xlu0 %680 }
  0xa2   :  { %v8295_v47 = vpop.permute.xlu1 %682 }
  0xa3   :  { %1064 = vrot.lane.b32.xlu0 %v8287_v45, %s11562_s21 }
  0xa4   :  { %1151 = vrot.lane.b32.xlu1 %v8178_v26, %s11488_s20 }
  0xa5   :  { %v8297_v48 = vpop.permute.xlu0 %684 }
  0xa6   :  { %v8303_v49 = vpop.permute.xlu1 %1046 }
  0xa7   :  { %1153 = vrot.lane.b32.xlu0 %v8184_v27, %s11488_s20 }
  0xa8   :  { %1155 = vrot.lane.b32.xlu1 %v8190_v28, %s11488_s20 }
  0xa9   :  { %v8305_v50 = vpop.permute.xlu0 %1048 }
  0xaa   :  { %v8311_v51 = vpop.permute.xlu1 %771 }
  0xab   :  { %1157 = vrot.lane.b32.xlu0 %v8287_v45, %s11488_s20  ;;  %s11622_s20 = smov 101  }
  0xac   :  { %1329 = vrot.lane.b32.xlu1 %v8105_v18, %s7825_s8 }
  0xad   :  { %v8313_v52 = vpop.permute.xlu0 %773 }
  0xae   :  { %11595 = vst [vmem:[#allocation12_spill] sm:$0xff] %v8313_v52  ;;  %v8321_v54 = vpop.permute.xlu1 %775  ;;  %v8581_v52 = vsel %vm11524_vm0, %v8225_v30, %v8245_v35 }
  0xaf   :  { %1331 = vrot.lane.b32.xlu0 %v8113_v20, %s7825_s8  ;;  %11596 = vst [vmem:[#allocation13_spill] sm:$0xff] %v8321_v54  ;;  %11630 = vst [vmem:[#allocation45_spill] sm:$0xff] %v8581_v52 }
  0xb0   :  { %1333 = vrot.lane.b32.xlu1 %v8119_v21, %s7825_s8 }
  0xb1   :  { %v8323_v55 = vpop.permute.xlu0 %777 }
  0xb2   :  { %11597 = vst [vmem:[#allocation14_spill] sm:$0xff] %v8323_v55  ;;  %v8329_v56 = vpop.permute.xlu1 %1044 }
  0xb3   :  { %1335 = vrot.lane.b32.xlu0 %v8167_v24, %s7825_s8  ;;  %11598 = vst [vmem:[#allocation15_spill] sm:$0xff] %v8329_v56 }
  0xb4   :  { %1244 = vrot.lane.b32.xlu1 %v8178_v26, %s7824_s0 }
  0xb5   :  { %v8331_v57 = vpop.permute.xlu0 %1139 }
  0xb6   :  { %v8337_v58 = vpop.permute.xlu1 %1141 }
  0xb7   :  { %1246 = vrot.lane.b32.xlu0 %v8184_v27, %s7824_s0 }
  0xb8   :  { %1248 = vrot.lane.b32.xlu1 %v8190_v28, %s7824_s0 }
  0xb9   :  { %v8339_v59 = vpop.permute.xlu0 %612 }
  0xba   :  { %11599 = vst [vmem:[#allocation16_spill] sm:$0xff] %v8339_v59  ;;  %v8350_v61 = vpop.permute.xlu1 %614 }
  0xbb   :  { %1250 = vrot.lane.b32.xlu0 %v8287_v45, %s7824_s0  ;;  %11601 = vst [vmem:[#allocation18_spill] sm:$0xff] %v8350_v61 }
  0xbc   :  { %124 = vrot.lane.b32.xlu1 %v8346_v60, %s7817_s3 }
  0xbd   :  { %v8357_v63 = vpop.permute.xlu0 %616 }
  0xbe   :  { %11602 = vst [vmem:[#allocation19_spill] sm:$0xff] %v8357_v63  ;;  %v8368_v8 = vpop.permute.xlu1 %618 }
  0xbf   :  { %126 = vrot.lane.b32.xlu0 %v8355_v62, %s7817_s3  ;;  %11604 = vst [vmem:[#allocation21_spill] sm:$0xff] %v8368_v8 }
  0xc0   :  { %128 = vrot.lane.b32.xlu1 %v8364_v0, %s7817_s3  ;;  %v956_v0 = vunpack.c.l.s4 %v7827_v53 }
  0xc1   :  { %v8375_v16 = vpop.permute.xlu0 %863 }
  0xc2   :  { %11606 = vst [vmem:[#allocation23_spill] sm:$0xff] %v8375_v16  ;;  %v8381_v18 = vpop.permute.xlu1 %865  ;;  %v729_v16 = vrot.slane %v8025_v4, 1 }
  0xc3   :  { %130 = vrot.lane.b32.xlu0 %v8373_v10, %s7817_s3  ;;  %11607 = vst [vmem:[#allocation24_spill] sm:$0xff] %v8381_v18  ;;  %v951_v18 = vcombine.high %v8009_v1, %v8025_v4 }
  0xc4   :  { %1337 = vrot.lane.b32.xlu1 %v8178_v26, %s7825_s8  ;;  %v8401_v26 = vrot.slane %v8172_v25, %v8087_v14 }
  0xc5   :  { %v8383_v20 = vpop.permute.xlu0 %867 }
  0xc6   :  { %11608 = vst [vmem:[#allocation25_spill] sm:$0xff] %v8383_v20  ;;  %v8389_v21 = vpop.permute.xlu1 %869  ;;  %v11665_v23 = vld [vmem:[#allocation21_spill] sm:$0xff] }
  0xc7   :  { %1339 = vrot.lane.b32.xlu0 %v8184_v27, %s7825_s8  ;;  %11609 = vst [vmem:[#allocation26_spill] sm:$0xff] %v8389_v21  ;;  %v957_v27 = vunpack.c.0.s8 %v956_v0  ;;  %v952_v21 = vcombine.high %v8047_v9, %v8014_v2 }
  0xc8   :  { %1341 = vrot.lane.b32.xlu1 %v8190_v28, %s7825_s8 }
  0xc9   :  { %v8391_v24 = vpop.permute.xlu0 %1137  ;;  %v8418_v20 = vsub.s32 %v957_v27, %v8020_v3  ;;  %v8434_v3 = vsel %vm11524_vm0, %v8222_v29, %v8229_v31 }
  0xca   :  { %11610 = vst [vmem:[#allocation27_spill] sm:$0xff] %v8391_v24  ;;  %v8397_v10 = vpop.permute.xlu1 %1232  ;;  %v1285_v24 = vrot.slane %v8025_v4, 7 }
  0xcb   :  { %1343 = vrot.lane.b32.xlu0 %v8287_v45, %s7825_s8  ;;  %v961_v27 = vrot.slane %v951_v18, %v8418_v20 }
  0xcc   :  { %694 = vrot.lane.b32.xlu1 %v8287_v45, %s7818_s4 }
  0xcd   :  { %v8403_v60 = vpop.permute.xlu0 %1234 }
  0xce   :  { %11611 = vst [vmem:[#allocation28_spill] sm:$0xff] %v8403_v60  ;;  %v8409_v28 = vpop.permute.xlu1 %1230 }
  0xcf   :  { %696 = vrot.lane.b32.xlu0 %v8401_v26, %s7818_s4  ;;  %11612 = vst [vmem:[#allocation29_spill] sm:$0xff] %v8409_v28 }
  0xd0   :  { %787 = vrot.lane.b32.xlu1 %v8287_v45, %s11568_s5 }
  0xd1   :  { %v8411_v53 = vpop.permute.xlu0 %686 }
  0xd2   :  { %11613 = vst [vmem:[#allocation30_spill] sm:$0xff] %v8411_v53  ;;  %v8424_v0 = vpop.permute.xlu1 %688  ;;  %v968_v53 = vrot.slane %v952_v21, %v8418_v20  ;;  %v953_v21 = vcombine.high %v8060_v11, %v8067_v12 }
  0xd3   :  { %789 = vrot.lane.b32.xlu0 %v8401_v26, %s11568_s5  ;;  %11614 = vst [vmem:[#allocation31_spill] sm:$0xff] %v8424_v0 }
  0xd4   :  { %628 = vrot.lane.b32.xlu1 %v8287_v45, %s7820_s29  ;;  %v983_v18 = vcombine.low %v961_v27, %v968_v53 }
  0xd5   :  { %v8426_v8 = vpop.permute.xlu0 %690 }
  0xd6   :  { %11615 = vst [vmem:[#allocation32_spill] sm:$0xff] %v8426_v8  ;;  %v8439_v55 = vpop.permute.xlu1 %692  ;;  %v8444_v8 = vsel %vm11524_vm0, %v8092_v15, %v8222_v29  ;;  %v8460_v15 = vrot.slane %v8172_v25, %v8099_v17  ;;  %v1072_v29 = vsel %vm1070_vm5, %v8303_v49, %v8305_v50 }
  0xd7   :  { %630 = vrot.lane.b32.xlu0 %v8401_v26, %s7820_s29  ;;  %11616 = vst [vmem:[#allocation33_spill] sm:$0xff] %v8439_v55  ;;  %v954_v0 = vcombine.high %v8444_v8, %v8434_v3 }
  0xd8   :  { %879 = vrot.lane.b32.xlu1 %v8287_v45, %s11564_s2  ;;  %v635_v45 = vsel %vm11558_vm3, %v8261_v39, %v8267_v40 }
  0xd9   :  { %v8450_v28 = vpop.permute.xlu0 %1050  ;;  %v982_v54 = vrot.slane %v954_v0, %v8418_v20  ;;  %v886_v0 = vsel %vm11547_vm4, %v8269_v41, %v8275_v42  ;;  %v8530_v42 = vld [vmem:[%s11583_s24 + $0x58] sm:$0x1] }
  0xda   :  { %11617 = vst [vmem:[#allocation34_spill] sm:$0xff] %v8450_v28  ;;  %v8456_v55 = vpop.permute.xlu1 %1052  ;;  %v975_v28 = vrot.slane %v953_v21, %v8418_v20  ;;  %v913_v21 = vrot.slane %v8025_v4, 3  ;;  %11625 = vst [vmem:[#allocation41_spill] sm:$0xff] %v8530_v42 }
  0xdb   :  { %881 = vrot.lane.b32.xlu0 %v8401_v26, %s11564_s2  ;;  %11618 = vst [vmem:[#allocation35_spill] sm:$0xff] %v8456_v55  ;;  %v8473_v55 = vrot.slane %v983_v18, %v8418_v20 }
  0xdc   :  { %1066 = vrot.lane.b32.xlu1 %v8401_v26, %s11562_s21  ;;  %v984_v63 = vcombine.low %v975_v28, %v982_v54  ;;  %v701_v54 = vsel %vm11557_vm1, %v8235_v32, %v8243_v34  ;;  %v939_v40 = vmul.f32 %v913_v21, %v886_v0  ;;  %v8545_v28 = vld [vmem:[%s11583_s24 + $0x60] sm:$0x1] }
  0xdd   :  { %v8468_v27 = vpop.permute.xlu0 %1054  ;;  %11627 = vst [vmem:[#allocation43_spill] sm:$0xff] %v8545_v28 }
  0xde   :  { %11619 = vst [vmem:[#allocation36_spill] sm:$0xff] %v8468_v27  ;;  %v8482_v27 = vpop.permute.xlu1 %1056  ;;  %v998_v18 = vrot.slane %v984_v63, %v8418_v20  ;;  %v794_v63 = vsel %vm11556_vm2, %v8253_v37, %v8259_v38 }
  0xdf   :  { %1068 = vrot.lane.b32.xlu0 %v8460_v15, %s11562_s21  ;;  %11620 = vst [vmem:[#allocation37_spill] sm:$0xff] %v8482_v27  ;;  %v755_v27 = vmul.f32 %v729_v16, %v701_v54  ;;  %v11628_v54 = vrot.slane %v8025_v4, 2 }
  0xe0   :  { %1159 = vrot.lane.b32.xlu1 %v8401_v26, %s11622_s20 }
  0xe1   :  { %v8490_v53 = vpop.permute.xlu0 %779  ;;  %v847_v56 = vmul.f32 %v11628_v54, %v794_v63  ;;  %v1404_v0 = vrot.slane %v755_v27, 7  ;;  %v8571_v54 = vsel %vm11524_vm0, %v8229_v31, %v8237_v33  ;;  %v8576_v27 = vsel %vm11524_vm0, %v8237_v33, %v8225_v30 }
  0xe2   :  { %11621 = vst [vmem:[#allocation38_spill] sm:$0xff] %v8490_v53  ;;  %v8505_v61 = vpop.permute.xlu1 %781  ;;  %v662_v53 = vmul.f32 %v635_v45, %v8025_v4  ;;  %v1258_v45 = vsel %vm1256_vm8, %v8397_v10, %v8403_v60  ;;  %v8594_v33 = vsel %vm11524_vm0, %v8251_v36, %v8277_v43  ;;  %v11633_v30 = vrot.slane %v8025_v4, 5 }
  0xe3   :  { %1161 = vrot.lane.b32.xlu0 %v8460_v15, %s11622_s20  ;;  %11623 = vst [vmem:[#allocation39_spill] sm:$0xff] %v8505_v61  ;;  %11632 = vst [vmem:[#allocation47_spill] sm:$0xff] %v8594_v33  ;;  %v11634_v60 = vrot.slane %v8025_v4, 6 }
  0xe4   :  { %1252 = vrot.lane.b32.xlu1 %v8401_v26, %s7824_s0  ;;  %v1693_v31 = vsel %vm1691_vm7, %v662_v53, %v1404_v0 }
  0xe5   :  { %v8518_v61 = vpop.permute.xlu0 %783 }
  0xe6   :  { %11624 = vst [vmem:[#allocation40_spill] sm:$0xff] %v8518_v61  ;;  %v8535_v16 = vpop.permute.xlu1 %785  ;;  %v1482_v61 = vrot.slane %v939_v40, 5  ;;  %v1311_v40 = vmul.f32 %v1285_v24, %v1258_v45 }
  0xe7   :  { %1254 = vrot.lane.b32.xlu0 %v8460_v15, %s7824_s0  ;;  %11626 = vst [vmem:[#allocation42_spill] sm:$0xff] %v8535_v16  ;;  %v999_v16 = vcombine.low %v8473_v55, %v998_v18  ;;  %v8562_v55 = vsel %vm11524_vm0, %v8245_v35, %v8251_v36  ;;  %v1165_v18 = vsel %vm1163_vm6, %v8331_v57, %v8337_v58  ;;  %vm7828_vm0 = vmmov 1  }
  0xe8   :  { %132 = vrot.lane.b32.xlu1 %v8530_v42, %s7817_s3  ;;  %11629 = vst [vmem:[#allocation44_spill] sm:$0xff] %v8562_v55  ;;  %v1125_v35 = vmul.f32 %v11633_v30, %v1072_v29  ;;  %v1443_v42 = vrot.slane %v847_v56, 6  ;;  %v1000_v36 = vcombine.high %v8571_v54, %v8576_v27  ;;  %v1002_v56 = vcombine.high %v8594_v33, %v8594_v33 }
  0xe9   :  { %v8555_v21 = vpop.permute.xlu0 %1143  ;;  %v8599_v59 = vmul.f32 %v999_v16, %v8030_v5 }
  0xea   :  { %v8588_v63 = vpop.permute.xlu1 %1145  ;;  %v1707_v29 = vsel %vm1705_vm9, %v1693_v31, %v1443_v42  ;;  %v1588_v16 = vrot.slane %v1125_v35, 3  ;;  %v726_v42 = vsel %vm11557_vm1, 0.0, %v8235_v32  ;;  %v819_v35 = vsel %vm11556_vm2, 0.0, %v8253_v37 }
  0xeb   :  { %134 = vrot.lane.b32.xlu0 %v8545_v28, %s7817_s3  ;;  %11631 = vst [vmem:[#allocation46_spill] sm:$0xff] %v8588_v63  ;;  %v1001_v28 = vcombine.high %v8581_v52, %v8562_v55  ;;  %v1218_v63 = vmul.f32 %v11634_v60, %v1165_v18  ;;  %v1721_v24 = vsel %vm1719_vm10, %v1707_v29, %v1482_v61  ;;  %v1666_v29 = vrot.slane %v1311_v40, 1 }
  0xec   :  { %1345 = vrot.lane.b32.xlu1 %v8401_v26, %s7825_s8  ;;  %v1516_v26 = vrot.slane %v8599_v59, %v8036_v7  ;;  %v1009_v61 = vrot.slane %v1000_v36, %v8418_v20  ;;  %v660_v32 = vsel %vm11558_vm3, 0.0, %v8261_v39  ;;  %v11635_v37 = vrot.slane %v8009_v1, 1 }
  0xed   :  { %v8605_v53 = vpop.permute.xlu0 %1147  ;;  %v1016_v18 = vrot.slane %v1001_v28, %v8418_v20  ;;  %v1627_v31 = vrot.slane %v1218_v63, 2  ;;  %v911_v28 = vsel %vm11547_vm4, 0.0, %v8269_v41  ;;  %v1023_v63 = vrot.slane %v1002_v56, %v8418_v20 }
  0xee   :  { %v8619_v60 = vpop.permute.xlu1 %1149  ;;  %v1735_v36 = vsel %vm1733_vm13, %v1721_v24, %v1516_v26  ;;  %v754_v40 = vmul.f32 %v11635_v37, %v726_v42  ;;  %v11636_v42 = vrot.slane %v8009_v1, 2  ;;  %v661_v4 = vmul.f32 %v660_v32, %v8009_v1 }
  0xef   :  { %1347 = vrot.lane.b32.xlu0 %v8460_v15, %s7825_s8  ;;  %v1749_v39 = vsel %vm1747_vm11, %v1735_v36, %v1588_v16  ;;  %v1024_v45 = vcombine.low %v1009_v61, %v1016_v18  ;;  %v11637_v16 = vrot.slane %v8009_v1, 3  ;;  %v702_v41 = vsel %vm11557_vm1, %v8243_v34, %v8283_v44 }
  0xf0   :  { %698 = vrot.lane.b32.xlu1 %v8460_v15, %s7818_s4  ;;  %v1763_v26 = vsel %vm1761_vm14, %v1749_v39, %v1627_v31  ;;  %v846_v37 = vmul.f32 %v11636_v42, %v819_v35  ;;  %v11644_v34 = vrot.slane %v8060_v11, 1  ;;  %v11658_v39 = vld [vmem:[#allocation13_spill] sm:$0xff]  ;;  %s7835_s4 = smov 14  }
  0xf1   :  { %v8628_v30 = vpop.permute.xlu0 %1325  ;;  %v938_v36 = vmul.f32 %v11637_v16, %v911_v28  ;;  %v1777_v18 = vsel %vm1775_vm15, %v1763_v26, %v1666_v29  ;;  %v1403_v28 = vrot.slane %v754_v40, 7  ;;  %v1031_v16 = vrot.slane %v1024_v45, %v8418_v20  ;;  %v11655_v26 = vld [vmem:[#allocation18_spill] sm:$0xff] }
  0xf2   :  { %v8645_v43 = vpop.permute.xlu1 %1327  ;;  %v1442_v40 = vrot.slane %v846_v37, 6  ;;  %v11643_v37 = vrot.slane %v8014_v2, 1 }
  0xf3   :  { %791 = vrot.lane.b32.xlu0 %v8460_v15, %s11568_s5  ;;  %v1351_v0 = vsel %vm11525_vm12, %v8628_v30, %v8645_v43  ;;  %vm8669_vm12 = vmpackc.low %vm1691_vm7, %vm7828_vm0  ;;  %v1481_v32 = vrot.slane %v938_v36, 5  ;;  %vm11561_vm0 = vcmask 72704   ;;  %s7848_s5 = smov 8  }
  0xf4   :  { %632 = vrot.lane.b32.xlu1 %v8460_v15, %s7820_s29  ;;  %v1378_v5 = vmul.f32 %v1351_v0, %v8355_v62  ;;  %v8676_v62 = vld [vmem:[%s11583_s24 + $0x68] sm:$0x1]  ;;  %v1038_v0 = vrot.slane %v1023_v63, %v8418_v20  ;;  %v704_v63 = vsel %vm11557_vm1, %v8289_v46, %v8295_v47  ;;  %s7837_s29 = smov 115   ;;  %s7838_s24 = smov 114  }
  0xf5   :  { %v8655_v56 = vpop.permute.xlu0 %620  ;;  %11640 = vst [vmem:[#allocation48_spill] sm:$0xff] %v8676_v62  ;;  %v758_v42 = vmul.f32 %v11644_v34, %v704_v63  ;;  %v11652_v63 = vld [vmem:[#allocation10_spill] sm:$0xff] }
  0xf6   :  { %v8681_v31 = vpop.permute.xlu1 %622  ;;  %v6473_v35 = vpack.c.bf16 %v1378_v5, %v1777_v18  ;;  %v1692_v18 = vsel %vm1691_vm7, %v661_v4, %v1403_v28  ;;  %v1039_v45 = vcombine.low %v1031_v16, %v1038_v0  ;;  %v705_v4 = vsel %vm11557_vm1, %v8295_v47, %v8297_v48 }
  0xf7   :  { %883 = vrot.lane.b32.xlu0 %v8460_v15, %s11564_s2  ;;  %v1706_v0 = vsel %vm1705_vm9, %v1692_v18, %v1442_v40  ;;  %v11642_v47 = vrot.slane %v8047_v9, 1  ;;  %v11646_v18 = vrot.slane %v8067_v12, 1  ;;  %v1512_v16 = vrot.slane %v8599_v59, %v8033_v6 }
  0xf8   :  { %6475 = vmatprep.subr.msk.bf16.mxu0 %vm8669_vm12, %v6473_v35  ;;  %136 = vrot.lane.b32.xlu1 %v8676_v62, %s7817_s3  ;;  %v703_v35 = vsel %vm11557_vm1, %v8283_v44, %v8289_v46  ;;  %v1720_v15 = vsel %vm1719_vm10, %v1706_v0, %v1481_v32  ;;  %v8731_v40 = vmul.f32 %v1039_v45, %v8172_v25  ;;  %v1407_v46 = vrot.slane %v758_v42, 7  ;;  %v11649_v25 = vld [vmem:[#allocation15_spill] sm:$0xff]  ;;  %s11816_s3 = sld [smem:[#allocation61_spill]] }
  0xf9   :  { %v8690_v24 = vpop.permute.xlu0 %624  ;;  %v756_v20 = vmul.f32 %v11642_v47, %v702_v41  ;;  %v757_v36 = vmul.f32 %v11643_v37, %v703_v35  ;;  %v8735_v44 = vmul.f32 %v11646_v18, %v705_v4  ;;  %v795_v4 = vsel %vm11556_vm2, %v8259_v38, %v8311_v51  ;;  %v11650_v38 = vld [vmem:[#allocation12_spill] sm:$0xff] }
  0xfa   :  { %v8709_v5 = vpop.permute.xlu1 %626  ;;  %11645 = vst [vmem:[#allocation50_spill] sm:$0xff] %v8731_v40  ;;  %v1734_v37 = vsel %vm1733_vm13, %v1720_v15, %v1512_v16  ;;  %v1071_v45 = vsel %vm1070_vm5, %v11649_v25, %v8303_v49  ;;  %v796_v15 = vsel %vm11556_vm2, %v8311_v51, %v11650_v38  ;;  %v11651_v16 = vld [vmem:[#allocation16_spill] sm:$0xff]  ;;  %v11654_v42 = vrot.slane %v8047_v9, 2  ;;  %v11657_v25 = vld [vmem:[#allocation27_spill] sm:$0xff] }
  0xfb   :  { %v1405_v18 = vrot.slane %v756_v20, 7  ;;  %v1406_v41 = vrot.slane %v757_v36, 7  ;;  %v1408_v29 = vrot.slane %v8735_v44, 7  ;;  %v636_v0 = vsel %vm11558_vm3, %v11652_v63, %v11651_v16  ;;  %v11656_v44 = vld [vmem:[#allocation19_spill] sm:$0xff] }
  0xfc   :  { %v848_v36 = vmul.f32 %v11654_v42, %v795_v4  ;;  %v637_v49 = vsel %vm11558_vm3, %v11651_v16, %v11655_v26  ;;  %v638_v51 = vsel %vm11558_vm3, %v11655_v26, %v11656_v44  ;;  %v1164_v63 = vsel %vm1163_vm6, %v11657_v25, %v8331_v57  ;;  %v11660_v4 = vld [vmem:[#allocation23_spill] sm:$0xff]  ;;  %v11662_v16 = vld [vmem:[#allocation29_spill] sm:$0xff]  ;;  %v11664_v25 = vld [vmem:[#allocation14_spill] sm:$0xff] }
  0xfd   :  { %v8718_v28 = vpop.permute.xlu0 %871  ;;  %v797_v47 = vsel %vm11556_vm2, %v11650_v38, %v11658_v39  ;;  %v11659_v20 = vrot.slane %v8009_v1, 5  ;;  %v11661_v42 = vld [vmem:[#allocation11_spill] sm:$0xff]  ;;  %v1257_v52 = vsel %vm1256_vm8, %v11662_v16, %v8397_v10  ;;  %v11663_v62 = vrot.slane %v8014_v2, 2 }
  0xfe   :  { %11641 = vst [vmem:[#allocation49_spill] sm:$0xff] %v8718_v28  ;;  %v8739_v32 = vpop.permute.xlu1 %873  ;;  %v887_v55 = vsel %vm11547_vm4, %v11661_v42, %v11660_v4  ;;  %v798_v38 = vsel %vm11556_vm2, %v11658_v39, %v11664_v25  ;;  %v663_v6 = vmul.f32 %v636_v0, %v8047_v9  ;;  %v665_v42 = vmul.f32 %v638_v51, %v8060_v11 }
  0xff   :  { %11647 = vst [vmem:[#allocation51_spill] sm:$0xff] %v8739_v32  ;;  %v1124_v33 = vmul.f32 %v11659_v20, %v1071_v45  ;;  %v849_v57 = vmul.f32 %v11663_v62, %v796_v15  ;;  %v664_v20 = vmul.f32 %v637_v49, %v8014_v2  ;;  %v639_v10 = vsel %vm11558_vm3, %v11656_v44, %v11665_v23  ;;  %v11669_v45 = vld [vmem:[#allocation24_spill] sm:$0xff] }
 0x100   :  { %v11666_v16 = vrot.slane %v8009_v1, 6  ;;  %v11667_v39 = vrot.slane %v8060_v11, 2  ;;  %v11668_v0 = vrot.slane %v8047_v9, 3  ;;  %v888_v49 = vsel %vm11547_vm4, %v11660_v4, %v11669_v45  ;;  %v11673_v4 = vld [vmem:[#allocation26_spill] sm:$0xff] }
 0x101   :  { %v8754_v34 = vpop.permute.xlu0 %875  ;;  %v11670_v51 = vrot.slane %v8009_v1, 7  ;;  %v1444_v40 = vrot.slane %v848_v36, 6  ;;  %v11671_v44 = vrot.slane %v8067_v12, 2  ;;  %v1696_v36 = vsel %vm1691_vm7, %v665_v42, %v1407_v46 }
 0x102   :  { %11648 = vst [vmem:[#allocation52_spill] sm:$0xff] %v8754_v34  ;;  %v8770_v35 = vpop.permute.xlu1 %877  ;;  %v1217_v62 = vmul.f32 %v11666_v16, %v1164_v63  ;;  %v850_v22 = vmul.f32 %v11667_v39, %v797_v47  ;;  %v1587_v63 = vrot.slane %v1124_v33, 3  ;;  %v11672_v16 = vld [vmem:[#allocation25_spill] sm:$0xff]  ;;  %v1445_v39 = vrot.slane %v849_v57, 6 }
 0x103   :  { %11653 = vst [vmem:[#allocation15_spill] sm:$0xff] %v8770_v35  ;;  %v940_v35 = vmul.f32 %v11668_v0, %v887_v55  ;;  %v1310_v7 = vmul.f32 %v11670_v51, %v1257_v52  ;;  %v851_v34 = vmul.f32 %v11671_v44, %v798_v38  ;;  %v889_v32 = vsel %vm11547_vm4, %v11669_v45, %v11672_v16 }
 0x104   :  { %v1694_v55 = vsel %vm1691_vm7, %v663_v6, %v1405_v18  ;;  %v666_v0 = vmul.f32 %v639_v10, %v8067_v12  ;;  %v890_v1 = vsel %vm11547_vm4, %v11672_v16, %v11673_v4  ;;  %v1695_v52 = vsel %vm1691_vm7, %v664_v20, %v1406_v41 }
 0x105   :  { %v8796_v26 = vpop.permute.xlu0 %1236  ;;  %v11674_v33 = vrot.slane %v8014_v2, 3  ;;  %v1626_v51 = vrot.slane %v1217_v62, 2  ;;  %v1446_v57 = vrot.slane %v850_v22, 6  ;;  %v1483_v44 = vrot.slane %v940_v35, 5 }
 0x106   :  { %v8813_v15 = vpop.permute.xlu1 %1238  ;;  %v11675_v6 = vrot.slane %v8060_v11, 3  ;;  %v1665_v10 = vrot.slane %v1310_v7, 1  ;;  %v1447_v28 = vrot.slane %v851_v34, 6  ;;  %v1748_v16 = vsel %vm1747_vm11, %v1734_v37, %v1587_v63  ;;  %v11678_v7 = vld [vmem:[#allocation34_spill] sm:$0xff]  ;;  %v11679_v34 = vld [vmem:[#allocation17_spill] sm:$0xff] }
 0x107   :  { %v941_v38 = vmul.f32 %v11674_v33, %v888_v49  ;;  %v1708_v41 = vsel %vm1705_vm9, %v1694_v55, %v1444_v40  ;;  %v11676_v46 = vrot.slane %v8067_v12, 3  ;;  %v1709_v62 = vsel %vm1705_vm9, %v1695_v52, %v1445_v39  ;;  %v11680_v52 = vld [vmem:[#allocation35_spill] sm:$0xff] }
 0x108   :  { %v942_v18 = vmul.f32 %v11675_v6, %v889_v32  ;;  %v1710_v49 = vsel %vm1705_vm9, %v1696_v36, %v1446_v57  ;;  %v1697_v22 = vsel %vm1691_vm7, %v666_v0, %v1408_v29  ;;  %vm11677_vm4 = vcmask 809984   ;;  %v11681_v36 = vld [vmem:[#allocation30_spill] sm:$0xff]  ;;  %v11682_v33 = vld [vmem:[#allocation31_spill] sm:$0xff]  ;;  %v11683_v6 = vld [vmem:[#allocation32_spill] sm:$0xff] }
 0x109   :  { %v8829_v47 = vpop.permute.xlu0 %1240  ;;  %v943_v20 = vmul.f32 %v11676_v46, %v890_v1  ;;  %v1484_v32 = vrot.slane %v941_v38, 5  ;;  %v1073_v37 = vsel %vm1070_vm5, %v8305_v50, %v11678_v7  ;;  %v1762_v55 = vsel %vm1761_vm14, %v1748_v16, %v1626_v51  ;;  %v11684_v16 = vld [vmem:[#allocation33_spill] sm:$0xff] }
 0x10a   :  { %v8840_v45 = vpop.permute.xlu1 %1242  ;;  %v1722_v39 = vsel %vm1719_vm10, %v1708_v41, %v1483_v44  ;;  %v1485_v1 = vrot.slane %v942_v18, 5  ;;  %v1074_v29 = vsel %vm1070_vm5, %v11678_v7, %v11680_v52  ;;  %v706_v50 = vsel %vm11557_vm1, %v8297_v48, %v11681_v36 }
 0x10b   :  { %v1486_v0 = vrot.slane %v943_v20, 5  ;;  %v707_v38 = vsel %vm11557_vm1, %v11681_v36, %v11682_v33  ;;  %v1711_v44 = vsel %vm1705_vm9, %v1697_v22, %v1447_v28  ;;  %v708_v18 = vsel %vm11557_vm1, %v11682_v33, %v11683_v6 }
 0x10c   :  { %v11685_v41 = vrot.slane %v8047_v9, 5  ;;  %v1723_v46 = vsel %vm1719_vm10, %v1709_v62, %v1484_v32  ;;  %v11686_v20 = vrot.slane %v8014_v2, 5  ;;  %v11688_v7 = vrot.slane %v8599_v59, %v8082_v13  ;;  %v8899_v62 = vld [vmem:[%s11689_s6] sm:$0xff]  ;;  %s11808_s6 = sld [smem:[#allocation58_spill]] }
 0x10d   :  { %v1324_v42 = vpop.permute.xlu0 %1323  ;;  %v1724_v32 = vsel %vm1719_vm10, %v1710_v49, %v1485_v1  ;;  %v11693_v36 = vrot.slane %v8571_v54, 1  ;;  %v11694_v49 = vrot.slane %v8576_v27, 1  ;;  %v11711_v13 = vrot.slane %v8444_v8, 2 }
 0x10e   :  { %v1350_v35 = vsel %vm11677_vm4, %v1324_v42, %v8628_v30  ;;  %v8857_v63 = vpop.permute.xlu1 %1058  ;;  %v1776_v30 = vsel %vm1775_vm15, %v1762_v55, %v1665_v10  ;;  %v709_v10 = vsel %vm11557_vm1, %v11683_v6, %v11684_v16  ;;  %v1126_v48 = vmul.f32 %v11685_v41, %v1073_v37 }
 0x10f   :  { %v1377_v40 = vmul.f32 %v1350_v35, %v11679_v34  ;;  %v1127_v42 = vmul.f32 %v11686_v20, %v1074_v29  ;;  %v11687_v35 = vld [vmem:[#allocation36_spill] sm:$0xff]  ;;  %v1736_v34 = vsel %vm1733_vm13, %v1722_v39, %v11688_v7  ;;  %v11690_v37 = vrot.slane %v8444_v8, 1  ;;  %v11692_v29 = vld [vmem:[#allocation37_spill] sm:$0xff]  ;;  %v11696_v20 = vld [vmem:[#allocation46_spill] sm:$0xff] }
 0x110   :  { %v1075_v28 = vsel %vm1070_vm5, %v11680_v52, %v11687_v35  ;;  %v11691_v55 = vrot.slane %v8434_v3, 1  ;;  %v1725_v39 = vsel %vm1719_vm10, %v1711_v44, %v1486_v0  ;;  %v8916_v33 = vmul.f32 %v11693_v36, %v708_v18 }
 0x111   :  { %v8871_v57 = vpop.permute.xlu0 %1060  ;;  %v6476_v51 = vpack.c.bf16 %v1377_v40, %v1776_v30  ;;  %v8904_v40 = vmul.f32 %v11690_v37, %v706_v50  ;;  %v1076_v30 = vsel %vm1070_vm5, %v11687_v35, %v11692_v29  ;;  %v8920_v1 = vmul.f32 %v11694_v49, %v709_v10 }
 0x112   :  { %v8890_v22 = vpop.permute.xlu1 %1062  ;;  %v8908_v52 = vmul.f32 %v11691_v55, %v707_v38  ;;  %v1166_v50 = vsel %vm1163_vm6, %v8337_v58, %v8555_v21  ;;  %v11695_v6 = vrot.slane %v8060_v11, 5  ;;  %v1167_v0 = vsel %vm1163_vm6, %v8555_v21, %v11696_v20 }
 0x113   :  { %6478 = vmatpush1.bf16.msk.msra.mxu0 %vm8669_vm12, %v6476_v51  ;;  %v1589_v51 = vrot.slane %v1126_v48, 3  ;;  %v1168_v44 = vsel %vm1163_vm6, %v11696_v20, %v8605_v53  ;;  %v1590_v18 = vrot.slane %v1127_v42, 3  ;;  %v11697_v58 = vrot.slane %v8599_v59, %v8099_v17 }
 0x114   :  { %v1128_v41 = vmul.f32 %v11695_v6, %v1075_v28  ;;  %v11698_v48 = vrot.slane %v8067_v12, 5  ;;  %v11699_v21 = vrot.slane %v8599_v59, %v8087_v14  ;;  %v11700_v37 = vmov 0.0  }
 0x115   :  { %v8925_v38 = vpop.permute.xlu0 %1064  ;;  %v1738_v10 = vsel %vm1733_vm13, %v1724_v32, %v11697_v58  ;;  %v11701_v36 = vrot.slane %v8599_v59, %v8108_v19  ;;  %v11703_v20 = vrot.slane %v8014_v2, 6 }
 0x116   :  { %6048 = vmatmul.mubr.msk.f32.vlgmr.msra.gmra.mrb[0].mxu0 %vm11561_vm0, %v8899_v62  ;;  %v1129_v35 = vmul.f32 %v11698_v48, %v1076_v30  ;;  %v8943_v28 = vpop.permute.xlu1 %1151  ;;  %v1737_v7 = vsel %vm1733_vm13, %v1723_v46, %v11699_v21  ;;  %v11702_v30 = vrot.slane %v8047_v9, 6  ;;  %v11704_v46 = vrot.slane %v8060_v11, 6 }
 0x117   :  { %2038 = vmatprep.mubr.f32.mxu0 %v11700_v37  ;;  %v1739_v32 = vsel %vm1733_vm13, %v1725_v39, %v11701_v36  ;;  %v1220_v58 = vmul.f32 %v11703_v20, %v1167_v0  ;;  %v1260_v21 = vsel %vm1256_vm8, %v8796_v26, %v8813_v15  ;;  %v1591_v39 = vrot.slane %v1128_v41, 3  ;;  %v11705_v36 = vld [vmem:[#allocation28_spill] sm:$0xff]  ;;  %v11706_v0 = vld [vmem:[#allocation38_spill] sm:$0xff]  ;;  %v11707_v41 = vld [vmem:[#allocation39_spill] sm:$0xff] }
 0x118   :  { %v1219_v49 = vmul.f32 %v11702_v30, %v1166_v50  ;;  %v1221_v48 = vmul.f32 %v11704_v46, %v1168_v44  ;;  %v1259_v50 = vsel %vm1256_vm8, %v11705_v36, %v8796_v26  ;;  %v1750_v30 = vsel %vm1747_vm11, %v1736_v34, %v1589_v51  ;;  %v11708_v26 = vld [vmem:[#allocation40_spill] sm:$0xff] }
 0x119   :  { %v8966_v42 = vpop.permute.xlu0 %1153  ;;  %v1592_v6 = vrot.slane %v1129_v35, 3  ;;  %v799_v44 = vsel %vm11556_vm2, %v11664_v25, %v11706_v0  ;;  %v1169_v20 = vsel %vm1163_vm6, %v8605_v53, %v8619_v60  ;;  %v1751_v55 = vsel %vm1747_vm11, %v1737_v7, %v1590_v18 }
 0x11a   :  { %v8979_v46 = vpop.permute.xlu1 %1155  ;;  %v800_v19 = vsel %vm11556_vm2, %v11706_v0, %v11707_v41  ;;  %v801_v34 = vsel %vm11556_vm2, %v11707_v41, %v11708_v26  ;;  %v1628_v51 = vrot.slane %v1219_v49, 2  ;;  %v11709_v35 = vrot.slane %v8014_v2, 7 }
 0x11b   :  { %v1629_v36 = vrot.slane %v1220_v58, 2  ;;  %v1630_v17 = vrot.slane %v1221_v48, 2  ;;  %v11710_v53 = vrot.slane %v8047_v9, 7  ;;  %v1262_v18 = vsel %vm1256_vm8, %v8829_v47, %v8840_v45 }
 0x11c   :  { %v1313_v25 = vmul.f32 %v11709_v35, %v1260_v21  ;;  %v1752_v0 = vsel %vm1747_vm11, %v1738_v10, %v1591_v39  ;;  %v9000_v41 = vmul.f32 %v11711_v13, %v799_v44  ;;  %v11712_v2 = vrot.slane %v8067_v12, 6  ;;  %v11715_v39 = vld [vmem:[#allocation42_spill] sm:$0xff] }
 0x11d   :  { %v1312_v14 = vmul.f32 %v11710_v53, %v1259_v50  ;;  %v8995_v7 = vpop.permute.xlu0 %1157  ;;  %v1261_v9 = vsel %vm1256_vm8, %v8813_v15, %v8829_v47  ;;  %v1753_v58 = vsel %vm1747_vm11, %v1739_v32, %v1592_v6  ;;  %v11713_v48 = vrot.slane %v8434_v3, 2 }
 0x11e   :  { %v1222_v49 = vmul.f32 %v11712_v2, %v1169_v20  ;;  %v11714_v50 = vrot.slane %v8571_v54, 2  ;;  %v802_v13 = vsel %vm11556_vm2, %v11708_v26, %v11715_v39  ;;  %v1330_v44 = vpop.permute.xlu1 %1329  ;;  %v1668_v20 = vrot.slane %v1313_v25, 1  ;;  %v11718_v25 = vld [vmem:[#allocation20_spill] sm:$0xff]  ;;  %vm11719_vm2 = vmmov %vm11677_vm4 }
 0x11f   :  { %v9010_v21 = vmul.f32 %v11713_v48, %v800_v19  ;;  %v11716_v35 = vrot.slane %v8067_v12, 7  ;;  %v1352_v15 = vsel %vm11677_vm4, %v8645_v43, %v1330_v44  ;;  %v1764_v47 = vsel %vm1761_vm14, %v1750_v30, %v1628_v51  ;;  %v11720_v30 = vld [vmem:[#allocation22_spill] sm:$0xff] }
 0x120   :  { %v9014_v10 = vmul.f32 %v11714_v50, %v801_v34  ;;  %v1766_v19 = vsel %vm1761_vm14, %v1752_v0, %v1630_v17  ;;  %v1667_v32 = vrot.slane %v1312_v14, 1  ;;  %v11717_v6 = vrot.slane %v8060_v11, 7 }
 0x121   :  { %v1315_v53 = vmul.f32 %v11716_v35, %v1262_v18  ;;  %v1332_v2 = vpop.permute.xlu0 %1331  ;;  %v1765_v48 = vsel %vm1761_vm14, %v1751_v55, %v1629_v36  ;;  %v1631_v26 = vrot.slane %v1222_v49, 2  ;;  %v640_v12 = vsel %vm11558_vm3, %v11665_v23, %v8655_v56  ;;  %v11721_v23 = vld [vmem:[#allocation49_spill] sm:$0xff] }
 0x122   :  { %v1314_v34 = vmul.f32 %v11717_v6, %v1261_v9  ;;  %v1379_v18 = vmul.f32 %v1352_v15, %v11718_v25  ;;  %v1353_v43 = vsel %vm11719_vm2, %v1330_v44, %v1332_v2  ;;  %v641_v17 = vsel %vm11558_vm3, %v8655_v56, %v8681_v31  ;;  %v1334_v55 = vpop.permute.xlu1 %1333  ;;  %v11723_v9 = vld [vmem:[#allocation51_spill] sm:$0xff]  ;;  %v11725_v15 = vld [vmem:[#allocation52_spill] sm:$0xff] }
 0x123   :  { %v642_v11 = vsel %vm11558_vm3, %v8681_v31, %v8690_v24  ;;  %v643_v14 = vsel %vm11558_vm3, %v8690_v24, %v8709_v5  ;;  %v1380_v51 = vmul.f32 %v1353_v43, %v11720_v30  ;;  %vm11722_vm4 = vcmask 7168   ;;  %v11730_v30 = vld [vmem:[#allocation43_spill] sm:$0xff] }
 0x124   :  { %v891_v36 = vsel %vm11722_vm4, %v11673_v4, %v11721_v23  ;;  %v1670_v0 = vrot.slane %v1315_v53, 1  ;;  %v1354_v49 = vsel %vm11719_vm2, %v1332_v2, %v1334_v55  ;;  %v1779_v56 = vsel %vm1775_vm15, %v1765_v48, %v1668_v20  ;;  %vm11724_vm1 = vmmov %vm11722_vm4  ;;  %v11727_v4 = vld [vmem:[#allocation41_spill] sm:$0xff] }
 0x125   :  { %v892_v31 = vsel %vm11724_vm1, %v11721_v23, %v11723_v9  ;;  %v1669_v50 = vrot.slane %v1314_v34, 1  ;;  %v9051_v44 = vpop.permute.xlu0 %1335  ;;  %v6479_v24 = vpack.c.bf16 %v1380_v51, %v1779_v56  ;;  %v1778_v35 = vsel %vm1775_vm15, %v1764_v47, %v1667_v32  ;;  %vm11726_vm3 = vmmov %vm11724_vm1 }
 0x126   :  { %v893_v6 = vsel %vm11726_vm3, %v11723_v9, %v11725_v15  ;;  %v1381_v53 = vmul.f32 %v1354_v49, %v11727_v4  ;;  %vm11728_vm4 = vmmov %vm11719_vm2  ;;  %v6482_v20 = vpack.c.bf16 %v1379_v18, %v1778_v35  ;;  %v1767_v48 = vsel %vm1761_vm14, %v1753_v58, %v1631_v26  ;;  %v1245_v47 = vpop.permute.xlu1 %1244 }
 0x127   :  { %v1355_v2 = vsel %vm11728_vm4, %v1334_v55, %v9051_v44  ;;  %v667_v25 = vmul.f32 %v640_v12, %v8444_v8  ;;  %v11729_v34 = vrot.slane %v8444_v8, 3  ;;  %6481 = vmatprep.subr.msk.bf16.mxu1 %vm8669_vm12, %v6479_v24  ;;  %v668_v32 = vmul.f32 %v641_v17, %v8434_v3  ;;  %v11734_v24 = vld [vmem:[#allocation15_spill] sm:$0xff] }
 0x128   :  { %v1382_v51 = vmul.f32 %v1355_v2, %v11730_v30  ;;  %v669_v23 = vmul.f32 %v642_v11, %v8571_v54  ;;  %v11731_v55 = vrot.slane %v8434_v3, 3  ;;  %v1781_v58 = vsel %vm1775_vm15, %v1767_v48, %v1670_v0  ;;  %6484 = vmatpush1.bf16.msk.msra.mxu1 %vm8669_vm12, %v6482_v20 }
 0x129   :  { %v944_v43 = vmul.f32 %v11729_v34, %v891_v36  ;;  %v670_v26 = vmul.f32 %v643_v14, %v8576_v27  ;;  %v11732_v12 = vrot.slane %v8571_v54, 3  ;;  %v1780_v49 = vsel %vm1775_vm15, %v1766_v19, %v1669_v50  ;;  %v9078_v9 = vpop.permute.xlu0 %1246 }
 0x12a   :  { %v945_v18 = vmul.f32 %v11731_v55, %v892_v31  ;;  %v6485_v56 = vpack.c.bf16 %v1382_v51, %v1781_v58  ;;  %v1448_v17 = vrot.slane %v9000_v41, 6  ;;  %v11733_v11 = vrot.slane %v8576_v27, 2  ;;  %v1249_v41 = vpop.permute.xlu1 %1248 }
 0x12b   :  { %v946_v36 = vmul.f32 %v11732_v12, %v893_v6  ;;  %v894_v0 = vsel %vm11724_vm1, %v11725_v15, %v11734_v24  ;;  %v6488_v35 = vpack.c.bf16 %v1381_v53, %v1780_v49  ;;  %v1449_v14 = vrot.slane %v9010_v21, 6  ;;  %6051 = vmatmul.mubr.msk.f32.vlgmr.msra.gmra.mrb[0].mxu1 %vm11561_vm0, %v8899_v62  ;;  %vm11762_vm1 = vmmov %vm11719_vm2 }
 0x12c   :  { %v855_v31 = vmul.f32 %v11733_v11, %v802_v13  ;;  %v11735_v4 = vrot.slane %v8904_v40, 7  ;;  %v1487_v19 = vrot.slane %v944_v43, 5  ;;  %v1077_v50 = vsel %vm1070_vm5, %v11692_v29, %v8857_v63  ;;  %6487 = vmatprep.subr.msk.bf16.mxu0 %vm8669_vm12, %v6485_v56  ;;  %2109 = vmatprep.mubr.f32.mxu1 %v11700_v37 }
 0x12d   :  { %v1450_v13 = vrot.slane %v9014_v10, 6  ;;  %v11736_v21 = vrot.slane %v8908_v52, 7  ;;  %v1488_v15 = vrot.slane %v945_v18, 5  ;;  %v1078_v53 = vsel %vm1070_vm5, %v8857_v63, %v8871_v57  ;;  %6490 = vmatpush1.bf16.msk.msra.mxu0 %vm8669_vm12, %v6488_v35  ;;  %v9115_v34 = vpop.permute.xlu0 %1250 }
 0x12e   :  { %v1698_v6 = vsel %vm1691_vm7, %v667_v25, %v11735_v4  ;;  %v11737_v29 = vrot.slane %v8916_v33, 7  ;;  %v11738_v10 = vrot.slane %v8920_v1, 7  ;;  %v1489_v20 = vrot.slane %v946_v36, 5  ;;  %v125_v58 = vpop.permute.xlu1 %124 }
 0x12f   :  { %v1699_v40 = vsel %vm1691_vm7, %v668_v32, %v11736_v21  ;;  %v11739_v48 = vrot.slane %v8576_v27, 3  ;;  %v1451_v63 = vrot.slane %v855_v31, 6  ;;  %v1712_v43 = vsel %vm1705_vm9, %v1698_v6, %v1448_v17 }
 0x130   :  { %v1700_v2 = vsel %vm1691_vm7, %v669_v23, %v11737_v29  ;;  %v1701_v52 = vsel %vm1691_vm7, %v670_v26, %v11738_v10  ;;  %v11740_v30 = vrot.slane %v8444_v8, 5  ;;  %v1170_v33 = vsel %vm1163_vm6, %v8619_v60, %v8943_v28  ;;  %6054 = vmatmul.mubr.msk.f32.vlgmr.msra.gmra.mrb[2].mxu0 %vm11561_vm0, %v8899_v62  ;;  %v11750_v10 = vld [vmem:[#allocation2_spill] sm:$0xff] }
 0x131   :  { %v947_v25 = vmul.f32 %v11739_v48, %v894_v0  ;;  %v1713_v1 = vsel %vm1705_vm9, %v1699_v40, %v1449_v14  ;;  %v1726_v32 = vsel %vm1719_vm10, %v1712_v43, %v1487_v19  ;;  %v11741_v23 = vrot.slane %v8434_v3, 5  ;;  %2180 = vmatprep.mubr.f32.mxu0 %v11700_v37  ;;  %v127_v31 = vpop.permute.xlu0 %126  ;;  %v11743_v0 = vld [vmem:[#allocation8_spill] sm:$0xff] }
 0x132   :  { %v1130_v51 = vmul.f32 %v11740_v30, %v1077_v50  ;;  %v1263_v18 = vsel %vm1256_vm8, %v8840_v45, %v1245_v47  ;;  %v1714_v26 = vsel %vm1705_vm9, %v1700_v2, %v1450_v13  ;;  %v1715_v12 = vsel %vm1705_vm9, %v1701_v52, %v1451_v63  ;;  %v11746_v13 = vld [vmem:[#allocation9_spill] sm:$0xff]  ;;  %v129_v29 = vpop.permute.xlu1 %128  ;;  %v11749_v2 = vld [vmem:[#allocation50_spill] sm:$0xff] }
 0x133   :  { %v1131_v55 = vmul.f32 %v11741_v23, %v1078_v53  ;;  %v1727_v60 = vsel %vm1719_vm10, %v1713_v1, %v1488_v15  ;;  %v1171_v36 = vsel %vm1163_vm6, %v8943_v28, %v8966_v42  ;;  %v1728_v49 = vsel %vm1719_vm10, %v1714_v26, %v1489_v20 }
 0x134   :  { %v1490_v56 = vrot.slane %v947_v25, 5  ;;  %v11742_v45 = vrot.slane %v8444_v8, 6  ;;  %v1264_v11 = vsel %vm1256_vm8, %v1245_v47, %v9078_v9  ;;  %v11744_v35 = vrot.slane %v8599_v59, %v11743_v0 }
 0x135   :  { %v1593_v4 = vrot.slane %v1130_v51, 3  ;;  %v1079_v28 = vsel %vm1070_vm5, %v8871_v57, %v8890_v22  ;;  %v11745_v6 = vrot.slane %v8444_v8, 7  ;;  %v1594_v50 = vrot.slane %v1131_v55, 3  ;;  %v9178_v51 = vpop.permute.xlu0 %130 }
 0x136   :  { %v1223_v17 = vmul.f32 %v11742_v45, %v1170_v33  ;;  %v1740_v14 = vsel %vm1733_vm13, %v1726_v32, %v11744_v35  ;;  %v11747_v21 = vrot.slane %v8599_v59, %v11746_v13  ;;  %v1080_v40 = vsel %vm1070_vm5, %v8890_v22, %v8925_v38  ;;  %v11758_v45 = vld [vmem:[#allocation48_spill] sm:$0xff] }
 0x137   :  { %v1316_v19 = vmul.f32 %v11745_v6, %v1263_v18  ;;  %v11748_v15 = vrot.slane %v8434_v3, 6  ;;  %v11751_v57 = vrot.slane %v11749_v2, %v11750_v10  ;;  %v1172_v52 = vsel %vm1163_vm6, %v8966_v42, %v8979_v46 }
 0x138   :  { %v1741_v47 = vsel %vm1733_vm13, %v1727_v60, %v11747_v21  ;;  %v1173_v59 = vsel %vm1163_vm6, %v8979_v46, %v8995_v7  ;;  %v11752_v20 = vrot.slane %v8434_v3, 7  ;;  %v1729_v48 = vsel %vm1719_vm10, %v1715_v12, %v1490_v56  ;;  %v1338_v60 = vpop.permute.xlu1 %1337 }
 0x139   :  { %v1224_v53 = vmul.f32 %v11748_v15, %v1171_v36  ;;  %v1742_v8 = vsel %vm1733_vm13, %v1728_v49, %v11751_v57  ;;  %v11753_v25 = vrot.slane %v8571_v54, 5  ;;  %v1632_v43 = vrot.slane %v1223_v17, 2 }
 0x13a   :  { %v1317_v22 = vmul.f32 %v11752_v20, %v1264_v11  ;;  %v1266_v30 = vsel %vm1256_vm8, %v1249_v41, %v9115_v34  ;;  %v1754_v42 = vsel %vm1747_vm11, %v1740_v14, %v1593_v4  ;;  %v11754_v33 = vrot.slane %v8576_v27, 5 }
 0x13b   :  { %v1132_v63 = vmul.f32 %v11753_v25, %v1079_v28  ;;  %v1671_v46 = vrot.slane %v1316_v19, 1  ;;  %v1265_v3 = vsel %vm1256_vm8, %v9078_v9, %v1249_v41  ;;  %v1755_v32 = vsel %vm1747_vm11, %v1741_v47, %v1594_v50  ;;  %v1340_v28 = vpop.permute.xlu0 %1339 }
 0x13c   :  { %v1133_v1 = vmul.f32 %v11754_v33, %v1080_v40  ;;  %v1633_v23 = vrot.slane %v1224_v53, 2  ;;  %v11755_v55 = vrot.slane %v8571_v54, 6  ;;  %v11756_v26 = vrot.slane %v8576_v27, 6  ;;  %v1342_v15 = vpop.permute.xlu1 %1341 }
 0x13d   :  { %v1672_v36 = vrot.slane %v1317_v22, 1  ;;  %v11757_v49 = vrot.slane %v8576_v27, 7  ;;  %vm11759_vm3 = vcmask 130048   ;;  %v1356_v9 = vsel %vm11719_vm2, %v9051_v44, %v1338_v60 }
 0x13e   :  { %v1225_v18 = vmul.f32 %v11755_v55, %v1172_v52  ;;  %v1226_v12 = vmul.f32 %v11756_v26, %v1173_v59  ;;  %v166_v17 = vsel %vm11759_vm3, %v11758_v45, %v125_v58  ;;  %v1595_v41 = vrot.slane %v1132_v63, 3  ;;  %vm11761_vm4 = vmmov %vm11759_vm3  ;;  %v11764_v59 = vld [vmem:[#allocation3_spill] sm:$0xff] }
 0x13f   :  { %v1319_v56 = vmul.f32 %v11757_v49, %v1266_v30  ;;  %v1768_v11 = vsel %vm1761_vm14, %v1754_v42, %v1632_v43  ;;  %v11760_v35 = vrot.slane %v8571_v54, 7  ;;  %v1383_v4 = vmul.f32 %v1356_v9, %v166_v17  ;;  %vm11763_vm3 = vmmov %vm11762_vm1  ;;  %v9210_v43 = vpop.permute.xlu0 %1343 }
 0x140   :  { %v1596_v6 = vrot.slane %v1133_v1, 3  ;;  %v145_v19 = vsel %vm11761_vm4, %v125_v58, %v127_v31  ;;  %v1782_v27 = vsel %vm1775_vm15, %v1768_v11, %v1671_v46  ;;  %v1357_v50 = vsel %vm11762_vm1, %v1338_v60, %v1340_v28  ;;  %vm11766_vm2 = vmmov %vm11761_vm4 }
 0x141   :  { %v1318_v14 = vmul.f32 %v11760_v35, %v1265_v3  ;;  %v1769_v21 = vsel %vm1761_vm14, %v1755_v32, %v1633_v23  ;;  %v1635_v47 = vrot.slane %v1226_v12, 2  ;;  %v6494_v40 = vpack.c.bf16 %v1383_v4, %v1782_v27  ;;  %vm11767_vm4 = vmmov %vm11766_vm2  ;;  %v11770_v35 = vld [vmem:[#allocation44_spill] sm:$0xff] }
 0x142   :  { %v1384_v44 = vmul.f32 %v1357_v50, %v145_v19  ;;  %v1634_v53 = vrot.slane %v1225_v18, 2  ;;  %v1674_v57 = vrot.slane %v1319_v56, 1  ;;  %v1783_v54 = vsel %vm1775_vm15, %v1769_v21, %v1672_v36 }
 0x143   :  { %v1358_v52 = vsel %vm11763_vm3, %v1340_v28, %v1342_v15  ;;  %v11765_v20 = vrot.slane %v11749_v2, %v11764_v59  ;;  %v1673_v22 = vrot.slane %v1318_v14, 1  ;;  %v146_v25 = vsel %vm11766_vm2, %v127_v31, %v129_v29  ;;  %v695_v31 = vpop.permute.xlu1 %694  ;;  %v9226_v18 = vpop.permute.xlu0 %696 }
 0x144   :  { %v6491_v63 = vpack.c.bf16 %v1384_v44, %v1783_v54  ;;  %v147_v42 = vsel %vm11767_vm4, %v129_v29, %v9178_v51  ;;  %v1385_v33 = vmul.f32 %v1358_v52, %v146_v25  ;;  %v1359_v1 = vsel %vm11762_vm1, %v1342_v15, %v9210_v43 }
 0x145   :  { %v1743_v58 = vsel %vm1733_vm13, %v1729_v48, %v11765_v20  ;;  %v1756_v46 = vsel %vm1747_vm11, %v1742_v8, %v1595_v41  ;;  %v1386_v48 = vmul.f32 %v1359_v1, %v147_v42  ;;  %v7829_v60 = vmov 0.0|0.0   ;;  %v11769_v41 = vld [vmem:[#allocation45_spill] sm:$0xff] }
 0x146   :  { %v1757_v30 = vsel %vm1747_vm11, %v1743_v58, %v1596_v6  ;;  %6493 = vmatprep.subr.msk.bf16.mxu1 %vm8669_vm12, %v6491_v63  ;;  %v1770_v32 = vsel %vm1761_vm14, %v1756_v46, %v1634_v53  ;;  %vm11559_vm3 = vmmov 0   ;;  %vm11768_vm2 = vcmask 228352  }
 0x147   :  { %v1771_v3 = vsel %vm1761_vm14, %v1757_v30, %v1635_v47  ;;  %6496 = vmatpush1.bf16.msk.msra.mxu1 %vm8669_vm12, %v6494_v40  ;;  %v1784_v29 = vsel %vm1775_vm15, %v1770_v32, %v1673_v22  ;;  %v788_v26 = vpop.permute.xlu1 %787  ;;  %v9235_v12 = vpop.permute.xlu0 %789  ;;  %v711_v9 = vsel %vm11768_vm2, %v695_v31, %v9226_v18  ;;  %v738_v11 = vrot.slane %v11769_v41, 1  ;;  %vm11771_vm4 = vmmov %vm11768_vm2 }
 0x148   :  { %v1785_v23 = vsel %vm1775_vm15, %v1771_v3, %v1674_v57  ;;  %v6500_v8 = vpack.c.bf16 %v1385_v33, %v1784_v29  ;;  %v739_v14 = vrot.slane %v11770_v35, 1  ;;  %v830_v4 = vrot.slane %v11769_v41, 2 }
 0x149   :  { %v6497_v55 = vpack.c.bf16 %v1386_v48, %v1785_v23  ;;  %v710_v6 = vsel %vm11771_vm4, %v11684_v16, %v695_v31  ;;  %vm11772_vm1 = vcmask 220160   ;;  %v831_v27 = vrot.slane %v11770_v35, 2 }
 0x14a   :  { %6057 = vmatmul.mubr.msk.f32.vlgmr.msra.gmra.mrb[2].mxu1 %vm11561_vm0, %v8899_v62  ;;  %v804_v19 = vsel %vm11772_vm1, %v788_v26, %v9235_v12  ;;  %v765_v21 = vmul.f32 %v739_v14, %v711_v9  ;;  %v922_v47 = vrot.slane %v11769_v41, 3  ;;  %vm11774_vm2 = vcmask 7168  }
 0x14b   :  { %6499 = vmatprep.subr.msk.bf16.mxu0 %vm8669_vm12, %v6497_v55  ;;  %2251 = vmatprep.mubr.f32.mxu1 %v11700_v37  ;;  %v629_v36 = vpop.permute.xlu1 %628  ;;  %v9242_v49 = vpop.permute.xlu0 %630  ;;  %v923_v44 = vrot.slane %v11770_v35, 3  ;;  %vm11776_vm4 = vmmov %vm11774_vm2  ;;  %v1108_v57 = vrot.slane %v11769_v41, 5  ;;  %v1109_v54 = vrot.slane %v11770_v35, 5  ;;  %v764_v52 = vmul.f32 %v738_v11, %v710_v6 }
 0x14c   :  { %6502 = vmatpush1.bf16.msk.msra.mxu0 %vm8669_vm12, %v6500_v8  ;;  %v857_v58 = vmul.f32 %v831_v27, %v804_v19  ;;  %v1201_v30 = vrot.slane %v11769_v41, 6  ;;  %v1414_v42 = vrot.slane %v765_v21, 7  ;;  %v1295_v32 = vrot.slane %v11770_v35, 7 }
 0x14d   :  { %6509 = vmatprep.subr.bf16.mxu0 %v7829_v60  ;;  %v1413_v23 = vrot.slane %v764_v52, 7 }
 0x14e   :  { %v1453_v29 = vrot.slane %v857_v58, 6 }
 0x14f   :  { %6060 = vmatmul.mubr.msk.f32.vlgmr.msra.gmra.mrb[4].mxu0 %vm11561_vm0, %v8899_v62  ;;  %v880_v56 = vpop.permute.xlu1 %879  ;;  %v9244_v45 = vpop.permute.xlu0 %881 }
 0x150   :  { %6333 = vmatprep.mubr.msk.f32.mxu0 %vm11559_vm3, %v11700_v37  ;;  %vm11773_vm3 = vcmask 236544   ;;  %v896_v40 = vsel %vm11774_vm2, %v880_v56, %v9244_v45  ;;  %v895_v53 = vsel %vm11776_vm4, %v11734_v24, %v880_v56  ;;  %v1294_v24 = vrot.slane %v11769_v41, 7 }
 0x151   :  { %v645_v50 = vsel %vm11773_vm3, %v629_v36, %v9242_v49  ;;  %vm11775_vm0 = vmmov %vm11773_vm3  ;;  %v949_v63 = vmul.f32 %v923_v44, %v896_v40  ;;  %v948_v1 = vmul.f32 %v922_v47, %v895_v53  ;;  %v11778_v47 = vld [vmem:[#allocation4_spill] sm:$0xff]  ;;  %v11779_v53 = vld [vmem:[#allocation5_spill] sm:$0xff]  ;;  %vm11785_vm4 = vcmask 228352  }
 0x152   :  { %v644_v16 = vsel %vm11775_vm0, %v8709_v5, %v629_v36  ;;  %vm11777_vm3 = vmmov %vm11772_vm1  ;;  %v672_v22 = vmul.f32 %v645_v50, %v11770_v35  ;;  %v1202_v5 = vrot.slane %v11770_v35, 6  ;;  %v1552_v40 = vrot.slane %v11749_v2, %v11778_v47 }
 0x153   :  { %v1067_v17 = vpop.permute.xlu1 %1066  ;;  %v9251_v28 = vpop.permute.xlu0 %1068  ;;  %v803_v20 = vsel %vm11777_vm3, %v11715_v39, %v788_v26  ;;  %v671_v33 = vmul.f32 %v644_v16, %v11769_v41  ;;  %v1492_v36 = vrot.slane %v949_v63, 5  ;;  %v1491_v41 = vrot.slane %v948_v1, 5 }
 0x154   :  { %v1082_v46 = vsel %vm1070_vm5, %v1067_v17, %v9251_v28  ;;  %v856_v3 = vmul.f32 %v830_v4, %v803_v20  ;;  %v1081_v48 = vsel %vm1070_vm5, %v8925_v38, %v1067_v17  ;;  %v1703_v55 = vsel %vm1691_vm7, %v672_v22, %v1414_v42 }
 0x155   :  { %v1135_v56 = vmul.f32 %v1109_v54, %v1082_v46  ;;  %v1702_v17 = vsel %vm1691_vm7, %v671_v33, %v1413_v23  ;;  %v1134_v11 = vmul.f32 %v1108_v57, %v1081_v48  ;;  %v1556_v57 = vrot.slane %v11749_v2, %v11779_v53 }
 0x156   :  { %v1452_v4 = vrot.slane %v856_v3, 6  ;;  %vm11781_vm0 = vcmask 809984   ;;  %vm1096_vm3 = vcmask 252928  }
 0x157   :  { %v1160_v15 = vpop.permute.xlu1 %1159  ;;  %v9273_v25 = vpop.permute.xlu0 %1161  ;;  %v1598_v44 = vrot.slane %v1135_v56, 3  ;;  %v1597_v16 = vrot.slane %v1134_v11, 3  ;;  %vm11783_vm2 = vmmov %vm11781_vm0 }
 0x158   :  { %v1175_v31 = vsel %vm1163_vm6, %v1160_v15, %v9273_v25  ;;  %v1174_v8 = vsel %vm1163_vm6, %v8995_v7, %v1160_v15  ;;  %v1717_v7 = vsel %vm1705_vm9, %v1703_v55, %v1453_v29  ;;  %v1716_v21 = vsel %vm1705_vm9, %v1702_v17, %v1452_v4 }
 0x159   :  { %v1228_v35 = vmul.f32 %v1202_v5, %v1175_v31  ;;  %v1227_v6 = vmul.f32 %v1201_v30, %v1174_v8  ;;  %v1730_v15 = vsel %vm1719_vm10, %v1716_v21, %v1491_v41  ;;  %vm11780_vm6 = vcmask 130048  }
 0x15a   :  { %vm11782_vm1 = vmmov %vm11780_vm6  ;;  %v1744_v33 = vsel %vm1733_vm13, %v1730_v15, %v1552_v40 }
 0x15b   :  { %v1253_v39 = vpop.permute.xlu1 %1252  ;;  %v9289_v26 = vpop.permute.xlu0 %1254  ;;  %v1637_v54 = vrot.slane %v1228_v35, 2  ;;  %v1636_v20 = vrot.slane %v1227_v6, 2  ;;  %v1758_v3 = vsel %vm1747_vm11, %v1744_v33, %v1597_v16 }
 0x15c   :  { %v1267_v9 = vsel %vm1256_vm8, %v9115_v34, %v1253_v39  ;;  %v1268_v38 = vsel %vm1256_vm8, %v1253_v39, %v9289_v26  ;;  %v1731_v34 = vsel %vm1719_vm10, %v1717_v7, %v1492_v36 }
 0x15d   :  { %v1321_v19 = vmul.f32 %v1295_v32, %v1268_v38  ;;  %v1320_v27 = vmul.f32 %v1294_v24, %v1267_v9  ;;  %v1745_v30 = vsel %vm1733_vm13, %v1731_v34, %v1556_v57  ;;  %v1772_v29 = vsel %vm1761_vm14, %v1758_v3, %v1636_v20 }
 0x15e   :  { %v1759_v1 = vsel %vm1747_vm11, %v1745_v30, %v1598_v44 }
 0x15f   :  { %v133_v14 = vpop.permute.xlu1 %132  ;;  %v9297_v50 = vpop.permute.xlu0 %134  ;;  %v1676_v58 = vrot.slane %v1321_v19, 1  ;;  %v1675_v5 = vrot.slane %v1320_v27, 1  ;;  %v1773_v48 = vsel %vm1761_vm14, %v1759_v1, %v1637_v54 }
 0x160   :  { %v149_v22 = vsel %vm11780_vm6, %v133_v14, %v9297_v50  ;;  %v148_v24 = vsel %vm11782_vm1, %v9178_v51, %v133_v14  ;;  %vm1189_vm6 = vcmask 39936   ;;  %vm1282_vm1 = vcmask 31744  }
 0x161   :  { %v1787_v51 = vsel %vm1775_vm15, %v1773_v48, %v1676_v58  ;;  %v1786_v36 = vsel %vm1775_vm15, %v1772_v29, %v1675_v5  ;;  %v11791_v58 = vld [vmem:[#allocation6_spill] sm:$0xff] }
 0x163   :  { %v1346_v52 = vpop.permute.xlu1 %1345  ;;  %v1348_v42 = vpop.permute.xlu0 %1347 }
 0x164   :  { %v1360_v63 = vsel %vm11781_vm0, %v9210_v43, %v1346_v52  ;;  %v1361_v39 = vsel %vm11783_vm2, %v1346_v52, %v1348_v42  ;;  %v11784_v43 = vld [vmem:[#allocation47_spill] sm:$0xff]  ;;  %vm11786_vm0 = vcmask 220160   ;;  %vm11787_vm2 = vcmask 236544  }
 0x165   :  { %v1387_v46 = vmul.f32 %v1360_v63, %v148_v24  ;;  %v1388_v31 = vmul.f32 %v1361_v39, %v149_v22  ;;  %v740_v32 = vrot.slane %v11784_v43, 1  ;;  %v832_v8 = vrot.slane %v11784_v43, 2 }
 0x166   :  { %v1110_v14 = vrot.slane %v11784_v43, 5  ;;  %v1203_v4 = vrot.slane %v11784_v43, 6  ;;  %v924_v21 = vrot.slane %v11784_v43, 3  ;;  %v1296_v44 = vrot.slane %v11784_v43, 7 }
 0x167   :  { %v699_v23 = vpop.permute.xlu1 %698  ;;  %v6503_v56 = vpack.c.bf16 %v1388_v31, %v1787_v51  ;;  %v792_v38 = vpop.permute.xlu0 %791  ;;  %v6506_v17 = vpack.c.bf16 %v1387_v46, %v1786_v36  ;;  %v1560_v22 = vrot.slane %v11749_v2, %v11791_v58 }
 0x168   :  { %v712_v55 = vsel %vm11785_vm4, %v9226_v18, %v699_v23  ;;  %v805_v41 = vsel %vm11786_vm0, %v9235_v12, %v792_v38  ;;  %v1097_v18 = vsel %vm1096_vm3, %v9251_v28, 0.0  ;;  %v1190_v12 = vsel %vm1189_vm6, %v9273_v25, 0.0 }
 0x169   :  { %v766_v9 = vmul.f32 %v740_v32, %v712_v55  ;;  %v858_v11 = vmul.f32 %v832_v8, %v805_v41  ;;  %6505 = vmatprep.subr.msk.bf16.mxu1 %vm8669_vm12, %v6503_v56  ;;  %v1283_v28 = vsel %vm1282_vm1, %v9289_v26, 0.0  ;;  %vm1375_vm4 = vcmask 23552   ;;  %v7652_v41 = vld [vmem:[%s11793_s23 + $0x4] ss:$8 sps:$4 sm:$0xff]  }
 0x16a   :  { %6508 = vmatpush1.bf16.msk.msra.mxu1 %vm8669_vm12, %v6506_v17  ;;  %vm11788_vm0 = vcmask 7168   ;;  %vm11789_vm6 = vcmask 72704   ;;  %v1229_v57 = vmul.f32 %v1203_v4, %v1190_v12  ;;  %v1322_v54 = vmul.f32 %v1296_v44, %v1283_v28  ;;  %v7660_v4 = vld [vmem:[%s11793_s23 + $0x20] ss:$8 sps:$4 sm:$0xff]   ;;  %v7663_v12 = vld [vmem:[%s11793_s23 + $0x30] ss:$8 sps:$4 sm:$0xff]  }
 0x16b   :  { %v633_v35 = vpop.permute.xlu1 %632  ;;  %v1415_v19 = vrot.slane %v766_v9, 7  ;;  %v884_v27 = vpop.permute.xlu0 %883  ;;  %v1454_v34 = vrot.slane %v858_v11, 6  ;;  %v1376_v52 = vsel %vm1375_vm4, %v1348_v42, 0.0  ;;  %v7654_v11 = vld [vmem:[%s11793_s23] ss:$8 sps:$4 sm:$0xff]   ;;  %6514 = vmatprep.subr.bf16.mxu1 %v7652_v41 }
 0x16c   :  { %v646_v6 = vsel %vm11787_vm2, %v9242_v49, %v633_v35  ;;  %v897_v40 = vsel %vm11788_vm0, %v9244_v45, %v884_v27  ;;  %v1136_v49 = vmul.f32 %v1110_v14, %v1097_v18  ;;  %vm11790_vm2 = vcmask 130048   ;;  %vm11792_vm0 = vmmov %vm11789_vm6  ;;  %v7655_v35 = vld [vmem:[%s11793_s23 + $0x14] ss:$8 sps:$4 sm:$0xff]   ;;  %v7657_v18 = vld [vmem:[%s11793_s23 + $0x10] ss:$8 sps:$4 sm:$0xff]  }
 0x16d   :  { %v673_v7 = vmul.f32 %v646_v6, %v11784_v43  ;;  %v950_v25 = vmul.f32 %v924_v21, %v897_v40  ;;  %6063 = vmatmul.mubr.msk.f32.vlgmr.msra.gmra.mrb[4].mxu1 %vm11789_vm6, %v8899_v62  ;;  %v1638_v5 = vrot.slane %v1229_v57, 2  ;;  %v1677_v1 = vrot.slane %v1322_v54, 1  ;;  %v7658_v14 = vld [vmem:[%s11793_s23 + $0x24] ss:$8 sps:$4 sm:$0xff]   ;;  %v7661_v6 = vld [vmem:[%s11793_s23 + $0x34] ss:$8 sps:$4 sm:$0xff]  }
 0x16e   :  { %v1599_v63 = vrot.slane %v1136_v49, 3  ;;  %6516 = vmatpush1.bf16.msra.mxu1 %v7654_v11  ;;  %v7667_v27 = vld [vmem:[%s11793_s23 + $0x54] ss:$8 sps:$4 sm:$0xff]   ;;  %v7669_v21 = vld [vmem:[%s11793_s23 + $0x50] ss:$8 sps:$4 sm:$0xff]  }
 0x16f   :  { %v1704_v15 = vsel %vm1691_vm7, %v673_v7, %v1415_v19  ;;  %v137_v16 = vpop.permute.xlu1 %136  ;;  %v1493_v26 = vrot.slane %v950_v25, 5  ;;  %6518 = vmatprep.subr.bf16.mxu1 %v7655_v35  ;;  %v7664_v19 = vld [vmem:[%s11793_s23 + $0x44] ss:$8 sps:$4 sm:$0xff]   ;;  %v7666_v7 = vld [vmem:[%s11793_s23 + $0x40] ss:$8 sps:$4 sm:$0xff]  }
 0x170   :  { %v150_v20 = vsel %vm11790_vm2, %v9297_v50, %v137_v16  ;;  %v1718_v45 = vsel %vm1705_vm9, %v1704_v15, %v1454_v34  ;;  %v7670_v28 = vld [vmem:[%s11793_s23 + $0x64] ss:$8 sps:$4 sm:$0xff]   ;;  %v7672_v34 = vld [vmem:[%s11793_s23 + $0x60] ss:$8 sps:$4 sm:$0xff]   ;;  %v7673_v40 = vld [vmem:[%s11793_s23 + $0x74] ss:$8 sps:$4 sm:$0xff]  }
 0x171   :  { %v1732_v30 = vsel %vm1719_vm10, %v1718_v45, %v1493_v26  ;;  %v1389_v33 = vmul.f32 %v1376_v52, %v150_v20  ;;  %v7675_v49 = vld [vmem:[%s11793_s23 + $0x70] ss:$8 sps:$4 sm:$0xff]   ;;  %v7676_v44 = vld [vmem:[%s11793_s23 + $0x84] ss:$8 sps:$4 sm:$0xff]   ;;  %v7678_v15 = vld [vmem:[%s11793_s23 + $0x80] ss:$8 sps:$4 sm:$0xff]  }
 0x172   :  { %v1746_v24 = vsel %vm1733_vm13, %v1732_v30, %v1560_v22  ;;  %6520 = vmatpush1.bf16.msra.mxu1 %v7657_v18  ;;  %v7679_v25 = vld [vmem:[%s11793_s23 + $0x94] ss:$8 sps:$4 sm:$0xff]   ;;  %v7681_v16 = vld [vmem:[%s11793_s23 + $0x90] ss:$8 sps:$4 sm:$0xff]   ;;  %v7682_v57 = vld [vmem:[%s11793_s23 + $0xa4] ss:$8 sps:$4 sm:$0xff]  }
 0x173   :  { %v1760_v46 = vsel %vm1747_vm11, %v1746_v24, %v1599_v63  ;;  %6522 = vmatprep.subr.bf16.mxu1 %v7658_v14  ;;  %v7684_v54 = vld [vmem:[%s11793_s23 + $0xa0] ss:$8 sps:$4 sm:$0xff]   ;;  %v7685_v52 = vld [vmem:[%s11793_s23 + $0xb4] ss:$8 sps:$4 sm:$0xff]   ;;  %v7687_v26 = vld [vmem:[%s11793_s23 + $0xb0] ss:$8 sps:$4 sm:$0xff]  }
 0x174   :  { %v1774_v42 = vsel %vm1761_vm14, %v1760_v46, %v1638_v5  ;;  %v7688_v20 = vld [vmem:[%s11793_s23 + $0xc4] ss:$8 sps:$4 sm:$0xff]   ;;  %v7690_v45 = vld [vmem:[%s11793_s23 + $0xc0] ss:$8 sps:$4 sm:$0xff]   ;;  %v7691_v22 = vld [vmem:[%s11793_s23 + $0xd4] ss:$8 sps:$4 sm:$0xff]  }
 0x175   :  { %v1788_v39 = vsel %vm1775_vm15, %v1774_v42, %v1677_v1  ;;  %v7693_v30 = vld [vmem:[%s11793_s23 + $0xd0] ss:$8 sps:$4 sm:$0xff]   ;;  %v7694_v5 = vld [vmem:[%s11793_s23 + $0xe4] ss:$8 sps:$4 sm:$0xff]  }
 0x176   :  { %v6510_v50 = vpack.c.bf16 %v1389_v33, %v1788_v39  ;;  %6524 = vmatpush1.bf16.msra.mxu1 %v7660_v4  ;;  %v7696_v33 = vld [vmem:[%s11793_s23 + $0xe0] ss:$8 sps:$4 sm:$0xff]  }
 0x177   :  { %6526 = vmatprep.subr.bf16.mxu1 %v7661_v6 }
 0x178   :  { %6512 = vmatpush3.bf16.msk.msra.mxu0 %vm8669_vm12, %v6510_v50  ;;  %vm11794_vm12 = vcmask 809984  }
 0x179   :  { %6710 = vmatprep.subr.bf16.mxu0 %v7652_v41  ;;  %vm11795_vm6 = vmmov %vm11794_vm12 }
 0x17a   :  { %6528 = vmatpush1.bf16.msra.mxu1 %v7663_v12  ;;  %vm11796_vm2 = vmmov %vm11795_vm6 }
 0x17b   :  { %6334 = vmatmul.mubr.msk.f32.vlgmr.msra.gmra.mrb[6].mxu0 %vm11792_vm0, %v8899_v62  ;;  %6530 = vmatprep.subr.bf16.mxu1 %v7664_v19  ;;  %vm11797_vm0 = vmmov %vm11796_vm2 }
 0x17c   :  { %6712 = vmatpush1.bf16.msra.mxu0 %v7654_v11 }
 0x17d   :  { %6714 = vmatprep.subr.bf16.mxu0 %v7655_v35 }
 0x17e   :  { %6532 = vmatpush1.bf16.msra.mxu1 %v7666_v7 }
 0x17f   :  { %6534 = vmatprep.subr.bf16.mxu1 %v7667_v27 }
 0x180   :  { %6716 = vmatpush1.bf16.msra.mxu0 %v7657_v18 }
 0x181   :  { %6718 = vmatprep.subr.bf16.mxu0 %v7658_v14 }
 0x182   :  { %6536 = vmatpush1.bf16.msra.mxu1 %v7669_v21 }
 0x183   :  { %6538 = vmatprep.subr.bf16.mxu1 %v7670_v28 }
 0x184   :  { %6720 = vmatpush1.bf16.msra.mxu0 %v7660_v4 }
 0x185   :  { %6722 = vmatprep.subr.bf16.mxu0 %v7661_v6 }
 0x186   :  { %6540 = vmatpush1.bf16.msra.mxu1 %v7672_v34 }
 0x187   :  { %6542 = vmatprep.subr.bf16.mxu1 %v7673_v40 }
 0x188   :  { %6724 = vmatpush1.bf16.msra.mxu0 %v7663_v12  ;;  %v7700_v12 = vld [vmem:[%s11793_s23 + $0x104] ss:$8 sps:$4 sm:$0xff]  }
 0x189   :  { %6726 = vmatprep.subr.bf16.mxu0 %v7664_v19 }
 0x18a   :  { %6544 = vmatpush1.bf16.msra.mxu1 %v7675_v49 }
 0x18b   :  { %6546 = vmatprep.subr.bf16.mxu1 %v7676_v44 }
 0x18c   :  { %6728 = vmatpush1.bf16.msra.mxu0 %v7666_v7 }
 0x18d   :  { %6730 = vmatprep.subr.bf16.mxu0 %v7667_v27 }
 0x18e   :  { %6548 = vmatpush1.bf16.msra.mxu1 %v7678_v15 }
 0x18f   :  { %6550 = vmatprep.subr.bf16.mxu1 %v7679_v25 }
 0x190   :  { %6732 = vmatpush1.bf16.msra.mxu0 %v7669_v21 }
 0x191   :  { %6734 = vmatprep.subr.bf16.mxu0 %v7670_v28 }
 0x192   :  { %6552 = vmatpush1.bf16.msra.mxu1 %v7681_v16 }
 0x193   :  { %6554 = vmatprep.subr.bf16.mxu1 %v7682_v57 }
 0x194   :  { %6736 = vmatpush1.bf16.msra.mxu0 %v7672_v34 }
 0x195   :  { %6738 = vmatprep.subr.bf16.mxu0 %v7673_v40 }
 0x196   :  { %6556 = vmatpush1.bf16.msra.mxu1 %v7684_v54 }
 0x197   :  { %6558 = vmatprep.subr.bf16.mxu1 %v7685_v52 }
 0x198   :  { %6740 = vmatpush1.bf16.msra.mxu0 %v7675_v49 }
 0x199   :  { %6742 = vmatprep.subr.bf16.mxu0 %v7676_v44 }
 0x19a   :  { %6560 = vmatpush1.bf16.msra.mxu1 %v7687_v26 }
 0x19b   :  { %6562 = vmatprep.subr.bf16.mxu1 %v7688_v20 }
 0x19c   :  { %6744 = vmatpush1.bf16.msra.mxu0 %v7678_v15 }
 0x19d   :  { %6746 = vmatprep.subr.bf16.mxu0 %v7679_v25 }
 0x19e   :  { %6564 = vmatpush1.bf16.msra.mxu1 %v7690_v45 }
 0x19f   :  { %6566 = vmatprep.subr.bf16.mxu1 %v7691_v22 }
 0x1a0   :  { %6748 = vmatpush1.bf16.msra.mxu0 %v7681_v16 }
 0x1a1   :  { %6750 = vmatprep.subr.bf16.mxu0 %v7682_v57 }
 0x1a2   :  { %6568 = vmatpush1.bf16.msra.mxu1 %v7693_v30 }
 0x1a3   :  { %6570 = vmatprep.subr.bf16.mxu1 %v7694_v5 }
 0x1a4   :  { %6752 = vmatpush1.bf16.msra.mxu0 %v7684_v54 }
 0x1a5   :  { %6754 = vmatprep.subr.bf16.mxu0 %v7685_v52 }
 0x1a6   :  { %6572 = vmatpush1.bf16.msra.mxu1 %v7696_v33 }
 0x1a8   :  { %6756 = vmatpush1.bf16.msra.mxu0 %v7687_v26 }
 0x1a9   :  { %6758 = vmatprep.subr.bf16.mxu0 %v7688_v20 }
 0x1ac   :  { %6760 = vmatpush1.bf16.msra.mxu0 %v7690_v45 }
 0x1ad   :  { %6762 = vmatprep.subr.bf16.mxu0 %v7691_v22 }
 0x1b0   :  { %6764 = vmatpush1.bf16.msra.mxu0 %v7693_v30 }
 0x1b1   :  { %6766 = vmatprep.subr.bf16.mxu0 %v7694_v5 }
 0x1b4   :  { %6768 = vmatpush1.bf16.msra.mxu0 %v7696_v33 }
 0x1e9   :  { %v9363_v2 = vpop.f32.mrb[0].mxu0 }
 0x1ea   :  { %v9365_v3 = vpop.f32.mrb[1].mxu0 }
 0x1fe   :  { %v9367_v48 = vpop.f32.mrb[0].mxu1 }
 0x1ff   :  { %v9371_v31 = vpack.i.bf16 %v9367_v48, %v9365_v3  ;;  %v9373_v43 = vpop.f32.mrb[1].mxu1 }
 0x203   :  { %v9375_v32 = vpop.f32.mrb[2].mxu0 }
 0x204   :  { %v9379_v61 = vpack.i.bf16 %v9375_v32, %v9373_v43  ;;  %v9381_v23 = vpop.f32.mrb[3].mxu0 }
 0x21d   :  { %v9383_v62 = vpop.f32.mrb[2].mxu1 }
 0x21e   :  { %2353 = vrot.lane.b32.xlu0 %v9383_v62, %s11562_s21  ;;  %v9387_v29 = vpop.f32.mrb[3].mxu1 }
 0x222   :  { %v9389_v51 = vpop.f32.mrb[4].mxu0  ;;  %2355 = vrot.lane.b32.xlu0 %v9387_v29, %s11562_s21 }
 0x223   :  { %v9393_v55 = vpop.f32.mrb[5].mxu0 }
 0x224   :  { %v7527_v8 = vpack.i.bf16 %v9393_v55, %v9389_v51 }
 0x226   :  { %7518 = vrot.lane.b32.xlu1 %v7527_v8, %s11562_s21  ;;  %2420 = vrot.lane.b32.xlu0 %v9387_v29, %s7824_s0 }
 0x22a   :  { %7523 = vrot.lane.b32.xlu1 %v7527_v8, %s7824_s0  ;;  %2472 = vrot.lane.b32.xlu0 %v9387_v29, %s7825_s8 }
 0x22e   :  { %7528 = vrot.lane.b32.xlu1 %v7527_v8, %s7825_s8  ;;  %2470 = vrot.lane.b32.xlu0 %v9383_v62, %s7825_s8  ;;  %v7697_v8 = vld [vmem:[%s11793_s23 + $0xf4] ss:$8 sps:$4 sm:$0xff]  }
 0x22f   :  { %6770 = vmatprep.subr.bf16.mxu0 %v7697_v8  ;;  %6574 = vmatprep.subr.bf16.mxu1 %v7697_v8 }
 0x232   :  { %2418 = vrot.lane.b32.xlu1 %v9383_v62, %s7824_s0 }
 0x240   :  { %v9408_v36 = vpop.f32.mrb[4].mxu1 }
 0x241   :  { %v9410_v56 = vpop.f32.mrb[5].mxu1 }
 0x242   :  { %v7542_v9 = vpack.i.bf16 %v9410_v56, %v9408_v36 }
 0x244   :  { %7538 = vrot.lane.b32.xlu1 %v7542_v9, %s7824_s0  ;;  %7533 = vrot.lane.b32.xlu0 %v7542_v9, %s11562_s21 }
 0x248   :  { %7543 = vrot.lane.b32.xlu0 %v7542_v9, %s7825_s8  ;;  %v7699_v9 = vld [vmem:[%s11793_s23 + $0xf0] ss:$8 sps:$4 sm:$0xff]  }
 0x249   :  { %6772 = vmatpush1.bf16.msra.mxu0 %v7699_v9  ;;  %6576 = vmatpush1.bf16.msra.mxu1 %v7699_v9 }
 0x24a   :  { %6774 = vmatprep.subr.bf16.mxu0 %v7700_v12  ;;  %6578 = vmatprep.subr.bf16.mxu1 %v7700_v12 }
 0x24c   :  { %7553 = vrot.lane.b32.xlu0 %v9371_v31, %s11562_s21 }
 0x24e   :  { %v9419_v38 = vpop.f32.mrb[6].mxu0 }
 0x24f   :  { %v6335_v17 = vpop.f32.mrb[7].mxu0 }
 0x250   :  { %7563 = vrot.lane.b32.xlu0 %v9371_v31, %s7825_s8 }
 0x254   :  { %2406 = vrot.lane.b32.xlu0 %v9363_v2, %s7824_s0 }
 0x258   :  { %2365 = vrot.lane.b32.xlu0 %v9419_v38, %s11562_s21 }
 0x25c   :  { %2482 = vrot.lane.b32.xlu0 %v9419_v38, %s7825_s8 }
 0x260   :  { %7573 = vrot.lane.b32.xlu0 %v9379_v61, %s11562_s21 }
 0x264   :  { %7583 = vrot.lane.b32.xlu0 %v9379_v61, %s7825_s8 }
 0x290   :  { %v9514_v63 = vpop.permute.xlu0 %2353 }
 0x294   :  { %v2356_v24 = vpop.permute.xlu0 %2355 }
 0x295   :  { %v2373_v54 = vsel %vm1070_vm5, %v9514_v63, %v2356_v24 }
 0x298   :  { %v7519_v1 = vpop.permute.xlu1 %7518  ;;  %v2421_v46 = vpop.permute.xlu0 %2420 }
 0x299   :  { %v7521_v39 = vunpack.i.h.bf16 %v7519_v1  ;;  %v7520_v50 = vunpack.i.l.bf16 %v7519_v1 }
 0x29b   :  { %v2374_v18 = vsel %vm1070_vm5, %v2356_v24, %v7520_v50  ;;  %v2375_v14 = vsel %vm1070_vm5, %v7520_v50, %v7521_v39 }
 0x29c   :  { %v7524_v42 = vpop.permute.xlu1 %7523  ;;  %v2473_v41 = vpop.permute.xlu0 %2472  ;;  %v2400_v28 = vmax.f32 %v9387_v29, %v2374_v18  ;;  %v2401_v34 = vmax.f32 %v9389_v51, %v2375_v14  ;;  %v2399_v51 = vmax.f32 %v9383_v62, %v2373_v54  ;;  %v7702_v54 = vld [vmem:[%s11793_s23 + $0x100] ss:$8 sps:$4 sm:$0xff]  }
 0x29d   :  { %v7525_v17 = vunpack.i.l.bf16 %v7524_v42  ;;  %v7526_v11 = vunpack.i.h.bf16 %v7524_v42 }
 0x29f   :  { %v2439_v19 = vsel %vm1256_vm8, %v2421_v46, %v7525_v17  ;;  %v2440_v7 = vsel %vm1256_vm8, %v7525_v17, %v7526_v11 }
 0x2a0   :  { %v7529_v35 = vpop.permute.xlu1 %7528  ;;  %v9542_v44 = vpop.permute.xlu0 %2470 }
 0x2a1   :  { %v7531_v4 = vunpack.i.h.bf16 %v7529_v35  ;;  %v7530_v6 = vunpack.i.l.bf16 %v7529_v35  ;;  %v2490_v52 = vsel %vm11796_vm2, %v9542_v44, %v2473_v41  ;;  %vm11799_vm2 = vmmov %vm11797_vm0 }
 0x2a3   :  { %v2491_v27 = vsel %vm11794_vm12, %v2473_v41, %v7530_v6  ;;  %v2492_v21 = vsel %vm11795_vm6, %v7530_v6, %v7531_v4  ;;  %vm11798_vm12 = vmmov %vm11797_vm0  ;;  %vm2843_vm6 = vcmask 916480  }
 0x2a4   :  { %v2517_v40 = vmax.f32 %v2439_v19, %v2491_v27  ;;  %v2518_v49 = vmax.f32 %v2440_v7, %v2492_v21  ;;  %v9544_v15 = vpop.permute.xlu1 %2418 }
 0x2a5   :  { %v2438_v25 = vsel %vm1256_vm8, %v9544_v15, %v2421_v46 }
 0x2a6   :  { %v2530_v16 = vmax.f32 %v2400_v28, %v2517_v40  ;;  %v2531_v57 = vmax.f32 %v2401_v34, %v2518_v49  ;;  %v2516_v29 = vmax.f32 %v2438_v25, %v2490_v52 }
 0x2a8   :  { %v7547_v26 = vpack.i.bf16 %v2531_v57, %v2530_v16  ;;  %v9554_v20 = vmax.f32 %v2399_v51, %v2516_v29  ;;  %v7703_v29 = vld [vmem:[%s11793_s23 + $0x114] ss:$8 sps:$4 sm:$0xff]  }
 0x2aa   :  { %7548 = vrot.lane.b32.xlu1 %v7547_v26, %s7831_s28 }
 0x2ae   :  { %2829 = vrot.lane.b32.xlu1 %v9554_v20, %s7831_s28 }
 0x2b2   :  { %7558 = vrot.lane.b32.xlu1 %v9371_v31, %s7824_s0 }
 0x2b6   :  { %2341 = vrot.lane.b32.xlu1 %v9363_v2, %s11562_s21  ;;  %v7534_v45 = vpop.permute.xlu0 %7533  ;;  %v9564_v22 = vpop.permute.xlu1 %7538 }
 0x2b7   :  { %v7536_v62 = vunpack.i.h.bf16 %v7534_v45  ;;  %v7535_v30 = vunpack.i.l.bf16 %v7534_v45  ;;  %v7541_v5 = vunpack.i.h.bf16 %v9564_v22  ;;  %v7540_v24 = vunpack.i.l.bf16 %v9564_v22 }
 0x2b9   :  { %v2376_v31 = vsel %vm1070_vm5, %v7521_v39, %v7535_v30  ;;  %v2377_v1 = vsel %vm1070_vm5, %v7535_v30, %v7536_v62  ;;  %v2442_v46 = vsel %vm1256_vm8, %v7540_v24, %v7541_v5  ;;  %v2441_v8 = vsel %vm1256_vm8, %v7526_v11, %v7540_v24  ;;  %v7705_v30 = vld [vmem:[%s11793_s23 + $0x110] ss:$8 sps:$4 sm:$0xff]  }
 0x2ba   :  { %2458 = vrot.lane.b32.xlu1 %v9363_v2, %s7825_s8  ;;  %v9571_v33 = vpop.permute.xlu0 %7543  ;;  %v2402_v17 = vmax.f32 %v9393_v55, %v2376_v31  ;;  %v2403_v41 = vmax.f32 %v9408_v36, %v2377_v1  ;;  %v7706_v31 = vld [vmem:[%s11793_s23 + $0x124] ss:$8 sps:$4 sm:$0xff]  }
 0x2bb   :  { %v7546_v42 = vunpack.i.h.bf16 %v9571_v33  ;;  %v7545_v50 = vunpack.i.l.bf16 %v9571_v33  ;;  %v9680_v33 = vld [vmem:[%s11793_s23 + $0x150] ss:$8 sps:$4 sm:$0xff]  }
 0x2bd   :  { %v2493_v9 = vsel %vm11797_vm0, %v7531_v4, %v7545_v50  ;;  %v2494_v39 = vsel %vm11798_vm12, %v7545_v50, %v7546_v42  ;;  %vm11800_vm12 = vmmov %vm11797_vm0 }
 0x2be   :  { %2430 = vrot.lane.b32.xlu1 %v9419_v38, %s7824_s0  ;;  %v2519_v35 = vmax.f32 %v2441_v8, %v2493_v9  ;;  %v2520_v18 = vmax.f32 %v2442_v46, %v2494_v39  ;;  %v7554_v14 = vpop.permute.xlu0 %7553  ;;  %v7708_v8 = vld [vmem:[%s11793_s23 + $0x120] ss:$8 sps:$4 sm:$0xff]  }
 0x2bf   :  { %v7556_v28 = vunpack.i.h.bf16 %v7554_v14  ;;  %v7555_v26 = vunpack.i.l.bf16 %v7554_v14 }
 0x2c0   :  { %v2532_v6 = vmax.f32 %v2402_v17, %v2519_v35  ;;  %v2533_v12 = vmax.f32 %v2403_v41, %v2520_v18  ;;  %v7709_v18 = vld [vmem:[%s11793_s23 + $0x134] ss:$8 sps:$4 sm:$0xff]  }
 0x2c1   :  { %v2368_v50 = vsel %vm1070_vm5, %v7555_v26, %v7556_v28 }
 0x2c2   :  { %v9586_v19 = vpop.permute.xlu0 %7563  ;;  %v7567_v7 = vpack.i.bf16 %v2533_v12, %v2532_v6  ;;  %v2394_v41 = vmax.f32 %v9365_v3, %v2368_v50  ;;  %v7711_v12 = vld [vmem:[%s11793_s23 + $0x130] ss:$8 sps:$4 sm:$0xff]   ;;  %v7712_v3 = vld [vmem:[%s11793_s23 + $0x144] ss:$8 sps:$4 sm:$0xff]  }
 0x2c3   :  { %v7566_v45 = vunpack.i.h.bf16 %v9586_v19 }
 0x2c4   :  { %7568 = vrot.lane.b32.xlu1 %v7567_v7, %s7831_s28 }
 0x2c6   :  { %v2407_v11 = vpop.permute.xlu0 %2406 }
 0x2c8   :  { %7578 = vrot.lane.b32.xlu1 %v9379_v61, %s7824_s0 }
 0x2ca   :  { %v2366_v4 = vpop.permute.xlu0 %2365 }
 0x2cb   :  { %v9592_v27 = vsel %vm1070_vm5, %v7536_v62, %v2366_v4  ;;  %v7565_v62 = vunpack.i.l.bf16 %v9586_v19 }
 0x2cc   :  { %v2404_v55 = vmax.f32 %v9410_v56, %v9592_v27  ;;  %v7720_v56 = vld [vmem:[%s11793_s23 + $0x160] ss:$8 sps:$4 sm:$0xff]  }
 0x2cd   :  { %v2485_v39 = vsel %vm11799_vm2, %v7565_v62, %v7566_v45  ;;  %vm11805_vm2 = vmmov %vm11797_vm0 }
 0x2ce   :  { %v2483_v36 = vpop.permute.xlu0 %2482 }
 0x2d2   :  { %v9596_v21 = vpop.permute.xlu0 %7573 }
 0x2d3   :  { %v7575_v34 = vunpack.i.l.bf16 %v9596_v21 }
 0x2d5   :  { %v9602_v40 = vsel %vm1070_vm5, %v7556_v28, %v7575_v34 }
 0x2d6   :  { %v2395_v61 = vmax.f32 %v9367_v48, %v9602_v40  ;;  %v9702_v27 = vpop.permute.xlu0 %7583  ;;  %v7735_v48 = vld [vmem:[%s11793_s23 + $0x1b0] ss:$8 sps:$4 sm:$0xff]   ;;  %v7736_v40 = vld [vmem:[%s11793_s23 + $0x1c4] ss:$8 sps:$4 sm:$0xff]  }
 0x31c   :  { %v9606_v49 = vpop.permute.xlu1 %7548 }
 0x31d   :  { %v7551_v25 = vunpack.i.h.bf16 %v9606_v49  ;;  %v7550_v16 = vunpack.i.l.bf16 %v9606_v49  ;;  %v7756_v49 = vld [vmem:[%s11793_s23 + $0x220] ss:$8 sps:$4 sm:$0xff]  }
 0x31f   :  { %v2845_v57 = vsel %vm2843_vm6, %v7550_v16, %v7551_v25 }
 0x320   :  { %v2830_v52 = vpop.permute.xlu1 %2829  ;;  %2922 = vmatprep.mubr.f32.mxu0 %v2845_v57 }
 0x321   :  { %v2844_v51 = vsel %vm2843_vm6, %v2830_v52, %v7550_v16 }
 0x322   :  { %2923 = vmatmul.mubr.f32.vlgmr.msra.gmra.mrb[8].mxu0 %v2844_v51  ;;  %v9660_v51 = vld [vmem:[%s11793_s23 + $0x140] ss:$8 sps:$4 sm:$0xff]  }
 0x323   :  { %6776 = vmatpush1.bf16.msra.mxu0 %v7702_v54 }
 0x324   :  { %v9625_v24 = vpop.permute.xlu1 %7558  ;;  %6778 = vmatprep.subr.bf16.mxu0 %v7703_v29 }
 0x325   :  { %v7561_v1 = vunpack.i.h.bf16 %v9625_v24  ;;  %v7560_v46 = vunpack.i.l.bf16 %v9625_v24 }
 0x327   :  { %6780 = vmatpush1.bf16.msra.mxu0 %v7705_v30  ;;  %v2433_v9 = vsel %vm1256_vm8, %v7560_v46, %v7561_v1  ;;  %v2432_v28 = vsel %vm1256_vm8, %v2407_v11, %v7560_v46  ;;  %v9665_v11 = vld [vmem:[%s11793_s23 + $0x154] ss:$8 sps:$4 sm:$0xff]  }
 0x328   :  { %v2342_v17 = vpop.permute.xlu1 %2341  ;;  %6782 = vmatprep.subr.bf16.mxu0 %v7706_v31  ;;  %v2511_v35 = vmax.f32 %v2433_v9, %v2485_v39 }
 0x329   :  { %v2367_v6 = vsel %vm1070_vm5, %v2342_v17, %v7555_v26  ;;  %v2392_v26 = vsel %vm1096_vm3, %v2366_v4, 0.0  ;;  %v2509_v4 = vsel %vm1375_vm4, %v2483_v36, 0.0  ;;  %vm11802_vm3 = vmmov %vm11797_vm0 }
 0x32a   :  { %v2524_v14 = vmax.f32 %v2394_v41, %v2511_v35  ;;  %v2393_v57 = vmax.f32 %v9363_v2, %v2367_v6  ;;  %v2495_v2 = vsel %vm11800_vm12, %v7546_v42, %v2483_v36  ;;  %v2405_v39 = vmax.f32 %v9419_v38, %v2392_v26  ;;  %v7718_v38 = vld [vmem:[%s11793_s23 + $0x164] ss:$8 sps:$4 sm:$0xff]   ;;  %v7721_v42 = vld [vmem:[%s11793_s23 + $0x174] ss:$8 sps:$4 sm:$0xff]  }
 0x32b   :  { %6784 = vmatpush1.bf16.msra.mxu0 %v7708_v8  ;;  %v7586_v35 = vunpack.i.h.bf16 %v9702_v27  ;;  %vm183_vm12 = vcmask 556032  }
 0x32c   :  { %v2459_v7 = vpop.permute.xlu1 %2458  ;;  %2603 = vmatprep.mubr.f32.mxu1 %v2524_v14  ;;  %6786 = vmatprep.subr.bf16.mxu0 %v7709_v18  ;;  %v7726_v14 = vld [vmem:[%s11793_s23 + $0x180] ss:$8 sps:$4 sm:$0xff]  }
 0x32d   :  { %v2484_v16 = vsel %vm11797_vm0, %v2459_v7, %v7565_v62  ;;  %v7727_v7 = vld [vmem:[%s11793_s23 + $0x194] ss:$8 sps:$4 sm:$0xff]  }
 0x32e   :  { %v2510_v52 = vmax.f32 %v2432_v28, %v2484_v16 }
 0x32f   :  { %6788 = vmatpush1.bf16.msra.mxu0 %v7711_v12 }
 0x330   :  { %v2523_v50 = vmax.f32 %v2393_v57, %v2510_v52  ;;  %v2431_v9 = vpop.permute.xlu1 %2430  ;;  %6790 = vmatprep.subr.bf16.mxu0 %v7712_v3 }
 0x331   :  { %v2443_v62 = vsel %vm1256_vm8, %v7541_v5, %v2431_v9  ;;  %v2457_v46 = vsel %vm1282_vm1, %v2431_v9, 0.0  ;;  %vm11803_vm1 = vmmov %vm11797_vm0 }
 0x332   :  { %v2521_v17 = vmax.f32 %v2443_v62, %v2495_v2  ;;  %v2522_v41 = vmax.f32 %v2457_v46, %v2509_v4  ;;  %2604 = vmatmul.mubr.f32.vlgmr.msra.gmra.mrb[6].mxu1 %v2523_v50  ;;  %v7729_v50 = vld [vmem:[%s11793_s23 + $0x190] ss:$8 sps:$4 sm:$0xff]   ;;  %v7739_v4 = vld [vmem:[%s11793_s23 + $0x1d4] ss:$8 sps:$4 sm:$0xff]   ;;  %v7742_v46 = vld [vmem:[%s11793_s23 + $0x1e4] ss:$8 sps:$4 sm:$0xff]  }
 0x333   :  { %6580 = vmatpush1.bf16.msra.mxu1 %v7702_v54  ;;  %6792 = vmatpush1.bf16.msra.mxu0 %v9660_v51  ;;  %v7576_v54 = vunpack.i.h.bf16 %v9596_v21  ;;  %v7741_v62 = vld [vmem:[%s11793_s23 + $0x1d0] ss:$8 sps:$4 sm:$0xff]  }
 0x334   :  { %v2534_v22 = vmax.f32 %v2404_v55, %v2521_v17  ;;  %v2535_v5 = vmax.f32 %v2405_v39, %v2522_v41  ;;  %6582 = vmatprep.subr.bf16.mxu1 %v7703_v29  ;;  %6794 = vmatprep.subr.bf16.mxu0 %v9665_v11  ;;  %v7723_v55 = vld [vmem:[%s11793_s23 + $0x170] ss:$8 sps:$4 sm:$0xff]   ;;  %v7744_v39 = vld [vmem:[%s11793_s23 + $0x1e0] ss:$8 sps:$4 sm:$0xff]   ;;  %v7745_v17 = vld [vmem:[%s11793_s23 + $0x1f4] ss:$8 sps:$4 sm:$0xff]  }
 0x335   :  { %v2370_v57 = vsel %vm1070_vm5, %v7575_v34, %v7576_v54  ;;  %v7747_v41 = vld [vmem:[%s11793_s23 + $0x1f0] ss:$8 sps:$4 sm:$0xff]  }
 0x336   :  { %2841 = vrot.lane.b32.xlu0 %v2535_v5, %s7831_s28  ;;  %2839 = vrot.lane.b32.xlu1 %v2534_v22, %s7831_s28  ;;  %v9707_v36 = vpop.permute.xlu1 %7568  ;;  %s11801_s28 = sld [smem:[#allocation57_spill]]  ;;  %v2396_v24 = vmax.f32 %v9373_v43, %v2370_v57  ;;  %v7733_v43 = vld [vmem:[%s11793_s23 + $0x1b4] ss:$8 sps:$4 sm:$0xff]   ;;  %v7750_v22 = vld [vmem:[%s11793_s23 + $0x200] ss:$8 sps:$4 sm:$0xff]  }
 0x337   :  { %6584 = vmatpush1.bf16.msra.mxu1 %v7705_v30  ;;  %6796 = vmatpush1.bf16.msra.mxu0 %v9680_v33  ;;  %v7571_v29 = vunpack.i.h.bf16 %v9707_v36  ;;  %v7570_v30 = vunpack.i.l.bf16 %v9707_v36  ;;  %v7751_v5 = vld [vmem:[%s11793_s23 + $0x214] ss:$8 sps:$4 sm:$0xff]   ;;  %v7772_v57 = vld [vmem:[%s11793_s23 + $0x284] ss:$8 sps:$4 sm:$0xff]  }
 0x338   :  { %6586 = vmatprep.subr.bf16.mxu1 %v7706_v31  ;;  %6798 = vmatprep.subr.bf16.mxu0 %v7718_v38  ;;  %v7724_v31 = vld [vmem:[%s11793_s23 + $0x184] ss:$8 sps:$4 sm:$0xff]  }
 0x33a   :  { %2416 = vrot.lane.b32.xlu0 %v9381_v23, %s7824_s0  ;;  %2351 = vrot.lane.b32.xlu1 %v9381_v23, %s11562_s21  ;;  %v9727_v6 = vpop.permute.xlu1 %7578  ;;  %s7836_s0 = smov 13  }
 0x33b   :  { %6588 = vmatpush1.bf16.msra.mxu1 %v7708_v8  ;;  %6800 = vmatpush1.bf16.msra.mxu0 %v7720_v56  ;;  %v7585_v8 = vunpack.i.l.bf16 %v9702_v27  ;;  %v7581_v28 = vunpack.i.h.bf16 %v9727_v6  ;;  %v7580_v16 = vunpack.i.l.bf16 %v9727_v6 }
 0x33c   :  { %6590 = vmatprep.subr.bf16.mxu1 %v7709_v18  ;;  %6802 = vmatprep.subr.bf16.mxu0 %v7721_v42  ;;  %v2847_v18 = vsel %vm2843_vm6, %v7570_v30, %v7571_v29 }
 0x33d   :  { %2993 = vmatprep.mubr.f32.mxu0 %v2847_v18  ;;  %v2486_v52 = vsel %vm11802_vm3, %v7566_v45, %v7585_v8  ;;  %v2434_v26 = vsel %vm1256_vm8, %v7561_v1, %v7580_v16  ;;  %v2435_v34 = vsel %vm1256_vm8, %v7580_v16, %v7581_v28  ;;  %v2487_v19 = vsel %vm11803_vm1, %v7585_v8, %v7586_v35  ;;  %v7763_v8 = vld [vmem:[%s11793_s23 + $0x254] ss:$8 sps:$4 sm:$0xff]   ;;  %v7765_v18 = vld [vmem:[%s11793_s23 + $0x250] ss:$8 sps:$4 sm:$0xff]  }
 0x33e   :  { %2468 = vrot.lane.b32.xlu1 %v9381_v23, %s7825_s8  ;;  %v2512_v45 = vmax.f32 %v2434_v26, %v2486_v52  ;;  %v2513_v1 = vmax.f32 %v2435_v34, %v2487_v19  ;;  %v7771_v16 = vld [vmem:[%s11793_s23 + $0x270] ss:$8 sps:$4 sm:$0xff]   ;;  %v7775_v52 = vld [vmem:[%s11793_s23 + $0x294] ss:$8 sps:$4 sm:$0xff]   ;;  %v7780_v34 = vld [vmem:[%s11793_s23 + $0x2a0] ss:$8 sps:$4 sm:$0xff]  }
 0x33f   :  { %6592 = vmatpush1.bf16.msra.mxu1 %v7711_v12  ;;  %6804 = vmatpush1.bf16.msra.mxu0 %v7723_v55  ;;  %v3153_v12 = vld [vmem:[%s11801_s28] sm:$0xff]  ;;  %v7777_v26 = vld [vmem:[%s11793_s23 + $0x290] ss:$8 sps:$4 sm:$0xff]   ;;  %v7781_v19 = vld [vmem:[%s11793_s23 + $0x2b4] ss:$8 sps:$4 sm:$0xff]   ;;  %s7833_s8 = smov 68  }
 0x340   :  { %6594 = vmatprep.subr.bf16.mxu1 %v7712_v3  ;;  %6806 = vmatprep.subr.bf16.mxu0 %v7724_v31  ;;  %v7832_v3 = vmov 0   ;;  %v2526_v9 = vmax.f32 %v2396_v24, %v2513_v1  ;;  %v9766_v2 = vmax.f32 %v2395_v61, %v2512_v45  ;;  %v7738_v61 = vld [vmem:[%s11793_s23 + $0x1c0] ss:$8 sps:$4 sm:$0xff]   ;;  %v7783_v45 = vld [vmem:[%s11793_s23 + $0x2b0] ss:$8 sps:$4 sm:$0xff]   ;;  %s7834_s28 = smov 15  }
 0x341   :  { %7587 = vset.pattern.permute.xlu0 %v7832_v3  ;;  %7588 = vset.pattern.permute.xlu1 %v7832_v3  ;;  %v7774_v3 = vld [vmem:[%s11793_s23 + $0x280] ss:$8 sps:$4 sm:$0xff]   ;;  %v7784_v24 = vld [vmem:[%s11793_s23 + $0x2c4] ss:$8 sps:$4 sm:$0xff]   ;;  %vm3174_vm3 = vcmask 121856   ;;  %vm3208_vm1 = vcmask 113664  }
 0x342   :  { %3156 = vperm.xlu0 %7587, %v3153_v12   ;;  %2674 = vmatprep.mubr.f32.mxu1 %v2526_v9  ;;  %v7769_v12 = vld [vmem:[%s11793_s23 + $0x274] ss:$8 sps:$4 sm:$0xff]   ;;  %v7786_v1 = vld [vmem:[%s11793_s23 + $0x2c0] ss:$8 sps:$4 sm:$0xff]   ;;  %v7789_v9 = vld [vmem:[%s11793_s23 + $0x2d0] ss:$8 sps:$4 sm:$0xff]  }
 0x343   :  { %6596 = vmatpush1.bf16.msra.mxu1 %v9660_v51  ;;  %6808 = vmatpush1.bf16.msra.mxu0 %v7726_v14  ;;  %v7730_v51 = vld [vmem:[%s11793_s23 + $0x1a4] ss:$8 sps:$4 sm:$0xff]  }
 0x344   :  { %6598 = vmatprep.subr.bf16.mxu1 %v9665_v11  ;;  %6810 = vmatprep.subr.bf16.mxu0 %v7727_v7  ;;  %v7732_v11 = vld [vmem:[%s11793_s23 + $0x1a0] ss:$8 sps:$4 sm:$0xff]  }
 0x347   :  { %6600 = vmatpush1.bf16.msra.mxu1 %v9680_v33  ;;  %6812 = vmatpush1.bf16.msra.mxu0 %v7729_v50  ;;  %v7748_v33 = vld [vmem:[%s11793_s23 + $0x204] ss:$8 sps:$4 sm:$0xff]  }
 0x348   :  { %6602 = vmatprep.subr.bf16.mxu1 %v7718_v38  ;;  %6814 = vmatprep.subr.bf16.mxu0 %v7730_v51  ;;  %v2846_v38 = vsel %vm2843_vm6, %v7551_v25, %v7570_v30  ;;  %v7757_v25 = vld [vmem:[%s11793_s23 + $0x234] ss:$8 sps:$4 sm:$0xff]   ;;  %v7760_v30 = vld [vmem:[%s11793_s23 + $0x244] ss:$8 sps:$4 sm:$0xff]  }
 0x34b   :  { %6604 = vmatpush1.bf16.msra.mxu1 %v7720_v56  ;;  %6816 = vmatpush1.bf16.msra.mxu0 %v7732_v11  ;;  %v7753_v56 = vld [vmem:[%s11793_s23 + $0x210] ss:$8 sps:$4 sm:$0xff]  }
 0x34c   :  { %6606 = vmatprep.subr.bf16.mxu1 %v7721_v42  ;;  %6818 = vmatprep.subr.bf16.mxu0 %v7733_v43  ;;  %v7754_v42 = vld [vmem:[%s11793_s23 + $0x224] ss:$8 sps:$4 sm:$0xff]  }
 0x34f   :  { %6608 = vmatpush1.bf16.msra.mxu1 %v7723_v55  ;;  %6820 = vmatpush1.bf16.msra.mxu0 %v7735_v48  ;;  %v7759_v55 = vld [vmem:[%s11793_s23 + $0x230] ss:$8 sps:$4 sm:$0xff]  }
 0x350   :  { %6610 = vmatprep.subr.bf16.mxu1 %v7724_v31  ;;  %6822 = vmatprep.subr.bf16.mxu0 %v7736_v40  ;;  %v7762_v31 = vld [vmem:[%s11793_s23 + $0x240] ss:$8 sps:$4 sm:$0xff]  }
 0x353   :  { %6612 = vmatpush1.bf16.msra.mxu1 %v7726_v14  ;;  %6824 = vmatpush1.bf16.msra.mxu0 %v7738_v61  ;;  %v7766_v14 = vld [vmem:[%s11793_s23 + $0x264] ss:$8 sps:$4 sm:$0xff]  }
 0x354   :  { %6614 = vmatprep.subr.bf16.mxu1 %v7727_v7  ;;  %6826 = vmatprep.subr.bf16.mxu0 %v7739_v4  ;;  %v7768_v7 = vld [vmem:[%s11793_s23 + $0x260] ss:$8 sps:$4 sm:$0xff]  }
 0x357   :  { %6616 = vmatpush1.bf16.msra.mxu1 %v7729_v50  ;;  %6828 = vmatpush1.bf16.msra.mxu0 %v7741_v62  ;;  %v7778_v50 = vld [vmem:[%s11793_s23 + $0x2a4] ss:$8 sps:$4 sm:$0xff]  }
 0x358   :  { %6618 = vmatprep.subr.bf16.mxu1 %v7730_v51  ;;  %6830 = vmatprep.subr.bf16.mxu0 %v7742_v46  ;;  %v7787_v51 = vld [vmem:[%s11793_s23 + $0x2d4] ss:$8 sps:$4 sm:$0xff]  }
 0x35b   :  { %6620 = vmatpush1.bf16.msra.mxu1 %v7732_v11  ;;  %6832 = vmatpush1.bf16.msra.mxu0 %v7744_v39  ;;  %v7792_v11 = vld [vmem:[%s11793_s23 + $0x2e0] ss:$8 sps:$4 sm:$0xff]  }
 0x35c   :  { %6622 = vmatprep.subr.bf16.mxu1 %v7733_v43  ;;  %6834 = vmatprep.subr.bf16.mxu0 %v7745_v17  ;;  %v7793_v43 = vld [vmem:[%s11793_s23 + $0x2f4] ss:$8 sps:$4 sm:$0xff]  }
 0x35f   :  { %6624 = vmatpush1.bf16.msra.mxu1 %v7735_v48  ;;  %6836 = vmatpush1.bf16.msra.mxu0 %v7747_v41  ;;  %v7795_v48 = vld [vmem:[%s11793_s23 + $0x2f0] ss:$8 sps:$4 sm:$0xff]  }
 0x360   :  { %6626 = vmatprep.subr.bf16.mxu1 %v7736_v40  ;;  %6838 = vmatprep.subr.bf16.mxu0 %v7748_v33  ;;  %v7796_v40 = vld [vmem:[%s11793_s23 + $0x304] ss:$8 sps:$4 sm:$0xff]  }
 0x362   :  { %2994 = vmatmul.mubr.f32.vlgmr.msra.gmra.mrb[8].mxu0 %v2846_v38 }
 0x363   :  { %6628 = vmatpush1.bf16.msra.mxu1 %v7738_v61  ;;  %6840 = vmatpush1.bf16.msra.mxu0 %v7750_v22 }
 0x364   :  { %6630 = vmatprep.subr.bf16.mxu1 %v7739_v4  ;;  %6842 = vmatprep.subr.bf16.mxu0 %v7751_v5 }
 0x367   :  { %6632 = vmatpush1.bf16.msra.mxu1 %v7741_v62  ;;  %6844 = vmatpush1.bf16.msra.mxu0 %v7753_v56  ;;  %v7798_v62 = vld [vmem:[%s11793_s23 + $0x300] ss:$8 sps:$4 sm:$0xff]  }
 0x368   :  { %6634 = vmatprep.subr.bf16.mxu1 %v7742_v46  ;;  %6846 = vmatprep.subr.bf16.mxu0 %v7754_v42 }
 0x36b   :  { %6636 = vmatpush1.bf16.msra.mxu1 %v7744_v39  ;;  %6848 = vmatpush1.bf16.msra.mxu0 %v7756_v49 }
 0x36c   :  { %6638 = vmatprep.subr.bf16.mxu1 %v7745_v17  ;;  %6850 = vmatprep.subr.bf16.mxu0 %v7757_v25 }
 0x36f   :  { %6640 = vmatpush1.bf16.msra.mxu1 %v7747_v41  ;;  %6852 = vmatpush1.bf16.msra.mxu0 %v7759_v55 }
 0x370   :  { %6642 = vmatprep.subr.bf16.mxu1 %v7748_v33  ;;  %6854 = vmatprep.subr.bf16.mxu0 %v7760_v30 }
 0x372   :  { %2675 = vmatmul.mubr.f32.vlgmr.msra.gmra.mrb[6].mxu1 %v9766_v2  ;;  %v7790_v2 = vld [vmem:[%s11793_s23 + $0x2e4] ss:$8 sps:$4 sm:$0xff]   ;;  %s7842_s23 = smov 79  }
 0x373   :  { %6644 = vmatpush1.bf16.msra.mxu1 %v7750_v22  ;;  %6856 = vmatpush1.bf16.msra.mxu0 %v7762_v31 }
 0x374   :  { %6646 = vmatprep.subr.bf16.mxu1 %v7751_v5  ;;  %6858 = vmatprep.subr.bf16.mxu0 %v7763_v8 }
 0x377   :  { %6648 = vmatpush1.bf16.msra.mxu1 %v7753_v56  ;;  %6860 = vmatpush1.bf16.msra.mxu0 %v7765_v18 }
 0x378   :  { %6650 = vmatprep.subr.bf16.mxu1 %v7754_v42  ;;  %6862 = vmatprep.subr.bf16.mxu0 %v7766_v14 }
 0x37b   :  { %6652 = vmatpush1.bf16.msra.mxu1 %v7756_v49  ;;  %6864 = vmatpush1.bf16.msra.mxu0 %v7768_v7 }
 0x37c   :  { %6654 = vmatprep.subr.bf16.mxu1 %v7757_v25  ;;  %6866 = vmatprep.subr.bf16.mxu0 %v7769_v12 }
 0x37f   :  { %6656 = vmatpush1.bf16.msra.mxu1 %v7759_v55  ;;  %6868 = vmatpush1.bf16.msra.mxu0 %v7771_v16 }
 0x380   :  { %6658 = vmatprep.subr.bf16.mxu1 %v7760_v30  ;;  %6870 = vmatprep.subr.bf16.mxu0 %v7772_v57 }
 0x383   :  { %6660 = vmatpush1.bf16.msra.mxu1 %v7762_v31  ;;  %6872 = vmatpush1.bf16.msra.mxu0 %v7774_v3 }
 0x384   :  { %6662 = vmatprep.subr.bf16.mxu1 %v7763_v8  ;;  %6874 = vmatprep.subr.bf16.mxu0 %v7775_v52 }
 0x387   :  { %6664 = vmatpush1.bf16.msra.mxu1 %v7765_v18  ;;  %6876 = vmatpush1.bf16.msra.mxu0 %v7777_v26 }
 0x388   :  { %6666 = vmatprep.subr.bf16.mxu1 %v7766_v14  ;;  %6878 = vmatprep.subr.bf16.mxu0 %v7778_v50 }
 0x38b   :  { %6668 = vmatpush1.bf16.msra.mxu1 %v7768_v7  ;;  %6880 = vmatpush1.bf16.msra.mxu0 %v7780_v34 }
 0x38c   :  { %6670 = vmatprep.subr.bf16.mxu1 %v7769_v12  ;;  %6882 = vmatprep.subr.bf16.mxu0 %v7781_v19 }
 0x38f   :  { %6672 = vmatpush1.bf16.msra.mxu1 %v7771_v16  ;;  %6884 = vmatpush1.bf16.msra.mxu0 %v7783_v45 }
 0x390   :  { %6674 = vmatprep.subr.bf16.mxu1 %v7772_v57  ;;  %6886 = vmatprep.subr.bf16.mxu0 %v7784_v24 }
 0x393   :  { %6676 = vmatpush1.bf16.msra.mxu1 %v7774_v3  ;;  %6888 = vmatpush1.bf16.msra.mxu0 %v7786_v1  ;;  %v10003_v3 = vld [vmem:[%s11808_s6 + $0x10] sm:$0x1] }
 0x394   :  { %6678 = vmatprep.subr.bf16.mxu1 %v7775_v52  ;;  %6890 = vmatprep.subr.bf16.mxu0 %v7787_v51  ;;  %v10020_v52 = vld [vmem:[%s11808_s6 + $0x18] sm:$0x1] }
 0x397   :  { %6680 = vmatpush1.bf16.msra.mxu1 %v7777_v26  ;;  %6892 = vmatpush1.bf16.msra.mxu0 %v7789_v9 }
 0x398   :  { %6682 = vmatprep.subr.bf16.mxu1 %v7778_v50  ;;  %6894 = vmatprep.subr.bf16.mxu0 %v7790_v2 }
 0x39b   :  { %6684 = vmatpush1.bf16.msra.mxu1 %v7780_v34  ;;  %6896 = vmatpush1.bf16.msra.mxu0 %v7792_v11 }
 0x39c   :  { %6686 = vmatprep.subr.bf16.mxu1 %v7781_v19  ;;  %6898 = vmatprep.subr.bf16.mxu0 %v7793_v43 }
 0x39f   :  { %6688 = vmatpush1.bf16.msra.mxu1 %v7783_v45  ;;  %6900 = vmatpush1.bf16.msra.mxu0 %v7795_v48 }
 0x3a0   :  { %6690 = vmatprep.subr.bf16.mxu1 %v7784_v24  ;;  %6902 = vmatprep.subr.bf16.mxu0 %v7796_v40 }
 0x3a3   :  { %6692 = vmatpush1.bf16.msra.mxu1 %v7786_v1 }
 0x3a4   :  { %6694 = vmatprep.subr.bf16.mxu1 %v7787_v51 }
 0x3a7   :  { %6696 = vmatpush1.bf16.msra.mxu1 %v7789_v9 }
 0x3a8   :  { %v2842_v61 = vpop.permute.xlu0 %2841  ;;  %v2840_v4 = vpop.permute.xlu1 %2839  ;;  %6698 = vmatprep.subr.bf16.mxu1 %v7790_v2 }
 0x3a9   :  { %v2849_v46 = vsel %vm2843_vm6, %v2840_v4, %v2842_v61  ;;  %v2848_v39 = vsel %vm2843_vm6, %v7571_v29, %v2840_v4  ;;  %vm11804_vm6 = vmmov %vm11797_vm0  ;;  %vm11806_vm0 = vcmask 130048  }
 0x3aa   :  { %3064 = vmatprep.mubr.f32.mxu0 %v2849_v46 }
 0x3ab   :  { %3065 = vmatmul.mubr.f32.vlgmr.msra.gmra.mrb[8].mxu0 %v2848_v39  ;;  %6700 = vmatpush1.bf16.msra.mxu1 %v7792_v11 }
 0x3ac   :  { %v2352_v17 = vpop.permute.xlu1 %2351  ;;  %6904 = vmatpush1.bf16.msra.mxu0 %v7798_v62  ;;  %3135 = vmatprep.mubr.f32.mxu0 %v11700_v37  ;;  %v2417_v41 = vpop.permute.xlu0 %2416 }
 0x3ad   :  { %6702 = vmatprep.subr.bf16.mxu1 %v7793_v43  ;;  %v2371_v33 = vsel %vm1070_vm5, %v7576_v54, %v2352_v17  ;;  %v2372_v22 = vsel %vm1070_vm5, %v2352_v17, %v9514_v63  ;;  %v2436_v29 = vsel %vm1256_vm8, %v7581_v28, %v2417_v41  ;;  %v2437_v5 = vsel %vm1256_vm8, %v2417_v41, %v9544_v15  ;;  %vm11807_vm8 = vmmov %vm11806_vm0  ;;  %v168_v15 = vld [vmem:[%s11808_s6 + $0x8] sm:$0xff] }
 0x3ae   :  { %v2397_v54 = vmax.f32 %v9375_v32, %v2371_v33  ;;  %v2398_v63 = vmax.f32 %v9381_v23, %v2372_v22  ;;  %v9941_v32 = vld [vmem:[%s11808_s6] sm:$0xff]  ;;  %s7843_s6 = smov 98  }
 0x3af   :  { %6704 = vmatpush1.bf16.msra.mxu1 %v7795_v48  ;;  %175 = vrot.lane.b32.xlu0 %v9941_v32, %s7833_s8  ;;  %v3185_v9 = vrot.slane %v9941_v32, %v11750_v10  ;;  %v3219_v2 = vrot.slane %v9941_v32, %v11764_v59 }
 0x3b0   :  { %v2469_v36 = vpop.permute.xlu1 %2468  ;;  %6706 = vmatprep.subr.bf16.mxu1 %v7796_v40 }
 0x3b1   :  { %v2488_v38 = vsel %vm11804_vm6, %v7586_v35, %v2469_v36  ;;  %v2489_v21 = vsel %vm11805_vm2, %v2469_v36, %v9542_v44  ;;  %vm3242_vm6 = vcmask 105472   ;;  %vm11809_vm2 = vcmask 7168  }
 0x3b2   :  { %v2514_v56 = vmax.f32 %v2436_v29, %v2488_v38  ;;  %v2515_v42 = vmax.f32 %v2437_v5, %v2489_v21  ;;  %v3290_v38 = vrot.slane %v9941_v32, %v11779_v53  ;;  %v3253_v21 = vrot.slane %v9941_v32, %v11778_v47 }
 0x3b3   :  { %6067 = vmatmul.mubr.msk.f32.vlgmr.msra.gmra.mrb[8].mxu0 %vm11806_vm0, %v2842_v61  ;;  %vm11810_vm0 = vmmov %vm11809_vm2 }
 0x3b4   :  { %v2527_v6 = vmax.f32 %v2397_v54, %v2514_v56  ;;  %v2528_v28 = vmax.f32 %v2398_v63, %v2515_v42  ;;  %3623 = vmatprep.mubr.f32.mxu0 %v11700_v37 }
 0x3b6   :  { %2745 = vmatprep.mubr.f32.mxu1 %v2528_v28 }
 0x3b7   :  { %2746 = vmatmul.mubr.f32.vlgmr.msra.gmra.mrb[6].mxu1 %v2527_v6 }
 0x3b8   :  { %6708 = vmatpush1.bf16.msra.mxu1 %v7798_v62  ;;  %2816 = vmatprep.mubr.f32.mxu1 %v11700_v37 }
 0x3bf   :  { %6066 = vmatmul.mubr.msk.f32.vlgmr.msra.gmra.mrb[6].mxu1 %vm11807_vm8, %v9554_v20  ;;  %vm11571_vm8 = vcmask 56320  }
 0x3c0   :  { %3546 = vmatprep.mubr.f32.mxu1 %v11700_v37 }
 0x3c1   :  { %v3157_v20 = vpop.permute.xlu0 %3156 }
 0x421   :  { %v9965_v25 = vpop.permute.xlu0 %175 }
 0x422   :  { %v9969_v55 = vsel %vm183_vm12, %v168_v15, %v9965_v25 }
 0x423   :  { %v3314_v31 = vrot.slane %v9969_v55, %v11791_v58  ;;  %v3189_v61 = vrot.slane %v9969_v55, %v11750_v10  ;;  %v3223_v4 = vrot.slane %v9969_v55, %v11764_v59  ;;  %v3257_v6 = vrot.slane %v9969_v55, %v11778_v47 }
 0x424   :  { %v3294_v28 = vrot.slane %v9969_v55, %v11779_v53 }
 0x486   :  { %v3137_v23 = vpop.f32.mrb[8].mxu0 }
 0x487   :  { %3144 = vrot.lane.b32.xlu1 %v3137_v23, %s7833_s8  ;;  %v3139_v44 = vpop.f32.mrb[9].mxu0 }
 0x48b   :  { %3146 = vrot.lane.b32.xlu1 %v3139_v44, %s7833_s8 }
 0x48f   :  { %177 = vrot.lane.b32.xlu1 %v168_v15, %s7833_s8 }
 0x492   :  { %v2818_v27 = vpop.f32.mrb[6].mxu1 }
 0x493   :  { %v9951_v35 = vadd.f32 %v3157_v20, %v2818_v27  ;;  %v2820_v49 = vpop.f32.mrb[7].mxu1 }
 0x495   :  { %3168 = vrot.lane.b32.xlu0 %v9951_v35, %s7834_s28  ;;  %3202 = vrot.lane.b32.xlu1 %v9951_v35, %s7835_s4 }
 0x499   :  { %3271 = vrot.lane.b32.xlu0 %v9951_v35, %s11564_s2  ;;  %3236 = vrot.lane.b32.xlu1 %v9951_v35, %s7836_s0 }
 0x49d   :  { %3327 = vrot.lane.b32.xlu0 %v9951_v35, %s11562_s21  ;;  %3364 = vrot.lane.b32.xlu1 %v9951_v35, %s7837_s29 }
 0x4f9   :  { %v3145_v30 = vpop.permute.xlu1 %3144 }
 0x4fa   :  { %v3152_v8 = vsel %vm183_vm12, %v2820_v49, %v3145_v30 }
 0x4fb   :  { %v3160_v18 = vadd.f32 %v3157_v20, %v3152_v8 }
 0x4fd   :  { %3170 = vrot.lane.b32.xlu0 %v3160_v18, %s7834_s28  ;;  %v3147_v14 = vpop.permute.xlu1 %3146  ;;  %v9975_v7 = vmul.f32 %v3314_v31, %v3160_v18 }
 0x4fe   :  { %v9977_v12 = vadd.f32 %v3157_v20, %v3147_v14  ;;  %v3148_v16 = vsel %vm183_vm12, %v3145_v30, %v3147_v14 }
 0x4ff   :  { %v9991_v57 = vadd.f32 %v3157_v20, %v3148_v16 }
 0x500   :  { %3277 = vrot.lane.b32.xlu1 %v9977_v12, %s11564_s2 }
 0x501   :  { %3204 = vrot.lane.b32.xlu0 %v3160_v18, %s7835_s4  ;;  %v10033_v26 = vpop.permute.xlu1 %177 }
 0x504   :  { %3333 = vrot.lane.b32.xlu1 %v9977_v12, %s11562_s21 }
 0x505   :  { %3238 = vrot.lane.b32.xlu0 %v3160_v18, %s7836_s0 }
 0x507   :  { %v3169_v50 = vpop.permute.xlu0 %3168  ;;  %v3203_v34 = vpop.permute.xlu1 %3202 }
 0x508   :  { %3329 = vrot.lane.b32.xlu1 %v3160_v18, %s11562_s21  ;;  %v3181_v11 = vsel %vm3174_vm3, 0.0, %v3169_v50  ;;  %v3215_v43 = vsel %vm3208_vm1, 0.0, %v3203_v34 }
 0x509   :  { %3273 = vrot.lane.b32.xlu0 %v3160_v18, %s11564_s2  ;;  %v3198_v46 = vmul.f32 %v3185_v9, %v3181_v11  ;;  %v3232_v39 = vmul.f32 %v3219_v2, %v3215_v43  ;;  %v3231_v9 = vrot.slane %v10033_v26, %v11764_v59 }
 0x50b   :  { %v3272_v19 = vpop.permute.xlu0 %3271  ;;  %v3237_v45 = vpop.permute.xlu1 %3236  ;;  %v6907_v5 = vpack.c.bf16 %v3232_v39, %v3198_v46 }
 0x50c   :  { %3366 = vrot.lane.b32.xlu1 %v3160_v18, %s7837_s29  ;;  %v3286_v54 = vsel %vm11809_vm2, 0.0, %v3272_v19  ;;  %v3249_v63 = vsel %vm3242_vm6, 0.0, %v3237_v45  ;;  %vm11813_vm2 = vmmov %vm11810_vm0 }
 0x50d   :  { %3370 = vrot.lane.b32.xlu0 %v9977_v12, %s7837_s29  ;;  %v3303_v44 = vmul.f32 %v3290_v38, %v3286_v54  ;;  %v3266_v15 = vmul.f32 %v3253_v21, %v3249_v63  ;;  %v3396_v21 = vrot.slane %v10033_v26, %v11743_v0  ;;  %v3384_v63 = vrot.slane %v9941_v32, %v11743_v0 }
 0x50f   :  { %v10035_v24 = vpop.permute.xlu0 %3327  ;;  %v10037_v1 = vpop.permute.xlu1 %3364 }
 0x510   :  { %3172 = vrot.lane.b32.xlu1 %v9991_v57, %s7834_s28  ;;  %s7839_s28 = smov 113  }
 0x511   :  { %3407 = vrot.lane.b32.xlu0 %v9977_v12, %s7838_s24 }
 0x514   :  { %3206 = vrot.lane.b32.xlu1 %v9991_v57, %s7835_s4  ;;  %s7851_s4 = smov 125  }
 0x515   :  { %3403 = vrot.lane.b32.xlu0 %v3160_v18, %s7838_s24 }
 0x518   :  { %179 = vrot.lane.b32.xlu1 %v10003_v3, %s7833_s8 }
 0x519   :  { %3275 = vrot.lane.b32.xlu0 %v9991_v57, %s11564_s2  ;;  %s7854_s2 = smov 95  }
 0x51c   :  { %3240 = vrot.lane.b32.xlu1 %v9991_v57, %s7836_s0  ;;  %s11814_s0 = sld [smem:[#allocation59_spill]] }
 0x51d   :  { %3401 = vrot.lane.b32.xlu0 %v9951_v35, %s7838_s24 }
 0x520   :  { %3368 = vrot.lane.b32.xlu1 %v9991_v57, %s7837_s29  ;;  %s7844_s29 = smov 117  }
 0x521   :  { %3331 = vrot.lane.b32.xlu0 %v9991_v57, %s11562_s21 }
 0x524   :  { %3405 = vrot.lane.b32.xlu1 %v9991_v57, %s7838_s24 }
 0x525   :  { %181 = vrot.lane.b32.xlu0 %v10020_v52, %s7833_s8 }
 0x528   :  { %3442 = vrot.lane.b32.xlu1 %v9991_v57, %s7839_s28 }
 0x529   :  { %3444 = vrot.lane.b32.xlu0 %v9977_v12, %s7839_s28 }
 0x52c   :  { %3440 = vrot.lane.b32.xlu1 %v3160_v18, %s7839_s28  ;;  %v6911_v18 = vpack.c.bf16 %v3303_v44, %v3266_v15  ;;  %v3433_v15 = vrot.slane %v10033_v26, %v11746_v13 }
 0x52d   :  { %3438 = vrot.lane.b32.xlu0 %v9951_v35, %s7839_s28 }
 0x56f   :  { %v3171_v51 = vpop.permute.xlu0 %3170 }
 0x570   :  { %v3175_v48 = vsel %vm3174_vm3, %v3169_v50, %v3171_v51  ;;  %v3310_v50 = vrot.slane %v9941_v32, %v11791_v58 }
 0x571   :  { %v3199_v41 = vmul.f32 %v3189_v61, %v3175_v48 }
 0x572   :  { %v10046_v40 = vpop.permute.xlu1 %3277 }
 0x573   :  { %v3205_v62 = vpop.permute.xlu0 %3204 }
 0x574   :  { %v3209_v17 = vsel %vm3208_vm1, %v3203_v34, %v3205_v62  ;;  %v10083_v34 = vsel %vm183_vm12, %v9965_v25, %v10033_v26 }
 0x575   :  { %v3233_v33 = vmul.f32 %v3223_v4, %v3209_v17  ;;  %v3193_v2 = vrot.slane %v10083_v34, %v11750_v10  ;;  %v3227_v11 = vrot.slane %v10083_v34, %v11764_v59  ;;  %v3298_v44 = vrot.slane %v10083_v34, %v11779_v53 }
 0x576   :  { %v10053_v22 = vpop.permute.xlu1 %3333 }
 0x577   :  { %v10055_v36 = vpop.permute.xlu0 %3238  ;;  %v6905_v29 = vpack.c.bf16 %v3233_v33, %v3199_v41  ;;  %v3388_v41 = vrot.slane %v9969_v55, %v11743_v0 }
 0x578   :  { %v3243_v56 = vsel %vm3242_vm6, %v3237_v45, %v10055_v36 }
 0x579   :  { %6906 = vmatprep.subr.bf16.mxu1 %v6905_v29  ;;  %v3267_v27 = vmul.f32 %v3257_v6, %v3243_v56 }
 0x57a   :  { %6908 = vmatpush1.bf16.msra.mxu1 %v6907_v5  ;;  %v10065_v42 = vpop.permute.xlu1 %3329  ;;  %v11811_v5 = vld [vmem:[#allocation7_spill] sm:$0xff] }
 0x57b   :  { %v3274_v23 = vpop.permute.xlu0 %3273  ;;  %v3351_v38 = vrot.slane %v9969_v55, %v11811_v5  ;;  %v3347_v54 = vrot.slane %v9941_v32, %v11811_v5  ;;  %v3359_v6 = vrot.slane %v10033_v26, %v11811_v5 }
 0x57c   :  { %v3279_v20 = vsel %vm11810_vm0, %v3272_v19, %v3274_v23  ;;  %v3197_v19 = vrot.slane %v10033_v26, %v11750_v10 }
 0x57d   :  { %v3304_v49 = vmul.f32 %v3294_v28, %v3279_v20 }
 0x57e   :  { %v10072_v30 = vpop.permute.xlu1 %3366 }
 0x57f   :  { %v10074_v31 = vpop.permute.xlu0 %3370  ;;  %v6909_v8 = vpack.c.bf16 %v3304_v49, %v3267_v27  ;;  %v3302_v27 = vrot.slane %v10033_v26, %v11779_v53  ;;  %v3265_v49 = vrot.slane %v10033_v26, %v11778_v47 }
 0x581   :  { %6910 = vmatprep.subr.bf16.mxu1 %v6909_v8  ;;  %v3322_v8 = vrot.slane %v10033_v26, %v11791_v58 }
 0x582   :  { %6912 = vmatpush1.bf16.msra.mxu1 %v6911_v18  ;;  %v3173_v14 = vpop.permute.xlu1 %3172 }
 0x583   :  { %v10076_v16 = vpop.permute.xlu0 %3407  ;;  %v3176_v45 = vsel %vm3174_vm3, %v3171_v51, %v3173_v14  ;;  %v3201_v48 = vmul.f32 %v3197_v19, %v3173_v14  ;;  %v10098_v51 = vmul.f32 %v3310_v50, %v9951_v35  ;;  %v3343_v35 = vsel %vm11571_vm8, %v10053_v22, 0.0 }
 0x584   :  { %v3200_v46 = vmul.f32 %v3193_v2, %v3176_v45  ;;  %vm3372_vm3 = vcmask 941056   ;;  %v3363_v18 = vmul.f32 %v3359_v6, %v3343_v35  ;;  %v3318_v50 = vrot.slane %v10083_v34, %v11791_v58 }
 0x585   :  { %v3400_v19 = vmul.f32 0.0, %v3396_v21  ;;  %v3429_v21 = vrot.slane %v10083_v34, %v11746_v13 }
 0x586   :  { %v3207_v43 = vpop.permute.xlu1 %3206 }
 0x587   :  { %v3210_v61 = vsel %vm3208_vm1, %v3205_v62, %v3207_v43  ;;  %v3235_v25 = vmul.f32 %v3231_v9, %v3207_v43  ;;  %v10095_v4 = vpop.permute.xlu0 %3403  ;;  %v3425_v62 = vrot.slane %v9969_v55, %v11746_v13  ;;  %vm11812_vm1 = vmmov %vm11810_vm0  ;;  %vm3409_vm0 = vcmask 932864  }
 0x588   :  { %v3234_v39 = vmul.f32 %v3227_v11, %v3210_v61  ;;  %v3392_v61 = vrot.slane %v10083_v34, %v11743_v0 }
 0x589   :  { %v6921_v17 = vpack.c.bf16 %v3235_v25, %v3201_v48  ;;  %v3437_v48 = vmul.f32 0.0, %v3433_v15  ;;  %v3355_v25 = vrot.slane %v10083_v34, %v11811_v5 }
 0x58a   :  { %v6923_v33 = vpack.c.bf16 %v3234_v39, %v3200_v46  ;;  %v10102_v29 = vpop.permute.xlu1 %179  ;;  %v3326_v39 = vmul.f32 %v3322_v8, %v9977_v12  ;;  %v3325_v12 = vmul.f32 %v3318_v50, %v9991_v57  ;;  %v3373_v57 = vsel %vm3372_vm3, %v10037_v1, %v10072_v30 }
 0x58b   :  { %v3276_v56 = vpop.permute.xlu0 %3275  ;;  %6922 = vmatprep.subr.bf16.mxu0 %v6921_v17 }
 0x58c   :  { %v3281_v28 = vsel %vm11812_vm1, %v3276_v56, %v10046_v40  ;;  %6924 = vmatpush1.bf16.msra.mxu0 %v6923_v33  ;;  %v3280_v20 = vsel %vm11813_vm2, %v3274_v23, %v3276_v56  ;;  %v3261_v40 = vrot.slane %v10083_v34, %v11778_v47  ;;  %v3335_v23 = vsel %vm1070_vm5, %v10035_v24, %v10065_v42 }
 0x58d   :  { %v3306_v45 = vmul.f32 %v3302_v27, %v3281_v28  ;;  %v3305_v26 = vmul.f32 %v3298_v44, %v3280_v20  ;;  %v3360_v24 = vmul.f32 %v3347_v54, %v3335_v23  ;;  %v6929_v28 = vpack.c.bf16 %v3363_v18, %v3326_v39 }
 0x58e   :  { %v3241_v14 = vpop.permute.xlu1 %3240  ;;  %v6933_v34 = vpack.c.bf16 %v3437_v48, %v3400_v19  ;;  %vm3416_vm1 = vcmask 998400   ;;  %vm3453_vm2 = vcmask 990208   ;;  %v193_v23 = vsel %vm183_vm12, %v10020_v52, %v10102_v29 }
 0x58f   :  { %v3244_v9 = vsel %vm3242_vm6, %v10055_v36, %v3241_v14  ;;  %v3269_v2 = vmul.f32 %v3265_v49, %v3241_v14  ;;  %v3402_v11 = vpop.permute.xlu0 %3401  ;;  %v3421_v36 = vrot.slane %v9941_v32, %v11746_v13  ;;  %vm3379_vm6 = vcmask 1006592  }
 0x590   :  { %v3268_v43 = vmul.f32 %v3261_v40, %v3244_v9  ;;  %v3410_v35 = vsel %vm3409_vm0, %v3402_v11, %v10095_v4  ;;  %v3458_v32 = vrot.slane %v10003_v3, %v11750_v10 }
 0x591   :  { %v6925_v46 = vpack.c.bf16 %v3306_v45, %v3269_v2  ;;  %v3434_v49 = vmul.f32 %v3421_v36, %v3410_v35 }
 0x592   :  { %v6927_v17 = vpack.c.bf16 %v3305_v26, %v3268_v43  ;;  %v3369_v33 = vpop.permute.xlu1 %3368  ;;  %v3462_v43 = vrot.slane %v193_v23, %v11750_v10 }
 0x593   :  { %v3375_v56 = vsel %vm3372_vm3, %v3369_v33, %v10074_v31  ;;  %v3332_v6 = vpop.permute.xlu0 %3331  ;;  %6926 = vmatprep.subr.bf16.mxu0 %v6925_v46  ;;  %v3374_v15 = vsel %vm3372_vm3, %v10072_v30, %v3369_v33  ;;  %v6915_v31 = vpack.c.bf16 %v3360_v24, %v10098_v51  ;;  %vm3446_vm3 = vcmask 924672   ;;  %v3164_v24 = vld [vmem:[%s11814_s0 + $0x8] sm:$0xff] }
 0x594   :  { %v3336_v54 = vsel %vm1070_vm5, %v10065_v42, %v3332_v6  ;;  %v3337_v44 = vsel %vm1070_vm5, %v3332_v6, %v10053_v22  ;;  %6928 = vmatpush1.bf16.msra.mxu0 %v6927_v17  ;;  %v3380_v42 = vsel %vm3379_vm6, %v3375_v56, 0.0  ;;  %v3398_v51 = vmul.f32 %v3388_v41, %v3374_v15  ;;  %v6149_v15 = vld [vmem:[%s11815_s27 + $0x20] sm:$0xff]  }
 0x595   :  { %v3361_v20 = vmul.f32 %v3351_v38, %v3336_v54  ;;  %v3362_v27 = vmul.f32 %v3355_v25, %v3337_v44  ;;  %6930 = vmatprep.subr.bf16.mxu0 %v6929_v28  ;;  %v3399_v19 = vmul.f32 %v3392_v61, %v3380_v42  ;;  %v3163_v25 = vld [vmem:[%s11814_s0] sm:$0xff]  ;;  %vm11570_vm6 = vcmask 588800   ;;  %v6146_v54 = vld [vmem:[%s11815_s27 + $0x8] sm:$0xff]   ;;  %v6147_v44 = vld [vmem:[%s11815_s27 + $0x10] sm:$0xff]   ;;  %s11817_s0 = sld [smem:[#allocation62_spill]] }
 0x596   :  { %v3406_v8 = vpop.permute.xlu1 %3405  ;;  %v6155_v42 = vld [vmem:[%s11815_s27 + $0x50] sm:$0xff]  }
 0x597   :  { %v6931_v22 = vpack.c.bf16 %v3362_v27, %v3325_v12  ;;  %v3411_v18 = vsel %vm3409_vm0, %v10095_v4, %v3406_v8  ;;  %v3412_v38 = vsel %vm3409_vm0, %v3406_v8, %v10076_v16  ;;  %v182_v40 = vpop.permute.xlu0 %181  ;;  %v6913_v14 = vpack.c.bf16 %v3361_v20, %v9975_v7  ;;  %v6099_v12 = vld [vmem:[%s11815_s27] sm:$0xff]   ;;  %v6150_v20 = vld [vmem:[%s11815_s27 + $0x28] sm:$0xff]   ;;  %v6151_v27 = vld [vmem:[%s11815_s27 + $0x30] sm:$0xff]  }
 0x598   :  { %v3417_v1 = vsel %vm3416_vm1, %v3412_v38, 0.0  ;;  %v3435_v30 = vmul.f32 %v3425_v62, %v3411_v18  ;;  %v3470_v50 = vrot.slane %v182_v40, %v11750_v10  ;;  %v185_v16 = vsel %vm183_vm12, %v10102_v29, %v182_v40  ;;  %v6156_v18 = vld [vmem:[%s11815_s27 + $0x58] sm:$0xff]  }
 0x599   :  { %v3436_v4 = vmul.f32 %v3429_v21, %v3417_v1  ;;  %6914 = vmatprep.subr.bf16.mxu1 %v6913_v14  ;;  %6932 = vmatpush1.bf16.msra.mxu0 %v6931_v22  ;;  %v3397_v7 = vmul.f32 %v3384_v63, %v3373_v57  ;;  %v3466_v11 = vrot.slane %v185_v16, %v11750_v10  ;;  %v6153_v57 = vld [vmem:[%s11815_s27 + $0x40] sm:$0xff]  }
 0x59a   :  { %6916 = vmatpush1.bf16.msra.mxu1 %v6915_v31  ;;  %6934 = vmatprep.subr.bf16.mxu0 %v6933_v34  ;;  %v3443_v41 = vpop.permute.xlu1 %3442  ;;  %v6917_v55 = vpack.c.bf16 %v3435_v30, %v3398_v51  ;;  %v3474_v62 = vmul.f32 0.0, %v3470_v50  ;;  %v6148_v34 = vld [vmem:[%s11815_s27 + $0x18] sm:$0xff]  }
 0x59b   :  { %v3445_v45 = vpop.permute.xlu0 %3444  ;;  %v6935_v9 = vpack.c.bf16 %v3436_v4, %v3399_v19  ;;  %v6919_v2 = vpack.c.bf16 %v3434_v49, %v3397_v7  ;;  %v6152_v31 = vld [vmem:[%s11815_s27 + $0x38] sm:$0xff]   ;;  %v6154_v49 = vld [vmem:[%s11815_s27 + $0x48] sm:$0xff]   ;;  %v525_v19 = vld [vmem:[%s11815_s27 + $0x60] sm:$0x3]  ;;  %s11566_s27 = smov 60  }
 0x59c   :  { %v3449_v26 = vsel %vm3446_vm3, %v3443_v41, %v3445_v45  ;;  %6918 = vmatprep.subr.bf16.mxu1 %v6917_v55 }
 0x59d   :  { %v3454_v63 = vsel %vm3453_vm2, %v3449_v26, 0.0  ;;  %6936 = vmatpush1.bf16.msra.mxu0 %v6935_v9 }
 0x59e   :  { %v3473_v48 = vmul.f32 %v3466_v11, %v3454_v63  ;;  %6920 = vmatpush1.bf16.msra.mxu1 %v6919_v2  ;;  %3575 = vmatprep.subr.mxu0 %v3474_v62  ;;  %v3441_v52 = vpop.permute.xlu1 %3440 }
 0x59f   :  { %v3448_v29 = vsel %vm3446_vm3, %v3441_v52, %v3443_v41  ;;  %v3439_v61 = vpop.permute.xlu0 %3438  ;;  %v550_v41 = vunpack.c.l.bf16 %v525_v19 }
 0x5a0   :  { %v3447_v46 = vsel %vm3446_vm3, %v3439_v61, %v3441_v52  ;;  %v3472_v3 = vmul.f32 %v3462_v43, %v3448_v29 }
 0x5a1   :  { %v3471_v39 = vmul.f32 %v3458_v32, %v3447_v46  ;;  %3576 = vmatpush1.msra.mxu0 %v3473_v48 }
 0x5a2   :  { %3498 = vmatprep.subr.mxu1 %v3472_v3  ;;  %6070 = vmatmul.mubr.msk.f32.vlgmr.msra.gmra.mrb[10].mxu0 %vm11570_vm6, %v3163_v25 }
 0x5a3   :  { %3499 = vmatpush1.msra.mxu1 %v3471_v39  ;;  %3629 = vmatprep.mubr.f32.mxu0 %v11700_v37 }
 0x5a4   :  { %6068 = vmatmul.mubr.msk.f32.vlgmr.msra.gmra.mrb[8].mxu1 %vm11570_vm6, %v3163_v25  ;;  %6973 = vmatprep.subr.bf16.mxu0 %v7829_v60 }
 0x5a5   :  { %3552 = vmatprep.mubr.f32.mxu1 %v11700_v37  ;;  %6937 = vmatprep.subr.bf16.mxu1 %v7829_v60 }
 0x5a6   :  { %6071 = vmatmul.mubr.msk.f32.gmra.mrb[12].mxu0 %vm11570_vm6, %v3164_v24  ;;  %6939 = vmatpush1.bf16.msra.mxu1 %v6099_v12 }
 0x5a7   :  { %6975 = vmatpush1.bf16.msra.mxu0 %v6099_v12  ;;  %6940 = vmatprep.subr.bf16.mxu1 %v7829_v60 }
 0x5a8   :  { %6069 = vmatmul.mubr.msk.f32.gmra.mrb[10].mxu1 %vm11570_vm6, %v3164_v24  ;;  %6976 = vmatprep.subr.bf16.mxu0 %v7829_v60  ;;  %vm4052_vm6 = vcmask 375808  }
 0x5aa   :  { %6942 = vmatpush1.bf16.msra.mxu1 %v6146_v54 }
 0x5ab   :  { %6978 = vmatpush1.bf16.msra.mxu0 %v6146_v54  ;;  %6943 = vmatprep.subr.bf16.mxu1 %v7829_v60 }
 0x5ac   :  { %6979 = vmatprep.subr.bf16.mxu0 %v7829_v60 }
 0x5ae   :  { %6945 = vmatpush1.bf16.msra.mxu1 %v6147_v44 }
 0x5af   :  { %6981 = vmatpush1.bf16.msra.mxu0 %v6147_v44  ;;  %6946 = vmatprep.subr.bf16.mxu1 %v7829_v60 }
 0x5b0   :  { %6982 = vmatprep.subr.bf16.mxu0 %v7829_v60 }
 0x5b2   :  { %6948 = vmatpush1.bf16.msra.mxu1 %v6148_v34 }
 0x5b3   :  { %6984 = vmatpush1.bf16.msra.mxu0 %v6148_v34  ;;  %6949 = vmatprep.subr.bf16.mxu1 %v7829_v60 }
 0x5b4   :  { %6985 = vmatprep.subr.bf16.mxu0 %v7829_v60 }
 0x5b6   :  { %6951 = vmatpush1.bf16.msra.mxu1 %v6149_v15 }
 0x5b7   :  { %6987 = vmatpush1.bf16.msra.mxu0 %v6149_v15  ;;  %6952 = vmatprep.subr.bf16.mxu1 %v7829_v60 }
 0x5b8   :  { %6988 = vmatprep.subr.bf16.mxu0 %v7829_v60 }
 0x5ba   :  { %6954 = vmatpush1.bf16.msra.mxu1 %v6150_v20 }
 0x5bb   :  { %6990 = vmatpush1.bf16.msra.mxu0 %v6150_v20  ;;  %6955 = vmatprep.subr.bf16.mxu1 %v7829_v60 }
 0x5bc   :  { %6991 = vmatprep.subr.bf16.mxu0 %v7829_v60 }
 0x5be   :  { %6957 = vmatpush1.bf16.msra.mxu1 %v6151_v27 }
 0x5bf   :  { %6993 = vmatpush1.bf16.msra.mxu0 %v6151_v27  ;;  %6958 = vmatprep.subr.bf16.mxu1 %v7829_v60 }
 0x5c0   :  { %6994 = vmatprep.subr.bf16.mxu0 %v7829_v60 }
 0x5c2   :  { %6960 = vmatpush1.bf16.msra.mxu1 %v6152_v31 }
 0x5c3   :  { %6996 = vmatpush1.bf16.msra.mxu0 %v6152_v31  ;;  %6961 = vmatprep.subr.bf16.mxu1 %v7829_v60 }
 0x5c4   :  { %6997 = vmatprep.subr.bf16.mxu0 %v7829_v60 }
 0x5c6   :  { %6963 = vmatpush1.bf16.msra.mxu1 %v6153_v57 }
 0x5c7   :  { %6999 = vmatpush1.bf16.msra.mxu0 %v6153_v57  ;;  %6964 = vmatprep.subr.bf16.mxu1 %v7829_v60 }
 0x5c8   :  { %7000 = vmatprep.subr.bf16.mxu0 %v7829_v60 }
 0x5ca   :  { %6966 = vmatpush1.bf16.msra.mxu1 %v6154_v49 }
 0x5cb   :  { %7002 = vmatpush1.bf16.msra.mxu0 %v6154_v49  ;;  %6967 = vmatprep.subr.bf16.mxu1 %v7829_v60 }
 0x5cc   :  { %7003 = vmatprep.subr.bf16.mxu0 %v7829_v60 }
 0x5ce   :  { %6969 = vmatpush1.bf16.msra.mxu1 %v6155_v42 }
 0x5cf   :  { %7005 = vmatpush1.bf16.msra.mxu0 %v6155_v42  ;;  %6970 = vmatprep.subr.bf16.mxu1 %v7829_v60 }
 0x5d0   :  { %7006 = vmatprep.subr.bf16.mxu0 %v7829_v60 }
 0x5d2   :  { %6972 = vmatpush1.bf16.msra.mxu1 %v6156_v18 }
 0x5d3   :  { %7008 = vmatpush1.bf16.msra.mxu0 %v6156_v18  ;;  %3815 = vmatprep.subr.mxu1 %v11700_v37 }
 0x5d4   :  { %3917 = vmatprep.subr.mxu0 %v11700_v37 }
 0x5d6   :  { %6072 = vmatpush1.msk.msra.mxu1 %vm1733_vm13, %v550_v41 }
 0x5d7   :  { %6075 = vmatpush1.msk.msra.mxu0 %vm1733_vm13, %v550_v41 }
 0x675   :  { %v10208_v17 = vpop.f32.mrb[10].mxu0 }
 0x676   :  { %3688 = vrot.lane.b32.xlu1 %v10208_v17, %s7838_s24  ;;  %v10212_v36 = vpop.f32.mrb[11].mxu0 }
 0x677   :  { %3690 = vrot.lane.b32.xlu0 %v10212_v36, %s7838_s24  ;;  %v10216_v33 = vpop.f32.mrb[8].mxu1 }
 0x678   :  { %v10218_v21 = vpop.f32.mrb[9].mxu1 }
 0x679   :  { %v10220_v35 = vpop.f32.mrb[12].mxu0 }
 0x67a   :  { %3718 = vrot.lane.b32.xlu1 %v10208_v17, %s7839_s28  ;;  %v10224_v56 = vpop.f32.mrb[13].mxu0 }
 0x67b   :  { %3720 = vrot.lane.b32.xlu0 %v10212_v36, %s7839_s28  ;;  %v10228_v6 = vpop.f32.mrb[10].mxu1 }
 0x67c   :  { %v10230_v28 = vpop.f32.mrb[11].mxu1 }
 0x67e   :  { %3648 = vrot.lane.b32.xlu1 %v10208_v17, %s11562_s21 }
 0x67f   :  { %3650 = vrot.lane.b32.xlu0 %v10212_v36, %s11562_s21 }
 0x682   :  { %3646 = vrot.lane.b32.xlu1 %v10218_v21, %s11562_s21 }
 0x683   :  { %3686 = vrot.lane.b32.xlu0 %v10218_v21, %s7838_s24 }
 0x686   :  { %3716 = vrot.lane.b32.xlu1 %v10218_v21, %s7839_s28 }
 0x687   :  { %3696 = vrot.lane.b32.xlu0 %v10220_v35, %s7838_s24 }
 0x68a   :  { %3698 = vrot.lane.b32.xlu1 %v10224_v56, %s7838_s24 }
 0x68b   :  { %3726 = vrot.lane.b32.xlu0 %v10220_v35, %s7839_s28 }
 0x68e   :  { %3728 = vrot.lane.b32.xlu1 %v10224_v56, %s7839_s28 }
 0x68f   :  { %3656 = vrot.lane.b32.xlu0 %v10220_v35, %s11562_s21 }
 0x692   :  { %3658 = vrot.lane.b32.xlu1 %v10224_v56, %s11562_s21 }
 0x693   :  { %3654 = vrot.lane.b32.xlu0 %v10230_v28, %s11562_s21 }
 0x696   :  { %3694 = vrot.lane.b32.xlu1 %v10230_v28, %s7838_s24 }
 0x697   :  { %3724 = vrot.lane.b32.xlu0 %v10230_v28, %s7839_s28 }
 0x6e8   :  { %v3689_v8 = vpop.permute.xlu1 %3688 }
 0x6e9   :  { %v3691_v22 = vpop.permute.xlu0 %3690 }
 0x6ea   :  { %v3702_v51 = vsel %vm3409_vm0, %v3689_v8, %v3691_v22 }
 0x6eb   :  { %v3712_v4 = vsel %vm3416_vm1, %v3702_v51, 0.0 }
 0x6ec   :  { %v3719_v38 = vpop.permute.xlu1 %3718 }
 0x6ed   :  { %v3721_v40 = vpop.permute.xlu0 %3720 }
 0x6ee   :  { %v3732_v14 = vsel %vm3446_vm3, %v3719_v38, %v3721_v40 }
 0x6ef   :  { %v3742_v1 = vsel %vm3453_vm2, %v3732_v14, 0.0 }
 0x6f0   :  { %v3649_v30 = vpop.permute.xlu1 %3648  ;;  %v3746_v55 = vmax.f32 %v3712_v4, %v3742_v1 }
 0x6f1   :  { %v3651_v50 = vpop.permute.xlu0 %3650 }
 0x6f2   :  { %v3662_v16 = vsel %vm1070_vm5, %v3649_v30, %v3651_v50  ;;  %v3674_v7 = vsel %vm11571_vm8, %v3651_v50, 0.0 }
 0x6f3   :  { %v3678_v62 = vmax.f32 %v10208_v17, %v3662_v16  ;;  %v3679_v23 = vmax.f32 %v10212_v36, %v3674_v7 }
 0x6f4   :  { %v10331_v45 = vpop.permute.xlu1 %3646 }
 0x6f5   :  { %v3752_v9 = vmax.f32 %v3678_v62, %v3746_v55  ;;  %v3753_v2 = vmax.f32 %v3679_v23, 0.0  ;;  %v10335_v11 = vpop.permute.xlu0 %3686  ;;  %v3661_v26 = vsel %vm1070_vm5, %v10331_v45, %v3649_v30 }
 0x6f6   :  { %v3701_v63 = vsel %vm3409_vm0, %v10335_v11, %v3689_v8  ;;  %v3677_v52 = vmax.f32 %v10218_v21, %v3661_v26 }
 0x6f7   :  { %3850 = vrot.lane.b32.xlu0 %v3753_v2, %s11566_s27  ;;  %3848 = vrot.lane.b32.xlu1 %v3752_v9, %s11566_s27 }
 0x6f8   :  { %v10341_v32 = vpop.permute.xlu1 %3716 }
 0x6f9   :  { %v3731_v43 = vsel %vm3446_vm3, %v10341_v32, %v3719_v38  ;;  %v3697_v48 = vpop.permute.xlu0 %3696 }
 0x6fa   :  { %v3745_v29 = vmax.f32 %v3701_v63, %v3731_v43 }
 0x6fc   :  { %v3751_v61 = vmax.f32 %v3677_v52, %v3745_v29  ;;  %v3699_v25 = vpop.permute.xlu1 %3698 }
 0x6fd   :  { %v3727_v46 = vpop.permute.xlu0 %3726  ;;  %v3705_v3 = vsel %vm3409_vm0, %v3697_v48, %v3699_v25 }
 0x6fe   :  { %3846 = vrot.lane.b32.xlu1 %v3751_v61, %s11566_s27  ;;  %6073 = vmatprep.mubr.msk.f32.mxu1 %vm183_vm12, %v3751_v61  ;;  %v3713_v24 = vsel %vm3416_vm1, %v3705_v3, 0.0  ;;  %vm3858_vm1 = vcmask 490496  }
 0x700   :  { %v3729_v39 = vpop.permute.xlu1 %3728 }
 0x701   :  { %v3735_v17 = vsel %vm3446_vm3, %v3727_v46, %v3729_v39  ;;  %v3657_v36 = vpop.permute.xlu0 %3656 }
 0x702   :  { %v3743_v12 = vsel %vm3453_vm2, %v3735_v17, 0.0  ;;  %vm4035_vm2 = vcmask 957440  }
 0x703   :  { %v3749_v54 = vmax.f32 %v3713_v24, %v3743_v12 }
 0x704   :  { %v3659_v21 = vpop.permute.xlu1 %3658 }
 0x705   :  { %v3665_v44 = vsel %vm1070_vm5, %v3657_v36, %v3659_v21  ;;  %v3675_v34 = vsel %vm11571_vm8, %v3659_v21, 0.0  ;;  %v3655_v15 = vpop.permute.xlu0 %3654  ;;  %v4144_v21 = vld [vmem:[%s11817_s0] sm:$0xff]  ;;  %vm5280_vm8 = vcmask 269312  }
 0x706   :  { %v3682_v20 = vmax.f32 %v10220_v35, %v3665_v44  ;;  %v3683_v27 = vmax.f32 %v10224_v56, %v3675_v34  ;;  %v3664_v49 = vsel %vm1070_vm5, %v3655_v15, %v3657_v36  ;;  %v3954_v56 = vld [vmem:[%s11816_s3] sm:$0xff]  ;;  %v4145_v34 = vld [vmem:[%s11817_s0 + $0x8] sm:$0xff] }
 0x707   :  { %v3681_v38 = vmax.f32 %v10230_v28, %v3664_v49  ;;  %v3955_v28 = vld [vmem:[%s11816_s3 + $0x8] sm:$0xff]  ;;  %v4147_v49 = vld [vmem:[%s11817_s0 + $0x18] sm:$0xff]  ;;  %s7845_s3 = smov 19  }
 0x708   :  { %v3756_v31 = vmax.f32 %v3682_v20, %v3749_v54  ;;  %v3757_v57 = vmax.f32 %v3683_v27, 0.0  ;;  %v3695_v42 = vpop.permute.xlu1 %3694  ;;  %v4160_v54 = vld [vmem:[%s11817_s0 + $0x80] sm:$0xff]  ;;  %v4163_v20 = vld [vmem:[%s11817_s0 + $0x98] sm:$0xff]  ;;  %v7011_v27 = vpack.c.bf16 %v4145_v34, %v4144_v21 }
 0x709   :  { %v3704_v8 = vsel %vm3409_vm0, %v3695_v42, %v3697_v48  ;;  %v3725_v22 = vpop.permute.xlu0 %3724  ;;  %v4180_v21 = vld [vmem:[%s11817_s0 + $0x120] sm:$0xff] }
 0x70a   :  { %v3734_v18 = vsel %vm3446_vm3, %v3725_v22, %v3727_v46  ;;  %3856 = vrot.lane.b32.xlu1 %v3757_v57, %s11566_s27  ;;  %3854 = vrot.lane.b32.xlu0 %v3756_v31, %s11566_s27  ;;  %v4146_v57 = vld [vmem:[%s11817_s0 + $0x10] sm:$0xff] }
 0x70b   :  { %v3748_v40 = vmax.f32 %v3704_v8, %v3734_v18  ;;  %v4165_v8 = vld [vmem:[%s11817_s0 + $0xa8] sm:$0xff]  ;;  %v7015_v18 = vpack.c.bf16 %v4147_v49, %v4146_v57  ;;  %v4156_v57 = vld [vmem:[%s11817_s0 + $0x60] sm:$0xff] }
 0x70c   :  { %v4157_v49 = vld [vmem:[%s11817_s0 + $0x68] sm:$0xff] }
 0x70d   :  { %v3755_v35 = vmax.f32 %v3681_v38, %v3748_v40 }
 0x70e   :  { %3644 = vrot.lane.b32.xlu1 %v10216_v33, %s11562_s21 }
 0x70f   :  { %3852 = vrot.lane.b32.xlu0 %v3755_v35, %s11566_s27  ;;  %s7869_s27 = smov 122  }
 0x712   :  { %3714 = vrot.lane.b32.xlu1 %v10216_v33, %s7839_s28 }
 0x713   :  { %3684 = vrot.lane.b32.xlu0 %v10216_v33, %s7838_s24 }
 0x716   :  { %3692 = vrot.lane.b32.xlu1 %v10228_v6, %s7838_s24  ;;  %s7841_s24 = smov 49  }
 0x717   :  { %3652 = vrot.lane.b32.xlu0 %v10228_v6, %s11562_s21  ;;  %s7853_s21 = smov 46  }
 0x71a   :  { %3958 = vperm.xlu1 %7588, %v3954_v56   ;;  %v4149_v56 = vld [vmem:[%s11817_s0 + $0x28] sm:$0xff] }
 0x71b   :  { %3722 = vrot.lane.b32.xlu0 %v10228_v6, %s7839_s28  ;;  %s7850_s28 = smov 57  }
 0x71e   :  { %3963 = vperm.xlu1 %7588, %v3955_v28   ;;  %v4166_v28 = vld [vmem:[%s11817_s0 + $0xb0] sm:$0xff] }
 0x769   :  { %v3851_v14 = vpop.permute.xlu0 %3850  ;;  %v3849_v51 = vpop.permute.xlu1 %3848 }
 0x76a   :  { %v3860_v1 = vsel %vm3858_vm1, %v3849_v51, %v3851_v14  ;;  %v4167_v14 = vld [vmem:[%s11817_s0 + $0xb8] sm:$0xff] }
 0x76b   :  { %6076 = vmatprep.mubr.msk.f32.mxu0 %vm183_vm12, %v3860_v1  ;;  %v7021_v1 = vpack.c.bf16 %v4167_v14, %v4166_v28 }
 0x770   :  { %v3847_v30 = vpop.permute.xlu1 %3846 }
 0x771   :  { %v3859_v50 = vsel %vm3858_vm1, %v3847_v30, %v3849_v51  ;;  %v4150_v30 = vld [vmem:[%s11817_s0 + $0x30] sm:$0xff] }
 0x772   :  { %3934 = vmatmul.mubr.f32.vlgmr.msra.gmra.mrb[14].mxu0 %v3859_v50  ;;  %v4151_v50 = vld [vmem:[%s11817_s0 + $0x38] sm:$0xff] }
 0x77c   :  { %v3855_v19 = vpop.permute.xlu0 %3854  ;;  %v3857_v4 = vpop.permute.xlu1 %3856 }
 0x77d   :  { %v3862_v16 = vsel %vm3858_vm1, %v3855_v19, %v3857_v4  ;;  %v4192_v4 = vld [vmem:[%s11817_s0 + $0x180] sm:$0xff] }
 0x77e   :  { %6077 = vmatprep.mubr.msk.f32.mxu0 %vm183_vm12, %v3862_v16  ;;  %v4193_v16 = vld [vmem:[%s11817_s0 + $0x188] sm:$0xff] }
 0x780   :  { %v3645_v7 = vpop.permute.xlu1 %3644 }
 0x781   :  { %v3853_v41 = vpop.permute.xlu0 %3852  ;;  %v3660_v62 = vsel %vm1070_vm5, %v3645_v7, %v10331_v45  ;;  %v4176_v7 = vld [vmem:[%s11817_s0 + $0x100] sm:$0xff] }
 0x782   :  { %v3861_v55 = vsel %vm3858_vm1, %v3853_v41, %v3855_v19  ;;  %v3676_v63 = vmax.f32 %v10216_v33, %v3660_v62  ;;  %v7023_v19 = vpack.c.bf16 %v4151_v50, %v4150_v30  ;;  %v7041_v41 = vpack.c.bf16 %v4193_v16, %v4192_v4  ;;  %v4168_v62 = vld [vmem:[%s11817_s0 + $0xc0] sm:$0xff]  ;;  %v4183_v30 = vld [vmem:[%s11817_s0 + $0x138] sm:$0xff]  ;;  %v4174_v50 = vld [vmem:[%s11817_s0 + $0xf0] sm:$0xff] }
 0x783   :  { %3939 = vmatmul.mubr.f32.gmra.mrb[16].mxu0 %v3861_v55  ;;  %v4177_v55 = vld [vmem:[%s11817_s0 + $0x108] sm:$0xff]  ;;  %v4158_v16 = vld [vmem:[%s11817_s0 + $0x70] sm:$0xff]  ;;  %vm4041_vm1 = vcmask 64512  }
 0x784   :  { %v3715_v23 = vpop.permute.xlu1 %3714  ;;  %7042 = vmatprep.subr.bf16.mxu0 %v7041_v41 }
 0x785   :  { %v3730_v9 = vsel %vm3446_vm3, %v3715_v23, %v10341_v32  ;;  %v3685_v2 = vpop.permute.xlu0 %3684  ;;  %v4169_v23 = vld [vmem:[%s11817_s0 + $0xc8] sm:$0xff] }
 0x786   :  { %v3700_v26 = vsel %vm3409_vm0, %v3685_v2, %v10335_v11  ;;  %v7025_v2 = vpack.c.bf16 %v4169_v23, %v4168_v62 }
 0x787   :  { %v3744_v43 = vmax.f32 %v3700_v26, %v3730_v9  ;;  %v7043_v9 = vpack.c.bf16 %v4177_v55, %v4176_v7  ;;  %v4152_v26 = vld [vmem:[%s11817_s0 + $0x40] sm:$0xff]  ;;  %v4159_v7 = vld [vmem:[%s11817_s0 + $0x78] sm:$0xff] }
 0x788   :  { %v3693_v29 = vpop.permute.xlu1 %3692  ;;  %v7039_v55 = vpack.c.bf16 %v4159_v7, %v4158_v16 }
 0x789   :  { %v3750_v48 = vmax.f32 %v3676_v63, %v3744_v43  ;;  %v3653_v52 = vpop.permute.xlu0 %3652  ;;  %v3703_v25 = vsel %vm3409_vm0, %v3693_v29, %v3695_v42  ;;  %v4164_v42 = vld [vmem:[%s11817_s0 + $0xa0] sm:$0xff]  ;;  %v4153_v63 = vld [vmem:[%s11817_s0 + $0x48] sm:$0xff]  ;;  %7044 = vmatpush3.bf16.msra.mxu0 %v7043_v9  ;;  %v4178_v29 = vld [vmem:[%s11817_s0 + $0x110] sm:$0xff]  ;;  %vm11569_vm0 = vcmask 801792  }
 0x78a   :  { %v3663_v61 = vsel %vm1070_vm5, %v3653_v52, %v3655_v15  ;;  %v4162_v15 = vld [vmem:[%s11817_s0 + $0x90] sm:$0xff]  ;;  %v7017_v40 = vpack.c.bf16 %v4165_v8, %v4164_v42  ;;  %v7027_v43 = vpack.c.bf16 %v4153_v63, %v4152_v26  ;;  %vm204_vm5 = vcmask 400384   ;;  %v4195_v52 = vld [vmem:[%s11817_s0 + $0x198] sm:$0xff]  ;;  %v4200_v9 = vld [vmem:[%s11817_s0 + $0x1c0] sm:$0xff] }
 0x78b   :  { %3832 = vmatmul.mubr.f32.vlgmr.msra.gmra.mrb[12].mxu1 %v3750_v48  ;;  %v3680_v46 = vmax.f32 %v10228_v6, %v3663_v61  ;;  %v4161_v6 = vld [vmem:[%s11817_s0 + $0x88] sm:$0xff]  ;;  %v7013_v31 = vpack.c.bf16 %v4163_v20, %v4162_v15  ;;  %v4194_v48 = vld [vmem:[%s11817_s0 + $0x190] sm:$0xff]  ;;  %v4172_v15 = vld [vmem:[%s11817_s0 + $0xe0] sm:$0xff] }
 0x78c   :  { %6074 = vmatprep.mubr.msk.f32.mxu1 %vm183_vm12, %v3755_v35  ;;  %v7009_v44 = vpack.c.bf16 %v4161_v6, %v4160_v54  ;;  %v4148_v35 = vld [vmem:[%s11817_s0 + $0x20] sm:$0xff]  ;;  %v7045_v61 = vpack.c.bf16 %v4195_v52, %v4194_v48  ;;  %v4197_v6 = vld [vmem:[%s11817_s0 + $0x1a8] sm:$0xff] }
 0x78d   :  { %v3723_v45 = vpop.permute.xlu0 %3722  ;;  %v7019_v51 = vpack.c.bf16 %v4149_v56, %v4148_v35  ;;  %v4196_v54 = vld [vmem:[%s11817_s0 + $0x1a0] sm:$0xff]  ;;  %v4173_v20 = vld [vmem:[%s11817_s0 + $0xe8] sm:$0xff]  ;;  %v4199_v35 = vld [vmem:[%s11817_s0 + $0x1b8] sm:$0xff] }
 0x78e   :  { %v3733_v32 = vsel %vm3446_vm3, %v3723_v45, %v3725_v22  ;;  %7010 = vmatprep.subr.bf16.mxu1 %v7009_v44  ;;  %v4179_v45 = vld [vmem:[%s11817_s0 + $0x118] sm:$0xff]  ;;  %7046 = vmatprep.subr.bf16.mxu0 %v7045_v61  ;;  %v7049_v34 = vpack.c.bf16 %v4197_v6, %v4196_v54  ;;  %v4182_v56 = vld [vmem:[%s11817_s0 + $0x130] sm:$0xff]  ;;  %v4184_v26 = vld [vmem:[%s11817_s0 + $0x140] sm:$0xff]  ;;  %vm4032_vm3 = vcmask 154624  }
 0x78f   :  { %v3747_v3 = vmax.f32 %v3703_v25, %v3733_v32  ;;  %7012 = vmatpush3.bf16.msra.mxu1 %v7011_v27  ;;  %v4170_v25 = vld [vmem:[%s11817_s0 + $0xd0] sm:$0xff]  ;;  %v4171_v32 = vld [vmem:[%s11817_s0 + $0xd8] sm:$0xff]  ;;  %v7055_v4 = vpack.c.bf16 %v4183_v30, %v4182_v56  ;;  %v4224_v48 = vld [vmem:[%s11817_s0 + $0x280] sm:$0xff] }
 0x790   :  { %7014 = vmatprep.subr.bf16.mxu1 %v7013_v31  ;;  %v7033_v31 = vpack.c.bf16 %v4173_v20, %v4172_v15  ;;  %v4225_v52 = vld [vmem:[%s11817_s0 + $0x288] sm:$0xff]  ;;  %v4188_v15 = vld [vmem:[%s11817_s0 + $0x160] sm:$0xff] }
 0x791   :  { %v3754_v11 = vmax.f32 %v3680_v46, %v3747_v3  ;;  %v7047_v3 = vpack.c.bf16 %v4179_v45, %v4178_v29  ;;  %v7073_v61 = vpack.c.bf16 %v4225_v52, %v4224_v48  ;;  %v4202_v45 = vld [vmem:[%s11817_s0 + $0x1d0] sm:$0xff]  ;;  %v4189_v20 = vld [vmem:[%s11817_s0 + $0x168] sm:$0xff] }
 0x793   :  { %3837 = vmatmul.mubr.f32.gmra.mrb[14].mxu1 %v3754_v11  ;;  %v7029_v11 = vpack.c.bf16 %v4171_v32, %v4170_v25  ;;  %7048 = vmatpush3.bf16.msra.mxu0 %v7047_v3  ;;  %v4203_v25 = vld [vmem:[%s11817_s0 + $0x1d8] sm:$0xff] }
 0x794   :  { %7016 = vmatpush3.bf16.msra.mxu1 %v7015_v18  ;;  %7050 = vmatprep.subr.bf16.mxu0 %v7049_v34 }
 0x795   :  { %7018 = vmatprep.subr.bf16.mxu1 %v7017_v40  ;;  %v4198_v40 = vld [vmem:[%s11817_s0 + $0x1b0] sm:$0xff] }
 0x798   :  { %7020 = vmatpush3.bf16.msra.mxu1 %v7019_v51 }
 0x799   :  { %7022 = vmatprep.subr.bf16.mxu1 %v7021_v1  ;;  %v7053_v1 = vpack.c.bf16 %v4199_v35, %v4198_v40  ;;  %v4190_v40 = vld [vmem:[%s11817_s0 + $0x170] sm:$0xff]  ;;  %v4191_v35 = vld [vmem:[%s11817_s0 + $0x178] sm:$0xff] }
 0x79c   :  { %7024 = vmatpush3.bf16.msra.mxu1 %v7023_v19  ;;  %v4175_v19 = vld [vmem:[%s11817_s0 + $0xf8] sm:$0xff] }
 0x79d   :  { %7026 = vmatprep.subr.bf16.mxu1 %v7025_v2  ;;  %v7037_v41 = vpack.c.bf16 %v4175_v19, %v4174_v50  ;;  %v4201_v2 = vld [vmem:[%s11817_s0 + $0x1c8] sm:$0xff] }
 0x79e   :  { %v7057_v63 = vpack.c.bf16 %v4201_v2, %v4200_v9 }
 0x7a0   :  { %7028 = vmatpush3.bf16.msra.mxu1 %v7027_v43  ;;  %v4185_v43 = vld [vmem:[%s11817_s0 + $0x148] sm:$0xff] }
 0x7a1   :  { %7030 = vmatprep.subr.bf16.mxu1 %v7029_v11  ;;  %v7059_v29 = vpack.c.bf16 %v4185_v43, %v4184_v26  ;;  %v7061_v11 = vpack.c.bf16 %v4203_v25, %v4202_v45 }
 0x845   :  { %v3935_v33 = vpop.f32.mrb[14].mxu0 }
 0x846   :  { %3946 = vrot.lane.b32.xlu0 %v3935_v33, %s7841_s24  ;;  %v3937_v39 = vpop.f32.mrb[15].mxu0  ;;  %v4154_v33 = vld [vmem:[%s11817_s0 + $0x50] sm:$0xff] }
 0x847   :  { %v4155_v39 = vld [vmem:[%s11817_s0 + $0x58] sm:$0xff] }
 0x856   :  { %v3940_v24 = vpop.f32.mrb[16].mxu0 }
 0x857   :  { %3948 = vrot.lane.b32.xlu0 %v3940_v24, %s7841_s24  ;;  %v3942_v17 = vpop.f32.mrb[17].mxu0  ;;  %v3959_v24 = vpop.permute.xlu1 %3958 }
 0x85e   :  { %v10399_v36 = vpop.f32.mrb[12].mxu1 }
 0x85f   :  { %v3835_v12 = vpop.f32.mrb[13].mxu1 }
 0x860   :  { %v7031_v12 = vpack.c.bf16 %v4155_v39, %v4154_v33  ;;  %v4186_v33 = vld [vmem:[%s11817_s0 + $0x150] sm:$0xff]  ;;  %v4187_v39 = vld [vmem:[%s11817_s0 + $0x158] sm:$0xff] }
 0x862   :  { %7032 = vmatpush3.bf16.msra.mxu1 %v7031_v12  ;;  %v4205_v12 = vld [vmem:[%s11817_s0 + $0x1e8] sm:$0xff] }
 0x863   :  { %7034 = vmatprep.subr.bf16.mxu1 %v7033_v31  ;;  %v7067_v31 = vpack.c.bf16 %v4189_v20, %v4188_v15 }
 0x866   :  { %v10431_v22 = vpop.f32.mrb[14].mxu1 }
 0x867   :  { %v3840_v38 = vpop.f32.mrb[15].mxu1 }
 0x868   :  { %v7035_v38 = vpack.c.bf16 %v4157_v49, %v4156_v57  ;;  %v4206_v57 = vld [vmem:[%s11817_s0 + $0x1f0] sm:$0xff] }
 0x86a   :  { %7036 = vmatpush3.bf16.msra.mxu1 %v7035_v38 }
 0x86b   :  { %7038 = vmatprep.subr.bf16.mxu1 %v7037_v41 }
 0x86e   :  { %7040 = vmatpush3.bf16.msra.mxu1 %v7039_v55 }
 0x86f   :  { %7074 = vmatprep.subr.bf16.mxu1 %v7073_v61 }
 0x8b8   :  { %v3947_v46 = vpop.permute.xlu0 %3946 }
 0x8b9   :  { %v3952_v17 = vsel %vm204_vm5, %v10399_v36, %v3947_v46  ;;  %v4181_v36 = vld [vmem:[%s11817_s0 + $0x128] sm:$0xff] }
 0x8ba   :  { %v10510_v44 = vadd.f32 %v3959_v24, %v3952_v17  ;;  %v7051_v27 = vpack.c.bf16 %v4181_v36, %v4180_v21  ;;  %v7063_v24 = vpack.c.bf16 %v4187_v39, %v4186_v33  ;;  %v4204_v17 = vld [vmem:[%s11817_s0 + $0x1e0] sm:$0xff]  ;;  %v3964_v21 = vpop.permute.xlu1 %3963 }
 0x8bb   :  { %v7065_v6 = vpack.c.bf16 %v4205_v12, %v4204_v17 }
 0x8bc   :  { %4056 = vrot.lane.b32.xlu0 %v10510_v44, %s7842_s23  ;;  %v3973_v42 = vrot.slane %v10510_v44, 2  ;;  %v3977_v8 = vrot.slane %v10510_v44, 3  ;;  %v3969_v18 = vrot.slane %v10510_v44, 1  ;;  %v3981_v51 = vrot.slane %v10510_v44, 4  ;;  %7052 = vmatpush3.bf16.msra.mxu0 %v7051_v27 }
 0x8bd   :  { %7054 = vmatprep.subr.bf16.mxu0 %v7053_v1  ;;  %v3985_v62 = vrot.slane %v10510_v44, 5  ;;  %v3989_v32 = vrot.slane %v10510_v44, 6  ;;  %v3993_v3 = vrot.slane %v10510_v44, 7 }
 0x8be   :  { %v7594_v28 = vpack.i.bf16 %v3973_v42, %v3977_v8  ;;  %v7589_v14 = vpack.i.bf16 %v3969_v18, %v3973_v42  ;;  %v7599_v23 = vpack.i.bf16 %v3977_v8, %v3981_v51 }
 0x8bf   :  { %v7604_v46 = vpack.i.bf16 %v3981_v51, %v3985_v62  ;;  %v7609_v36 = vpack.i.bf16 %v3989_v32, %v3993_v3 }
 0x8c0   :  { %7595 = vrot.lane.b32.xlu0 %v7594_v28, %s7843_s6  ;;  %7590 = vrot.lane.b32.xlu1 %v7589_v14, %s7841_s24  ;;  %s7846_s6 = smov 38   ;;  %v7071_v14 = vpack.c.bf16 %v4191_v35, %v4190_v40  ;;  %v4229_v40 = vld [vmem:[%s11817_s0 + $0x2a8] sm:$0xff] }
 0x8c1   :  { %7056 = vmatpush3.bf16.msra.mxu0 %v7055_v4 }
 0x8c2   :  { %7058 = vmatprep.subr.bf16.mxu0 %v7057_v63 }
 0x8c4   :  { %3986 = vrot.lane.b32.xlu0 %v3985_v62, %s7844_s29  ;;  %7600 = vrot.lane.b32.xlu1 %v7599_v23, %s7845_s3  ;;  %s7852_s3 = smov 76  }
 0x8c5   :  { %7060 = vmatpush3.bf16.msra.mxu0 %v7059_v29 }
 0x8c6   :  { %7062 = vmatprep.subr.bf16.mxu0 %v7061_v11 }
 0x8c8   :  { %4072 = vrot.lane.b32.xlu0 %v3989_v32, %s7844_s29  ;;  %7605 = vrot.lane.b32.xlu1 %v7604_v46, %s7833_s8  ;;  %s7847_s8 = smov 87   ;;  %s11825_s29 = smov 1  }
 0x8c9   :  { %v3949_v54 = vpop.permute.xlu0 %3948  ;;  %7064 = vmatpush3.bf16.msra.mxu0 %v7063_v24  ;;  %v4208_v24 = vld [vmem:[%s11817_s0 + $0x200] sm:$0xff] }
 0x8ca   :  { %v3953_v34 = vsel %vm204_vm5, %v10431_v22, %v3949_v54  ;;  %7066 = vmatprep.subr.bf16.mxu0 %v7065_v6  ;;  %v4207_v22 = vld [vmem:[%s11817_s0 + $0x1f8] sm:$0xff]  ;;  %v4226_v6 = vld [vmem:[%s11817_s0 + $0x290] sm:$0xff] }
 0x8cb   :  { %v3967_v27 = vadd.f32 %v3964_v21, %v3953_v34  ;;  %v7069_v28 = vpack.c.bf16 %v4207_v22, %v4206_v57  ;;  %v4227_v21 = vld [vmem:[%s11817_s0 + $0x298] sm:$0xff]  ;;  %v4210_v22 = vld [vmem:[%s11817_s0 + $0x210] sm:$0xff] }
 0x8cc   :  { %7610 = vrot.lane.b32.xlu1 %v7609_v36, %s7846_s6  ;;  %s7849_s6 = smov 106   ;;  %v7077_v57 = vpack.c.bf16 %v4227_v21, %v4226_v6 }
 0x8cd   :  { %v7614_v49 = vpack.i.bf16 %v3993_v3, %v3967_v27  ;;  %v4001_v42 = vrot.slane %v3967_v27, 1  ;;  %v4005_v8 = vrot.slane %v3967_v27, 2  ;;  %v4009_v38 = vrot.slane %v3967_v27, 3  ;;  %7068 = vmatpush3.bf16.msra.mxu0 %v7067_v31 }
 0x8ce   :  { %v4017_v1 = vrot.slane %v3967_v27, 5  ;;  %v4021_v30 = vrot.slane %v3967_v27, 6  ;;  %7070 = vmatprep.subr.bf16.mxu0 %v7069_v28  ;;  %v4013_v19 = vrot.slane %v3967_v27, 4  ;;  %v4025_v7 = vrot.slane %v3967_v27, 7 }
 0x8cf   :  { %7615 = vrot.lane.b32.xlu0 %v7614_v49, %s7847_s8  ;;  %v7619_v56 = vpack.i.bf16 %v3967_v27, %v4001_v42  ;;  %v7629_v51 = vpack.i.bf16 %v4005_v8, %v4009_v38  ;;  %v7624_v50 = vpack.i.bf16 %v4001_v42, %v4005_v8  ;;  %v4211_v49 = vld [vmem:[%s11817_s0 + $0x218] sm:$0xff] }
 0x8d0   :  { %v7639_v4 = vpack.i.bf16 %v4017_v1, %v4021_v30  ;;  %v7634_v16 = vpack.i.bf16 %v4013_v19, %v4017_v1  ;;  %v7644_v41 = vpack.i.bf16 %v4009_v38, %v4013_v19  ;;  %v4228_v38 = vld [vmem:[%s11817_s0 + $0x2a0] sm:$0xff] }
 0x8d1   :  { %7620 = vrot.lane.b32.xlu1 %v7619_v56, %s7848_s5  ;;  %7072 = vmatpush3.bf16.msra.mxu0 %v7071_v14  ;;  %v7079_v14 = vpack.c.bf16 %v4211_v49, %v4210_v22  ;;  %v4212_v1 = vld [vmem:[%s11817_s0 + $0x220] sm:$0xff]  ;;  %v4234_v49 = vld [vmem:[%s11817_s0 + $0x2d0] sm:$0xff] }
 0x8d2   :  { %7105 = vmatprep.subr.bf16.mxu0 %v7829_v60 }
 0x8d3   :  { %7630 = vrot.lane.b32.xlu0 %v7629_v51, %s7849_s6  ;;  %v7081_v51 = vpack.c.bf16 %v4229_v40, %v4228_v38  ;;  %s7857_s6 = smov 71  }
 0x8d5   :  { %7625 = vrot.lane.b32.xlu1 %v7624_v50, %s7850_s28  ;;  %s7859_s28 = smov 41  }
 0x8d7   :  { %7640 = vrot.lane.b32.xlu0 %v7639_v4, %s7851_s4  ;;  %s11823_s4 = sld [smem:[#allocation63_spill]] }
 0x8d9   :  { %7635 = vrot.lane.b32.xlu1 %v7634_v16, %s7852_s3  ;;  %v4230_v16 = vld [vmem:[%s11817_s0 + $0x2b0] sm:$0xff]  ;;  %s7863_s3 = smov 52  }
 0x8db   :  { %4099 = vrot.lane.b32.xlu0 %v4025_v7, %s7853_s21 }
 0x8dd   :  { %7645 = vrot.lane.b32.xlu1 %v7644_v41, %s11818_s30  ;;  %s7866_s30 = smov 33  }
 0x8df   :  { %4026 = vrot.lane.b32.xlu0 %v4025_v7, %s7854_s2  ;;  %v4231_v7 = vld [vmem:[%s11817_s0 + $0x2b8] sm:$0xff]  ;;  %s7867_s2 = smov 7  }
 0x8e1   :  { %4022 = vrot.lane.b32.xlu1 %v4021_v30, %s7853_s21  ;;  %v4213_v30 = vld [vmem:[%s11817_s0 + $0x228] sm:$0xff]  ;;  %s7864_s21 = smov 3  }
 0x92e   :  { %v4057_v55 = vpop.permute.xlu0 %4056 }
 0x92f   :  { %v4102_v29 = vsel %vm204_vm5, %v4057_v55, %v3969_v18  ;;  %v4209_v18 = vld [vmem:[%s11817_s0 + $0x208] sm:$0xff] }
 0x930   :  { %v7075_v27 = vpack.c.bf16 %v4209_v18, %v4208_v24 }
 0x932   :  { %v7596_v62 = vpop.permute.xlu0 %7595  ;;  %v7591_v23 = vpop.permute.xlu1 %7590 }
 0x933   :  { %v7592_v9 = vunpack.i.l.bf16 %v7591_v23  ;;  %v7597_v26 = vunpack.i.l.bf16 %v7596_v62  ;;  %v7593_v63 = vunpack.i.h.bf16 %v7591_v23  ;;  %v7598_v61 = vunpack.i.h.bf16 %v7596_v62  ;;  %v4214_v23 = vld [vmem:[%s11817_s0 + $0x230] sm:$0xff] }
 0x935   :  { %v4103_v45 = vsel %vm11569_vm0, %v4102_v29, %v7592_v9  ;;  %v4029_v32 = vsel %vm204_vm5, %v10510_v44, %v7593_v63  ;;  %v4104_v46 = vsel %vm4032_vm3, %v7592_v9, %v7597_v26  ;;  %v4215_v9 = vld [vmem:[%s11817_s0 + $0x238] sm:$0xff] }
 0x936   :  { %v7601_v2 = vpop.permute.xlu1 %7600  ;;  %v10623_v43 = vpop.permute.xlu0 %3986  ;;  %v4123_v17 = vrot.slane %v4103_v45, 7  ;;  %v4031_v20 = vsel %vm11569_vm0, %v4029_v32, %v7598_v61  ;;  %vm4045_vm0 = vcmask 867328   ;;  %v4240_v45 = vld [vmem:[%s11817_s0 + $0x300] sm:$0xff] }
 0x937   :  { %v7603_v48 = vunpack.i.h.bf16 %v7601_v2  ;;  %v7602_v52 = vunpack.i.l.bf16 %v7601_v2 }
 0x938   :  { %v4137_v8 = vsel %vm1691_vm7, %v4031_v20, %v4123_v17 }
 0x939   :  { %v4033_v33 = vsel %vm4032_vm3, %v7598_v61, %v7603_v48  ;;  %v4105_v39 = vsel %vm183_vm12, %v4104_v46, %v7602_v52  ;;  %vm4039_vm3 = vcmask 711680   ;;  %v7083_v48 = vpack.c.bf16 %v4213_v30, %v4212_v1  ;;  %v4236_v1 = vld [vmem:[%s11817_s0 + $0x2e0] sm:$0xff]  ;;  %v4237_v30 = vld [vmem:[%s11817_s0 + $0x2e8] sm:$0xff] }
 0x93a   :  { %v7606_v25 = vpop.permute.xlu1 %7605  ;;  %v4073_v12 = vpop.permute.xlu0 %4072  ;;  %v7085_v61 = vpack.c.bf16 %v4231_v7, %v4230_v16 }
 0x93b   :  { %v7608_v3 = vunpack.i.h.bf16 %v7606_v25  ;;  %v7607_v11 = vunpack.i.l.bf16 %v7606_v25  ;;  %v4241_v25 = vld [vmem:[%s11817_s0 + $0x308] sm:$0xff] }
 0x93c   :  { %v7106_v21 = vpack.c.bf16 %v4241_v25, %v4240_v45  ;;  %v4238_v25 = vld [vmem:[%s11817_s0 + $0x2f0] sm:$0xff] }
 0x93d   :  { %v4106_v54 = vsel %vm4035_vm2, %v4105_v39, %v7607_v11  ;;  %v4034_v44 = vsel %vm183_vm12, %v4033_v33, %v7608_v3  ;;  %vm4037_vm12 = vcmask 310272   ;;  %v4232_v33 = vld [vmem:[%s11817_s0 + $0x2c0] sm:$0xff]  ;;  %v4233_v39 = vld [vmem:[%s11817_s0 + $0x2c8] sm:$0xff] }
 0x93e   :  { %v7611_v34 = vpop.permute.xlu1 %7610  ;;  %v4036_v36 = vsel %vm4035_vm2, %v4034_v44, %v10623_v43  ;;  %v4124_v15 = vrot.slane %v4106_v54, 7  ;;  %v4107_v41 = vsel %vm4037_vm12, %v7607_v11, %v4073_v12  ;;  %vm4043_vm2 = vcmask 465920  }
 0x93f   :  { %v7612_v56 = vunpack.i.l.bf16 %v7611_v34  ;;  %v7613_v50 = vunpack.i.h.bf16 %v7611_v34  ;;  %v7087_v11 = vpack.c.bf16 %v4215_v9, %v4214_v23  ;;  %v7089_v20 = vpack.c.bf16 %v4233_v39, %v4232_v33 }
 0x940   :  { %v4138_v31 = vsel %vm1691_vm7, %v4036_v36, %v4124_v15  ;;  %v7097_v23 = vpack.c.bf16 %v4237_v30, %v4236_v1 }
 0x941   :  { %v7616_v42 = vpop.permute.xlu0 %7615  ;;  %4316 = vmatprep.mubr.f32.mxu1 %v4138_v31  ;;  %v4108_v2 = vsel %vm4039_vm3, %v4107_v41, %v7612_v56  ;;  %v4038_v32 = vsel %vm4037_vm12, %v10623_v43, %v7613_v50  ;;  %v4217_v31 = vld [vmem:[%s11817_s0 + $0x248] sm:$0xff]  ;;  %vm11819_vm12 = vmmov 0  }
 0x942   :  { %v7617_v35 = vunpack.i.l.bf16 %v7616_v42  ;;  %4317 = vmatmul.mubr.f32.vlgmr.msra.gmra.mrb[16].mxu1 %v4137_v8  ;;  %v7618_v26 = vunpack.i.h.bf16 %v7616_v42  ;;  %v4125_v24 = vrot.slane %v4108_v2, 7  ;;  %v4235_v42 = vld [vmem:[%s11817_s0 + $0x2d8] sm:$0xff] }
 0x943   :  { %7076 = vmatpush3.bf16.msra.mxu1 %v7075_v27  ;;  %v7621_v28 = vpop.permute.xlu1 %7620  ;;  %v4216_v27 = vld [vmem:[%s11817_s0 + $0x240] sm:$0xff] }
 0x944   :  { %7078 = vmatprep.subr.bf16.mxu1 %v7077_v57  ;;  %v7622_v19 = vunpack.i.l.bf16 %v7621_v28  ;;  %v4109_v55 = vsel %vm4041_vm1, %v7612_v56, %v7617_v35  ;;  %v7623_v62 = vunpack.i.h.bf16 %v7621_v28  ;;  %v4040_v12 = vsel %vm4039_vm3, %v4038_v32, %v7618_v26  ;;  %v4218_v56 = vld [vmem:[%s11817_s0 + $0x250] sm:$0xff]  ;;  %v4239_v32 = vld [vmem:[%s11817_s0 + $0x2f8] sm:$0xff] }
 0x945   :  { %v10669_v4 = vpop.permute.xlu0 %7630  ;;  %v4139_v38 = vsel %vm1691_vm7, %v4040_v12, %v4125_v24  ;;  %v7091_v35 = vpack.c.bf16 %v4217_v31, %v4216_v27  ;;  %vm4048_vm3 = vcmask 621568   ;;  %v7101_v24 = vpack.c.bf16 %v4239_v32, %v4238_v25 }
 0x946   :  { %v4110_v46 = vsel %vm4043_vm2, %v4109_v55, %v7622_v19  ;;  %v4042_v18 = vsel %vm4041_vm1, %v7618_v26, %v7623_v62  ;;  %v7633_v17 = vunpack.i.h.bf16 %v10669_v4  ;;  %v7632_v9 = vunpack.i.l.bf16 %v10669_v4 }
 0x947   :  { %7080 = vmatpush3.bf16.msra.mxu1 %v7079_v14  ;;  %v10686_v63 = vpop.permute.xlu1 %7625  ;;  %v7093_v14 = vpack.c.bf16 %v4235_v42, %v4234_v49  ;;  %v6078_v49 = vld [vmem:[%s11464_s7] ss:$0 sm:$0xff]  ;;  %s7862_s7 = smov 109  }
 0x948   :  { %v7628_v52 = vunpack.i.h.bf16 %v10686_v63  ;;  %v7627_v29 = vunpack.i.l.bf16 %v10686_v63  ;;  %7082 = vmatprep.subr.bf16.mxu1 %v7081_v51  ;;  %v4219_v51 = vld [vmem:[%s11817_s0 + $0x258] sm:$0xff]  ;;  %v4222_v63 = vld [vmem:[%s11817_s0 + $0x270] sm:$0xff] }
 0x949   :  { %v10699_v3 = vpop.permute.xlu0 %7640  ;;  %v7095_v62 = vpack.c.bf16 %v4219_v51, %v4218_v56 }
 0x94a   :  { %v4111_v43 = vsel %vm4045_vm0, %v4110_v46, %v7627_v29  ;;  %v4044_v44 = vsel %vm4043_vm2, %v4042_v18, %v7628_v52  ;;  %v7642_v34 = vunpack.i.l.bf16 %v10699_v3  ;;  %v7643_v16 = vunpack.i.h.bf16 %v10699_v3  ;;  %v4220_v52 = vld [vmem:[%s11817_s0 + $0x260] sm:$0xff] }
 0x94b   :  { %7084 = vmatpush3.bf16.msra.mxu1 %v7083_v48  ;;  %v10713_v54 = vpop.permute.xlu1 %7635  ;;  %v4126_v6 = vrot.slane %v4111_v43, 7  ;;  %v4046_v15 = vsel %vm4045_vm0, %v4044_v44, %v7633_v17  ;;  %vm4054_vm0 = vcmask 777216   ;;  %vm11820_vm2 = vcmask 130048  }
 0x94c   :  { %v7637_v36 = vunpack.i.l.bf16 %v10713_v54  ;;  %7086 = vmatprep.subr.bf16.mxu1 %v7085_v61  ;;  %v4221_v61 = vld [vmem:[%s11817_s0 + $0x268] sm:$0xff]  ;;  %v7638_v18 = vunpack.i.h.bf16 %v10713_v54 }
 0x94d   :  { %v4100_v57 = vpop.permute.xlu0 %4099  ;;  %v4140_v22 = vsel %vm1691_vm7, %v4046_v15, %v4126_v6  ;;  %v7099_v33 = vpack.c.bf16 %v4221_v61, %v4220_v52  ;;  %v4534_v54 = vld [vmem:[%s11823_s4 + $0x8] sm:$0xff]  ;;  %v4536_v15 = vld [vmem:[%s11823_s4 + $0x18] sm:$0xff]  ;;  %v4716_v52 = vld [vmem:[%s11468_s12] sm:$0xff] }
 0x94e   :  { %v4115_v8 = vsel %vm4052_vm6, %v7637_v36, %v7642_v34  ;;  %4386 = vmatprep.mubr.f32.mxu0 %v4140_v22  ;;  %v4129_v28 = vrot.slane %v4100_v57, 7  ;;  %v4535_v34 = vld [vmem:[%s11823_s4 + $0x10] sm:$0xff]  ;;  %v4717_v61 = vld [vmem:[%s11468_s12 + $0x8] sm:$0xff] }
 0x94f   :  { %7088 = vmatpush3.bf16.msra.mxu1 %v7087_v11  ;;  %v7646_v40 = vpop.permute.xlu1 %7645  ;;  %4387 = vmatmul.mubr.f32.vlgmr.msra.gmra.mrb[18].mxu0 %v4139_v38  ;;  %v4116_v50 = vsel %vm4054_vm0, %v4115_v8, %v4100_v57  ;;  %v7112_v27 = vpack.c.bf16 %v4536_v15, %v4535_v34  ;;  %v7115_v25 = vpack.c.bf16 %v4717_v61, %v4716_v52  ;;  %v4839_v15 = vld [vmem:[%s11469_s14 + $0x130] sm:$0xff]  ;;  %v4850_v61 = vld [vmem:[%s11469_s14 + $0x188] sm:$0xff] }
 0x950   :  { %7107 = vmatpush3.bf16.msra.mxu0 %v7106_v21  ;;  %7090 = vmatprep.subr.bf16.mxu1 %v7089_v20  ;;  %v7647_v41 = vunpack.i.l.bf16 %v7646_v40  ;;  %v4128_v2 = vrot.slane %v4116_v50, 7  ;;  %v7648_v26 = vunpack.i.h.bf16 %v7646_v40  ;;  %v4533_v21 = vld [vmem:[%s11823_s4] sm:$0xff]  ;;  %v4843_v52 = vld [vmem:[%s11469_s14 + $0x150] sm:$0xff]  ;;  %s11824_s4 = smov 60  }
 0x951   :  { %v4027_v19 = vpop.permute.xlu0 %4026  ;;  %6340 = vmatprep.mubr.msk.f32.mxu0 %vm11819_vm12, %v11700_v37  ;;  %7108 = vmatprep.subr.bf16.mxu0 %v7829_v60  ;;  %v4623_v20 = vld [vmem:[%s11463_s1] sm:$0x3]  ;;  %s7861_s1 = smov 22  }
 0x952   :  { %v4143_v7 = vsel %vm1691_vm7, %v4027_v19, %v4129_v28  ;;  %4625 = vrot.lane.b32.xlu1 %v4623_v20, %s7848_s5 }
 0x953   :  { %7092 = vmatpush3.bf16.msra.mxu1 %v7091_v35  ;;  %v4023_v55 = vpop.permute.xlu1 %4022  ;;  %6341 = vmatmul.mubr.msk.f32.vlgmr.msra.gmra.mrb[20].mxu0 %vm11820_vm2, %v4143_v7  ;;  %v6080_v7 = vld [vmem:[%s11466_s9] ss:$0 sm:$0xff]  ;;  %s11826_s9 = smov 127  }
 0x954   :  { %v4053_v48 = vsel %vm4052_vm6, %v7643_v16, %v4023_v55  ;;  %7094 = vmatprep.subr.bf16.mxu1 %v7093_v14  ;;  %6351 = vmatprep.mubr.msk.f32.mxu0 %vm11819_vm12, %v11700_v37  ;;  %vm11821_vm6 = vcmask 220160  }
 0x955   :  { %v4055_v45 = vsel %vm4054_vm0, %v4053_v48, %v4027_v19  ;;  %v4112_v46 = vsel %vm11821_vm6, %v7627_v29, %v7632_v9  ;;  %vm4050_vm0 = vcmask 1022976   ;;  %vm11822_vm2 = vmmov %vm11821_vm6  ;;  %v4223_v29 = vld [vmem:[%s11817_s0 + $0x278] sm:$0xff]  ;;  %vm4618_vm6 = vcmask 123904   ;;  %s7860_s0 = smov 90  }
 0x956   :  { %v4142_v3 = vsel %vm1691_vm7, %v4055_v45, %v4128_v2  ;;  %v4113_v11 = vsel %vm4048_vm3, %v4112_v46, %v7647_v41  ;;  %v4047_v39 = vsel %vm11822_vm2, %v7633_v17, %v7648_v26  ;;  %v7103_v12 = vpack.c.bf16 %v4223_v29, %v4222_v63  ;;  %v4718_v46 = vld [vmem:[%s11468_s12 + $0x10] sm:$0xff] }
 0x957   :  { %7096 = vmatpush3.bf16.msra.mxu1 %v7095_v62  ;;  %4456 = vmatprep.mubr.f32.mxu1 %v4142_v3  ;;  %v4114_v43 = vsel %vm4050_vm0, %v4113_v11, %v7637_v36  ;;  %v4049_v4 = vsel %vm4048_vm3, %v4047_v39, %v7638_v18  ;;  %v7109_v36 = vpack.c.bf16 %v4534_v54, %v4533_v21  ;;  %vm4544_vm3 = vcmask 261120   ;;  %v4719_v3 = vld [vmem:[%s11468_s12 + $0x18] sm:$0xff]  ;;  %v4809_v39 = vld [vmem:[%s11469_s14 + $0x40] sm:$0xff]  ;;  %v4811_v29 = vld [vmem:[%s11469_s14 + $0x50] sm:$0xff]  ;;  %s7868_s12 = smov 6  }
 0x958   :  { %7098 = vmatprep.subr.bf16.mxu1 %v7097_v23  ;;  %v4127_v17 = vrot.slane %v4114_v43, 7  ;;  %v4051_v44 = vsel %vm4050_vm0, %v4049_v4, %v7643_v16  ;;  %v4634_v16 = vld [vmem:[%s11465_s10] sm:$0xff]  ;;  %s7855_s10 = smov 120   ;;  %v7118_v11 = vpack.c.bf16 %v4719_v3, %v4718_v46  ;;  %v4803_v43 = vld [vmem:[%s11469_s14 + $0x10] sm:$0xff]  ;;  %v4824_v54 = vld [vmem:[%s11469_s14 + $0xb8] sm:$0xff]  ;;  %vm4894_vm0 = vcmask 523264  }
 0x959   :  { %7110 = vmatpush3.bf16.msra.mxu0 %v7109_v36  ;;  %v4817_v21 = vld [vmem:[%s11469_s14 + $0x80] sm:$0xff]  ;;  %v4832_v36 = vld [vmem:[%s11469_s14 + $0xf8] sm:$0xff]  ;;  %v4806_v3 = vld [vmem:[%s11469_s14 + $0x28] sm:$0xff]  ;;  %vm5200_vm2 = vcmask 244736  }
 0x95a   :  { %v4141_v6 = vsel %vm1691_vm7, %v4051_v44, %v4127_v17  ;;  %7111 = vmatprep.subr.bf16.mxu0 %v7829_v60  ;;  %v4818_v17 = vld [vmem:[%s11469_s14 + $0x88] sm:$0xff]  ;;  %v4825_v44 = vld [vmem:[%s11469_s14 + $0xc0] sm:$0xff]  ;;  %v7142_v34 = vpack.c.bf16 %v4824_v54, %v4817_v21  ;;  %v7144_v20 = vpack.c.bf16 %v4839_v15, %v4832_v36  ;;  %v4852_v46 = vld [vmem:[%s11469_s14 + $0x198] sm:$0xff] }
 0x95b   :  { %7100 = vmatpush3.bf16.msra.mxu1 %v7099_v33  ;;  %v4802_v33 = vld [vmem:[%s11469_s14 + $0x8] sm:$0xff] }
 0x95c   :  { %7102 = vmatprep.subr.bf16.mxu1 %v7101_v24  ;;  %v4804_v24 = vld [vmem:[%s11469_s14 + $0x18] sm:$0xff]  ;;  %v7120_v63 = vpack.c.bf16 %v4809_v39, %v4802_v33  ;;  %v4813_v33 = vld [vmem:[%s11469_s14 + $0x60] sm:$0xff] }
 0x95d   :  { %7113 = vmatpush3.bf16.msra.mxu0 %v7112_v27  ;;  %v7136_v18 = vpack.c.bf16 %v4811_v29, %v4804_v24  ;;  %v4831_v27 = vld [vmem:[%s11469_s14 + $0xf0] sm:$0xff]  ;;  %v7152_v39 = vpack.c.bf16 %v4813_v33, %v4806_v3  ;;  %v6084_v24 = vld [vmem:[%s11471_s13] ss:$0 sm:$0xff]  ;;  %v4812_v29 = vld [vmem:[%s11469_s14 + $0x58] sm:$0xff]  ;;  %s7858_s13 = smov 11  }
 0x95e   :  { %6354 = vmatprep.subr.mxu0 %v11700_v37 }
 0x95f   :  { %7104 = vmatpush3.bf16.msra.mxu1 %v7103_v12  ;;  %v4810_v12 = vld [vmem:[%s11469_s14 + $0x48] sm:$0xff] }
 0x960   :  { %v7138_v4 = vpack.c.bf16 %v4810_v12, %v4803_v43  ;;  %7137 = vmatprep.subr.bf16.mxu1 %v7136_v18  ;;  %v4807_v18 = vld [vmem:[%s11469_s14 + $0x30] sm:$0xff]  ;;  %v4814_v43 = vld [vmem:[%s11469_s14 + $0x68] sm:$0xff] }
 0x961   :  { %v7169_v54 = vpack.c.bf16 %v4814_v43, %v4807_v18 }
 0x962   :  { %4457 = vmatmul.mubr.f32.vlgmr.msra.gmra.mrb[18].mxu1 %v4141_v6  ;;  %v7140_v6 = vpack.c.bf16 %v4825_v44, %v4818_v17  ;;  %v4827_v17 = vld [vmem:[%s11469_s14 + $0xd0] sm:$0xff] }
 0x963   :  { %5033 = vmatprep.mubr.f32.mxu1 %v11700_v37  ;;  %7139 = vmatpush1.bf16.msra.mxu1 %v7138_v4  ;;  %v4820_v4 = vld [vmem:[%s11469_s14 + $0x98] sm:$0xff] }
 0x964   :  { %7141 = vmatprep.subr.bf16.mxu1 %v7140_v6  ;;  %v7156_v15 = vpack.c.bf16 %v4827_v17, %v4820_v4 }
 0x967   :  { %7143 = vmatpush1.bf16.msra.mxu1 %v7142_v34  ;;  %v4819_v34 = vld [vmem:[%s11469_s14 + $0x90] sm:$0xff] }
 0x968   :  { %7145 = vmatprep.subr.bf16.mxu1 %v7144_v20  ;;  %v4826_v20 = vld [vmem:[%s11469_s14 + $0xc8] sm:$0xff] }
 0x9c4   :  { %v4626_v2 = vpop.permute.xlu1 %4625 }
 0xa15   :  { %v6192_v31 = vpop.f32.mrb[16].mxu1 }
 0xa16   :  { %v6193_v57 = vpop.f32.mrb[17].mxu1 }
 0xa17   :  { %v6194_v22 = vadd.f32 %v6193_v57, %v6192_v31  ;;  %v4838_v31 = vld [vmem:[%s11469_s14 + $0x128] sm:$0xff] }
 0xa18   :  { %v7146_v57 = vpack.c.bf16 %v4838_v31, %v4831_v27  ;;  %v4821_v27 = vld [vmem:[%s11469_s14 + $0xa0] sm:$0xff]  ;;  %v4828_v31 = vld [vmem:[%s11469_s14 + $0xd8] sm:$0xff] }
 0xa19   :  { %v4319_v38 = vadd.f32 %v6194_v22, %v6078_v49  ;;  %v6082_v22 = vld [vmem:[%s11470_s11] ss:$0 sm:$0xff]  ;;  %s7865_s11 = smov 82  }
 0xa1a   :  { %7147 = vmatpush1.bf16.msra.mxu1 %v7146_v57  ;;  %v4801_v49 = vld [vmem:[%s11469_s14] sm:$0xff]  ;;  %v4834_v57 = vld [vmem:[%s11469_s14 + $0x108] sm:$0xff] }
 0xa22   :  { %v6227_v42 = vpop.f32.mrb[18].mxu0 }
 0xa23   :  { %v6228_v8 = vpop.f32.mrb[19].mxu0 }
 0xa24   :  { %v6229_v40 = vadd.f32 %v6228_v8, %v6227_v42  ;;  %v4808_v42 = vld [vmem:[%s11469_s14 + $0x38] sm:$0xff] }
 0xa26   :  { %v4389_v35 = vadd.f32 %v6229_v40, %v4319_v38  ;;  %v4528_v56 = vpop.f32.mrb[20].mxu0  ;;  %v4816_v38 = vld [vmem:[%s11469_s14 + $0x78] sm:$0xff]  ;;  %v4823_v40 = vld [vmem:[%s11469_s14 + $0xb0] sm:$0xff] }
 0xa27   :  { %v6342_v28 = vpop.f32.mrb[21].mxu0 }
 0xa28   :  { %v7122_v28 = vpack.c.bf16 %v4808_v42, %v4801_v49  ;;  %v7158_v49 = vpack.c.bf16 %v4826_v20, %v4819_v34  ;;  %v7172_v42 = vpack.c.bf16 %v4828_v31, %v4821_v27 }
 0xa35   :  { %v6262_v14 = vpop.f32.mrb[18].mxu1 }
 0xa36   :  { %v6263_v51 = vpop.f32.mrb[19].mxu1 }
 0xa37   :  { %v6264_v1 = vadd.f32 %v6263_v51, %v6262_v14  ;;  %v7124_v51 = vpack.c.bf16 %v4823_v40, %v4816_v38  ;;  %v4840_v40 = vld [vmem:[%s11469_s14 + $0x138] sm:$0xff] }
 0xa39   :  { %v4459_v30 = vadd.f32 %v6264_v1, %v4389_v35  ;;  %v4815_v1 = vld [vmem:[%s11469_s14 + $0x70] sm:$0xff] }
 0xa3b   :  { %v4529_v50 = vadd.f32 %v4528_v56, %v4459_v30  ;;  %v4822_v30 = vld [vmem:[%s11469_s14 + $0xa8] sm:$0xff] }
 0xa3d   :  { %v4532_v19 = vmax.f32 %v4529_v50, 0.0  ;;  %v4830_v50 = vld [vmem:[%s11469_s14 + $0xe8] sm:$0xff] }
 0xa3f   :  { %6352 = vmatmul.mubr.msk.f32.vlgmr.msra.gmra.mrb[22].mxu0 %vm4544_vm3, %v4532_v19  ;;  %v4837_v19 = vld [vmem:[%s11469_s14 + $0x120] sm:$0xff] }
 0xa40   :  { %6356 = vmatprep.mubr.msk.f32.mxu0 %vm11819_vm12, %v11700_v37  ;;  %6355 = vmatpush3.msra.mxu0 %v4634_v16  ;;  %v7126_v16 = vpack.c.bf16 %v4822_v30, %v4815_v1  ;;  %v4847_v30 = vld [vmem:[%s11469_s14 + $0x170] sm:$0xff] }
 0xa41   :  { %7114 = vmatprep.subr.bf16.mxu0 %v7829_v60 }
 0xb12   :  { %v4614_v41 = vpop.f32.mrb[22].mxu0 }
 0xb13   :  { %v4615_v55 = vadd.f32 %v6080_v7, %v4614_v41  ;;  %v6353_v62 = vpop.f32.mrb[23].mxu0  ;;  %v7128_v7 = vpack.c.bf16 %v4837_v19, %v4830_v50  ;;  %v4829_v41 = vld [vmem:[%s11469_s14 + $0xe0] sm:$0xff]  ;;  %v4854_v19 = vld [vmem:[%s11469_s14 + $0x1a8] sm:$0xff] }
 0xb15   :  { %4619 = vst.msk [vmem:[%s11467_s25] sm:$0x3] %vm4618_vm6, %v4615_v55  ;;  %v4620_v23 = vmul.f32 0.5, %v4615_v55  ;;  %vm5232_vm6 = vcmask 334848   ;;  %s7870_s25 = smov 121  }
 0xb17   :  { %v4621_v9 = vmul.f32 1.442695, %v4620_v23  ;;  %v4844_v23 = vld [vmem:[%s11469_s14 + $0x158] sm:$0xff] }
 0xb19   :  { %7799 = vpow2.f32 %v4621_v9  ;;  %v4851_v9 = vld [vmem:[%s11469_s14 + $0x190] sm:$0xff] }
 0xb23   :  { %v7800_v26 = vpop.eup %7799 }
 0xb24   :  { %v4628_v48 = vmul.f32 %v7800_v26, %v4626_v2  ;;  %v4846_v2 = vld [vmem:[%s11469_s14 + $0x168] sm:$0xff]  ;;  %v7132_v26 = vpack.c.bf16 %v4851_v9, %v4844_v23 }
 0xb26   :  { %4630 = vrot.lane.b32.xlu0 %v4628_v48, %s7855_s10  ;;  %v4853_v48 = vld [vmem:[%s11469_s14 + $0x1a0] sm:$0xff] }
 0xb98   :  { %v4631_v45 = vpop.permute.xlu0 %4630 }
 0xb99   :  { %v4633_v32 = vadd.f32 %v4631_v45, %v4615_v55  ;;  %v4836_v55 = vld [vmem:[%s11469_s14 + $0x118] sm:$0xff]  ;;  %v7148_v45 = vpack.c.bf16 %v4853_v48, %v4846_v2 }
 0xb9a   :  { %v7130_v62 = vpack.c.bf16 %v4836_v55, %v4829_v41  ;;  %v7166_v41 = vpack.c.bf16 %v4854_v19, %v4847_v30 }
 0xb9b   :  { %6357 = vmatmul.mubr.msk.f32.vlgmr.msra.gmra.mrb[24].mxu0 %vm4041_vm1, %v4633_v32  ;;  %v4845_v32 = vld [vmem:[%s11469_s14 + $0x160] sm:$0xff]  ;;  %7149 = vmatprep.subr.bf16.mxu1 %v7148_v45 }
 0xb9c   :  { %7116 = vmatpush3.bf16.msra.mxu0 %v7115_v25  ;;  %6367 = vmatprep.mubr.msk.f32.mxu0 %vm11819_vm12, %v11700_v37  ;;  %v7134_v25 = vpack.c.bf16 %v4850_v61, %v4843_v52 }
 0xb9d   :  { %7117 = vmatprep.subr.bf16.mxu0 %v7829_v60 }
 0xba0   :  { %7119 = vmatpush3.bf16.msra.mxu0 %v7118_v11  ;;  %v7150_v11 = vpack.c.bf16 %v4852_v46, %v4845_v32 }
 0xba1   :  { %7121 = vmatprep.subr.bf16.mxu0 %v7120_v63  ;;  %v4805_v63 = vld [vmem:[%s11469_s14 + $0x20] sm:$0xff] }
 0xba2   :  { %7151 = vmatpush1.bf16.msra.mxu1 %v7150_v11  ;;  %v7154_v21 = vpack.c.bf16 %v4812_v29, %v4805_v63 }
 0xba3   :  { %7168 = vmatprep.subr.bf16.mxu1 %v7829_v60 }
 0xc6e   :  { %v4711_v8 = vpop.f32.mrb[24].mxu0 }
 0xc6f   :  { %v4712_v35 = vadd.f32 %v6082_v22, %v4711_v8  ;;  %v6358_v56 = vpop.f32.mrb[25].mxu0  ;;  %v4841_v22 = vld [vmem:[%s11469_s14 + $0x140] sm:$0xff] }
 0xc70   :  { %v4833_v8 = vld [vmem:[%s11469_s14 + $0x100] sm:$0xff]  ;;  %v7160_v38 = vpack.c.bf16 %v4841_v22, %v4834_v57  ;;  %v4842_v56 = vld [vmem:[%s11469_s14 + $0x148] sm:$0xff] }
 0xc71   :  { %v4715_v14 = vmax.f32 %v4712_v35, 0.0  ;;  %v4835_v35 = vld [vmem:[%s11469_s14 + $0x110] sm:$0xff] }
 0xc72   :  { %v7175_v1 = vpack.c.bf16 %v4842_v56, %v4835_v35 }
 0xc73   :  { %6368 = vmatmul.mubr.msk.f32.vlgmr.msra.gmra.mrb[26].mxu0 %vm4544_vm3, %v4715_v14  ;;  %v4855_v14 = vld [vmem:[%s11469_s14 + $0x1b0] sm:$0xff]  ;;  %vm5218_vm3 = vcmask 89088  }
 0xc74   :  { %7123 = vmatpush1.bf16.msra.mxu0 %v7122_v28  ;;  %4962 = vmatprep.mubr.f32.mxu0 %v11700_v37  ;;  %v4848_v28 = vld [vmem:[%s11469_s14 + $0x178] sm:$0xff] }
 0xc75   :  { %7125 = vmatprep.subr.bf16.mxu0 %v7124_v51  ;;  %v7162_v51 = vpack.c.bf16 %v4840_v40, %v4833_v8  ;;  %v7164_v50 = vpack.c.bf16 %v4855_v14, %v4848_v28 }
 0xc78   :  { %7127 = vmatpush1.bf16.msra.mxu0 %v7126_v16  ;;  %v4849_v16 = vld [vmem:[%s11469_s14 + $0x180] sm:$0xff] }
 0xc79   :  { %7129 = vmatprep.subr.bf16.mxu0 %v7128_v7  ;;  %v4856_v7 = vld [vmem:[%s11469_s14 + $0x1b8] sm:$0xff] }
 0xc7a   :  { %v7178_v55 = vpack.c.bf16 %v4856_v7, %v4849_v16 }
 0xc7c   :  { %7131 = vmatpush1.bf16.msra.mxu0 %v7130_v62  ;;  %v11039_v62 = vld [vmem:[%s11472_s15] sm:$0x7f]  ;;  %s7856_s15 = smov 30  }
 0xc7d   :  { %7133 = vmatprep.subr.bf16.mxu0 %v7132_v26  ;;  %v4862_v23 = vrot.slane %v11039_v62, %v11750_v10  ;;  %v4870_v9 = vrot.slane %v11039_v62, %v11778_v47  ;;  %v4874_v2 = vrot.slane %v11039_v62, %v11779_v53  ;;  %v4866_v46 = vrot.slane %v11039_v62, %v11764_v59 }
 0xc7e   :  { %v4878_v43 = vrot.slane %v11039_v62, %v11791_v58  ;;  %v4882_v27 = vrot.slane %v11039_v62, %v11811_v5  ;;  %v4886_v8 = vrot.slane %v11039_v62, %v11743_v0 }
 0xc80   :  { %7135 = vmatpush1.bf16.msra.mxu0 %v7134_v25 }
 0xc81   :  { %7153 = vmatprep.subr.bf16.mxu0 %v7152_v39 }
 0xd46   :  { %v4796_v12 = vpop.f32.mrb[26].mxu0 }
 0xd47   :  { %v4797_v44 = vadd.f32 %v6084_v24, %v4796_v12  ;;  %v6369_v6 = vpop.f32.mrb[27].mxu0 }
 0xd49   :  { %v4800_v36 = vmax.f32 %v4797_v44, 0.0 }
 0xd4b   :  { %6086 = vmatmul.mubr.msk.f32.vlgmr.msra.gmra.mrb[28].mxu0 %vm4894_vm0, %v4800_v36  ;;  %6087 = vmatmul.mubr.msk.f32.vlgmr.msra.gmra.mrb[20].mxu1 %vm4894_vm0, %v4800_v36 }
 0xd4c   :  { %7155 = vmatpush1.bf16.msra.mxu0 %v7154_v21  ;;  %7170 = vmatpush3.bf16.msra.mxu1 %v7169_v54 }
 0xd4d   :  { %7157 = vmatprep.subr.bf16.mxu0 %v7156_v15  ;;  %7171 = vmatprep.subr.bf16.mxu1 %v7829_v60 }
 0xd4e   :  { %5104 = vmatprep.mubr.f32.mxu0 %v11700_v37  ;;  %6386 = vmatprep.mubr.msk.f32.mxu1 %vm11819_vm12, %v11700_v37 }
 0xd50   :  { %7159 = vmatpush1.bf16.msra.mxu0 %v7158_v49  ;;  %7173 = vmatpush3.bf16.msra.mxu1 %v7172_v42 }
 0xd51   :  { %7161 = vmatprep.subr.bf16.mxu0 %v7160_v38  ;;  %7174 = vmatprep.subr.bf16.mxu1 %v7829_v60 }
 0xd54   :  { %7163 = vmatpush1.bf16.msra.mxu0 %v7162_v51  ;;  %7176 = vmatpush3.bf16.msra.mxu1 %v7175_v1 }
 0xd55   :  { %7165 = vmatprep.subr.bf16.mxu0 %v7164_v50  ;;  %7177 = vmatprep.subr.bf16.mxu1 %v7829_v60 }
 0xd58   :  { %7167 = vmatpush1.bf16.msra.mxu0 %v7166_v41  ;;  %7179 = vmatpush3.bf16.msra.mxu1 %v7178_v55 }
 0xd59   :  { %7180 = vmatprep.subr.bf16.mxu0 %v7829_v60  ;;  %7207 = vmatprep.subr.bf16.mxu1 %v7829_v60 }
 0xd5b   :  { %6088 = vmatmul.mubr.msk.f32.vlgmr.msra.gmra.mrb[30].mxu0 %vm4894_vm0, %v4800_v36  ;;  %6387 = vmatmul.mubr.msk.f32.vlgmr.msra.gmra.mrb[22].mxu1 %vm4894_vm0, %v4800_v36  ;;  %vm5249_vm0 = vcmask 179200  }
 0xd5c   :  { %6407 = vmatprep.mubr.msk.f32.mxu1 %vm11819_vm12, %v11700_v37 }
 0xe1e   :  { %v4964_v26 = vpop.f32.mrb[28].mxu0  ;;  %v5035_v48 = vpop.f32.mrb[20].mxu1 }
 0xe1f   :  { %v4965_v52 = vadd.f32 %v4964_v26, %v4862_v23  ;;  %v5036_v61 = vadd.f32 %v5035_v48, %v4870_v9  ;;  %v4966_v45 = vpop.f32.mrb[29].mxu0  ;;  %v5037_v25 = vpop.f32.mrb[21].mxu1 }
 0xe20   :  { %v5038_v3 = vadd.f32 %v5037_v25, %v4874_v2  ;;  %v4967_v39 = vadd.f32 %v4966_v45, %v4866_v46 }
 0xe21   :  { %v11047_v32 = vmax.f32 %v4965_v52, 0.0  ;;  %v11051_v11 = vmax.f32 %v5036_v61, 0.0 }
 0xe22   :  { %v11056_v24 = vmax.f32 %v5038_v3, 0.0  ;;  %v11064_v29 = vmax.f32 %v4967_v39, 0.0 }
 0xe23   :  { %5299 = vrot.lane.b32.xlu1 %v11047_v32, %s7842_s23  ;;  %v5189_v33 = vrot.slane %v11047_v32, 7  ;;  %v5315_v63 = vrot.slane %v11051_v11, 4  ;;  %v5221_v18 = vrot.slane %v11051_v11, 2  ;;  %v5213_v12 = vrot.slane %v11051_v11, 3 }
 0xe24   :  { %v5302_v4 = vrot.slane %v11064_v29, 7  ;;  %v5227_v34 = vrot.slane %v11056_v24, 1  ;;  %v5207_v15 = vrot.slane %v11064_v29, 4  ;;  %v5238_v20 = vrot.slane %v11056_v24, 7 }
 0xe25   :  { %5303 = vrot.lane.b32.xlu0 %v5189_v33, %s7856_s15  ;;  %v5195_v57 = vrot.slane %v11064_v29, 6  ;;  %v5203_v42 = vrot.slane %v11064_v29, 5  ;;  %v5325_v35 = vrot.slane %v11056_v24, 2  ;;  %v5194_v19 = vrot.slane %v11047_v32, 6 }
 0xe26   :  { %v5243_v16 = vrot.slane %v11056_v24, 6  ;;  %v5212_v7 = vrot.slane %v11064_v29, 3  ;;  %v5226_v55 = vrot.slane %v11051_v11, 1 }
 0xe27   :  { %5335 = vrot.lane.b32.xlu1 %v11056_v24, %s7857_s6 }
 0xe29   :  { %5318 = vrot.lane.b32.xlu0 %v5315_v63, %s7858_s13 }
 0xe2b   :  { %5326 = vrot.lane.b32.xlu1 %v5221_v18, %s7859_s28 }
 0xe2d   :  { %5322 = vrot.lane.b32.xlu0 %v5213_v12, %s7860_s0 }
 0xe2e   :  { %v5106_v17 = vpop.f32.mrb[30].mxu0  ;;  %v5177_v44 = vpop.f32.mrb[22].mxu1 }
 0xe2f   :  { %v5107_v6 = vadd.f32 %v5106_v17, %v4878_v43  ;;  %v5108_v21 = vpop.f32.mrb[31].mxu0  ;;  %v6388_v54 = vpop.f32.mrb[23].mxu1  ;;  %5305 = vrot.lane.b32.xlu1 %v5302_v4, %s7856_s15  ;;  %v5178_v56 = vadd.f32 %v5177_v44, %v4886_v8 }
 0xe30   :  { %v5109_v22 = vadd.f32 %v5108_v21, %v4882_v27 }
 0xe31   :  { %v5185_v36 = vmax.f32 %v5107_v6, 0.0  ;;  %5332 = vrot.lane.b32.xlu0 %v5227_v34, %s7855_s10  ;;  %v5187_v51 = vmax.f32 %v5178_v56, 0.0 }
 0xe32   :  { %v5186_v38 = vmax.f32 %v5109_v22, 0.0 }
 0xe33   :  { %5316 = vrot.lane.b32.xlu1 %v5207_v15, %s7858_s13  ;;  %v5338_v31 = vrot.slane %v5185_v36, 7  ;;  %v5244_v49 = vrot.slane %v5185_v36, 6  ;;  %v5252_v40 = vrot.slane %v5185_v36, 5  ;;  %v5256_v14 = vrot.slane %v5185_v36, 4 }
 0xe34   :  { %v5351_v28 = vrot.slane %v5186_v38, 4  ;;  %v5262_v1 = vrot.slane %v5186_v38, 3  ;;  %v5269_v30 = vrot.slane %v5186_v38, 2  ;;  %v5361_v50 = vrot.slane %v5187_v51, 2 }
 0xe35   :  { %5339 = vrot.lane.b32.xlu0 %v5238_v20, %s7861_s1  ;;  %v5261_v41 = vrot.slane %v5185_v36, 3  ;;  %v5275_v62 = vrot.slane %v5187_v51, 1  ;;  %v5274_v23 = vrot.slane %v5186_v38, 1 }
 0xe37   :  { %5341 = vrot.lane.b32.xlu1 %v5338_v31, %s7861_s1 }
 0xe39   :  { %5309 = vrot.lane.b32.xlu0 %v5195_v57, %s7862_s7 }
 0xe3b   :  { %5345 = vrot.lane.b32.xlu1 %v5244_v49, %s11622_s20 }
 0xe3d   :  { %5312 = vrot.lane.b32.xlu0 %v5203_v42, %s11824_s4 }
 0xe3f   :  { %5348 = vrot.lane.b32.xlu1 %v5252_v40, %s7863_s3 }
 0xe41   :  { %5328 = vrot.lane.b32.xlu0 %v5325_v35, %s7859_s28 }
 0xe43   :  { %5354 = vrot.lane.b32.xlu1 %v5351_v28, %s7864_s21 }
 0xe45   :  { %5352 = vrot.lane.b32.xlu0 %v5256_v14, %s7864_s21 }
 0xe47   :  { %5358 = vrot.lane.b32.xlu1 %v5262_v1, %s7865_s11 }
 0xe49   :  { %5362 = vrot.lane.b32.xlu0 %v5269_v30, %s7866_s30 }
 0xe4b   :  { %5364 = vrot.lane.b32.xlu1 %v5361_v50, %s7866_s30 }
 0xe4d   :  { %5190 = vrot.lane.b32.xlu0 %v5189_v33, %s7842_s23  ;;  %v5297_v33 = vrot.slane %v11047_v32, 1 }
 0xe4f   :  { %5196 = vrot.lane.b32.xlu1 %v5194_v19, %s7856_s15 }
 0xe51   :  { %5198 = vrot.lane.b32.xlu0 %v5195_v57, %s7856_s15  ;;  %v194_v57 = vld [vmem:[%s11473_s22] sm:$0xff] }
 0xe53   :  { %5235 = vrot.lane.b32.xlu1 %v11056_v24, %s7855_s10 }
 0xe55   :  { %5239 = vrot.lane.b32.xlu0 %v5238_v20, %s7857_s6 }
 0xe57   :  { %5245 = vrot.lane.b32.xlu1 %v5243_v16, %s7861_s1 }
 0xe59   :  { %5247 = vrot.lane.b32.xlu0 %v5244_v49, %s7861_s1 }
 0xe5b   :  { %5204 = vrot.lane.b32.xlu1 %v5203_v42, %s7862_s7 }
 0xe5d   :  { %5253 = vrot.lane.b32.xlu0 %v5252_v40, %s11622_s20 }
 0xe5f   :  { %5208 = vrot.lane.b32.xlu1 %v5207_v15, %s11824_s4 }
 0xe61   :  { %5214 = vrot.lane.b32.xlu0 %v5212_v7, %s7858_s13 }
 0xe63   :  { %5216 = vrot.lane.b32.xlu1 %v5213_v12, %s7858_s13 }
 0xe65   :  { %5257 = vrot.lane.b32.xlu0 %v5256_v14, %s7863_s3 }
 0xe67   :  { %5263 = vrot.lane.b32.xlu1 %v5261_v41, %s7864_s21 }
 0xe69   :  { %5228 = vrot.lane.b32.xlu0 %v5226_v55, %s7859_s28 }
 0xe6b   :  { %5222 = vrot.lane.b32.xlu1 %v5221_v18, %s7860_s0 }
 0xe6d   :  { %5278 = vrot.lane.b32.xlu0 %v5275_v62, %s7866_s30 }
 0xe6f   :  { %5230 = vrot.lane.b32.xlu1 %v5227_v34, %s7859_s28 }
 0xe71   :  { %5265 = vrot.lane.b32.xlu0 %v5262_v1, %s7864_s21 }
 0xe73   :  { %5276 = vrot.lane.b32.xlu1 %v5274_v23, %s7866_s30 }
 0xe75   :  { %5270 = vrot.lane.b32.xlu0 %v5269_v30, %s7865_s11 }
 0xe95   :  { %v5300_v9 = vpop.permute.xlu1 %5299 }
 0xe96   :  { %v5368_v63 = vsel %vm1691_vm7, %v5297_v33, %v5300_v9 }
 0xe97   :  { %v5304_v2 = vpop.permute.xlu0 %5303 }
 0xe99   :  { %v5336_v26 = vpop.permute.xlu1 %5335 }
 0xe9b   :  { %v5319_v48 = vpop.permute.xlu0 %5318 }
 0xe9d   :  { %v5327_v52 = vpop.permute.xlu1 %5326 }
 0xe9f   :  { %v5323_v61 = vpop.permute.xlu0 %5322 }
 0xea1   :  { %v5306_v45 = vpop.permute.xlu1 %5305 }
 0xea2   :  { %v5307_v39 = vsel %vm5200_vm2, %v5304_v2, %v5306_v45 }
 0xea3   :  { %v5333_v25 = vpop.permute.xlu0 %5332  ;;  %v5369_v18 = vsel %vm1705_vm9, %v5368_v63, %v5307_v39 }
 0xea4   :  { %v5375_v27 = vsel %vm1691_vm7, %v5333_v25, %v5336_v26 }
 0xea5   :  { %v5317_v46 = vpop.permute.xlu1 %5316 }
 0xea6   :  { %v5320_v4 = vsel %vm5218_vm3, %v5317_v46, %v5319_v48 }
 0xea7   :  { %v5340_v3 = vpop.permute.xlu0 %5339 }
 0xea9   :  { %v5342_v11 = vpop.permute.xlu1 %5341 }
 0xeaa   :  { %v5343_v36 = vsel %vm5249_vm0, %v5340_v3, %v5342_v11 }
 0xeab   :  { %v5310_v24 = vpop.permute.xlu0 %5309  ;;  %v5376_v22 = vsel %vm1705_vm9, %v5375_v27, %v5343_v36 }
 0xeac   :  { %v5370_v43 = vsel %vm1719_vm10, %v5369_v18, %v5310_v24 }
 0xead   :  { %v5346_v29 = vpop.permute.xlu1 %5345 }
 0xeae   :  { %v5377_v42 = vsel %vm1719_vm10, %v5376_v22, %v5346_v29 }
 0xeaf   :  { %v5313_v12 = vpop.permute.xlu0 %5312 }
 0xeb0   :  { %v5371_v17 = vsel %vm1733_vm13, %v5370_v43, %v5313_v12 }
 0xeb1   :  { %v5372_v44 = vsel %vm1747_vm11, %v5371_v17, %v5320_v4  ;;  %v5349_v6 = vpop.permute.xlu1 %5348 }
 0xeb2   :  { %v5373_v34 = vsel %vm1761_vm14, %v5372_v44, %v5323_v61  ;;  %v5378_v38 = vsel %vm1733_vm13, %v5377_v42, %v5349_v6 }
 0xeb3   :  { %v5329_v21 = vpop.permute.xlu0 %5328 }
 0xeb4   :  { %v5330_v54 = vsel %vm5232_vm6, %v5327_v52, %v5329_v21 }
 0xeb5   :  { %v5355_v15 = vpop.permute.xlu1 %5354  ;;  %v5374_v20 = vsel %vm1775_vm15, %v5373_v34, %v5330_v54 }
 0xeb6   :  { %5384 = vrot.lane.b32.xlu1 %v5374_v20, %s7841_s24 }
 0xeb7   :  { %v5353_v31 = vpop.permute.xlu0 %5352 }
 0xeb8   :  { %v5356_v49 = vsel %vm1375_vm4, %v5353_v31, %v5355_v15 }
 0xeb9   :  { %v5359_v8 = vpop.permute.xlu1 %5358  ;;  %v5379_v40 = vsel %vm1747_vm11, %v5378_v38, %v5356_v49 }
 0xeba   :  { %198 = vrot.lane.b32.xlu1 %v194_v57, %s7841_s24  ;;  %v5380_v28 = vsel %vm1761_vm14, %v5379_v40, %v5359_v8 }
 0xebb   :  { %v5363_v35 = vpop.permute.xlu0 %5362 }
 0xebd   :  { %v5365_v56 = vpop.permute.xlu1 %5364 }
 0xebe   :  { %v5366_v14 = vsel %vm5280_vm8, %v5363_v35, %v5365_v56  ;;  %v11214_v56 = vld [vmem:[%s11473_s22 + $0x8] sm:$0x1] }
 0xebf   :  { %v5191_v51 = vpop.permute.xlu0 %5190  ;;  %v5381_v1 = vsel %vm1775_vm15, %v5380_v28, %v5366_v14  ;;  %v5528_v28 = vld [vmem:[%s11474_s17 + $0x18] sm:$0xff]  ;;  %v5393_v14 = vld [vmem:[%s11475_s16 + $0x8] sm:$0xff] }
 0xec0   :  { %5386 = vrot.lane.b32.xlu0 %v5381_v1, %s7841_s24  ;;  %v5283_v2 = vsel %vm1691_vm7, %v11047_v32, %v5191_v51  ;;  %v5525_v51 = vld [vmem:[%s11474_s17] sm:$0xff]  ;;  %v5527_v1 = vld [vmem:[%s11474_s17 + $0x10] sm:$0xff] }
 0xec1   :  { %v5197_v30 = vpop.permute.xlu1 %5196 }
 0xec3   :  { %v5199_v50 = vpop.permute.xlu0 %5198 }
 0xec4   :  { %v5201_v23 = vsel %vm5200_vm2, %v5197_v30, %v5199_v50  ;;  %v5526_v30 = vld [vmem:[%s11474_s17 + $0x8] sm:$0xff]  ;;  %vm5501_vm2 = vcmask 744448  }
 0xec5   :  { %v5236_v19 = vpop.permute.xlu1 %5235  ;;  %v5284_v48 = vsel %vm1705_vm9, %v5283_v2, %v5201_v23 }
 0xec7   :  { %v5240_v16 = vpop.permute.xlu0 %5239 }
 0xec8   :  { %v5290_v43 = vsel %vm1691_vm7, %v5236_v19, %v5240_v16  ;;  %vm11827_vm7 = vcmask 130048  }
 0xec9   :  { %v5246_v7 = vpop.permute.xlu1 %5245  ;;  %6090 = vmatprep.mubr.msk.f32.mxu0 %vm11827_vm7, %v5393_v14 }
 0xecb   :  { %v5248_v41 = vpop.permute.xlu0 %5247 }
 0xecc   :  { %v5250_v63 = vsel %vm5249_vm0, %v5246_v7, %v5248_v41 }
 0xecd   :  { %v5205_v55 = vpop.permute.xlu1 %5204  ;;  %v5291_v17 = vsel %vm1705_vm9, %v5290_v43, %v5250_v63  ;;  %vm11828_vm9 = vcmask 56320  }
 0xece   :  { %v5285_v52 = vsel %vm1719_vm10, %v5284_v48, %v5205_v55 }
 0xecf   :  { %v5254_v62 = vpop.permute.xlu0 %5253 }
 0xed0   :  { %v5292_v6 = vsel %vm1719_vm10, %v5291_v17, %v5254_v62  ;;  %vm5436_vm10 = vcmask 48128  }
 0xed1   :  { %v5209_v9 = vpop.permute.xlu1 %5208 }
 0xed2   :  { %v5286_v45 = vsel %vm1733_vm13, %v5285_v52, %v5209_v9 }
 0xed3   :  { %v5215_v26 = vpop.permute.xlu0 %5214 }
 0xed5   :  { %v5217_v61 = vpop.permute.xlu1 %5216 }
 0xed6   :  { %v5219_v25 = vsel %vm5218_vm3, %v5215_v26, %v5217_v61  ;;  %vm5516_vm3 = vcmask 736256  }
 0xed7   :  { %v5258_v46 = vpop.permute.xlu0 %5257  ;;  %v5287_v3 = vsel %vm1747_vm11, %v5286_v45, %v5219_v25 }
 0xed8   :  { %v5293_v54 = vsel %vm1733_vm13, %v5292_v6, %v5258_v46 }
 0xed9   :  { %v5264_v11 = vpop.permute.xlu1 %5263 }
 0xedb   :  { %v5229_v33 = vpop.permute.xlu0 %5228 }
 0xedd   :  { %v5223_v39 = vpop.permute.xlu1 %5222 }
 0xede   :  { %v5288_v29 = vsel %vm1761_vm14, %v5287_v3, %v5223_v39 }
 0xedf   :  { %v5279_v24 = vpop.permute.xlu0 %5278 }
 0xee1   :  { %v5231_v32 = vpop.permute.xlu1 %5230 }
 0xee2   :  { %v5233_v18 = vsel %vm5232_vm6, %v5229_v33, %v5231_v32 }
 0xee3   :  { %v5266_v12 = vpop.permute.xlu0 %5265  ;;  %v5289_v4 = vsel %vm1775_vm15, %v5288_v29, %v5233_v18 }
 0xee4   :  { %v5267_v44 = vsel %vm1375_vm4, %v5264_v11, %v5266_v12  ;;  %vm5471_vm4 = vcmask 793600  }
 0xee5   :  { %v5277_v21 = vpop.permute.xlu1 %5276  ;;  %v5294_v34 = vsel %vm1747_vm11, %v5293_v54, %v5267_v44  ;;  %vm11829_vm11 = vmmov %vm11828_vm9 }
 0xee6   :  { %v5281_v15 = vsel %vm5280_vm8, %v5277_v21, %v5279_v24  ;;  %vm5486_vm8 = vcmask 752640  }
 0xee7   :  { %v5271_v36 = vpop.permute.xlu0 %5270 }
 0xee8   :  { %v5295_v20 = vsel %vm1761_vm14, %v5294_v34, %v5271_v36  ;;  %vm11830_vm14 = vcmask 7168  }
 0xee9   :  { %v5296_v27 = vsel %vm1775_vm15, %v5295_v20, %v5281_v15  ;;  %vm11831_vm15 = vmmov %vm11830_vm14 }
 0xf28   :  { %v5385_v31 = vpop.permute.xlu1 %5384 }
 0xf29   :  { %v5390_v22 = vsel %vm204_vm5, %v5289_v4, %v5385_v31 }
 0xf2a   :  { %5402 = vrot.lane.b32.xlu0 %v5390_v22, %s7848_s5 }
 0xf2c   :  { %v199_v49 = vpop.permute.xlu1 %198 }
 0xf2d   :  { %v11186_v42 = vsel %vm204_vm5, %v194_v57, %v199_v49 }
 0xf2e   :  { %5416 = vrot.lane.b32.xlu0 %v5390_v22, %s7867_s2  ;;  %v11191_v8 = vrot.slane %v11186_v42, %v11791_v58  ;;  %v11241_v16 = vrot.slane %v11186_v42, %v11750_v10  ;;  %v11248_v9 = vrot.slane %v11186_v42, %v11764_v59  ;;  %v11256_v46 = vrot.slane %v11186_v42, %v11778_v47 }
 0xf2f   :  { %v11268_v18 = vrot.slane %v11186_v42, %v11779_v53  ;;  %v11277_v53 = vrot.slane %v11186_v42, %v11811_v5 }
 0xf30   :  { %v11197_v35 = vmul.f32 %v11191_v8, %v5390_v22 }
 0xf32   :  { %5430 = vrot.lane.b32.xlu0 %v5390_v22, %s7868_s12  ;;  %v5387_v38 = vpop.permute.xlu0 %5386 }
 0xf33   :  { %v5391_v40 = vsel %vm204_vm5, %v5296_v27, %v5387_v38 }
 0xf34   :  { %5404 = vrot.lane.b32.xlu1 %v5391_v40, %s7848_s5  ;;  %v11200_v57 = vmul.f32 %v11191_v8, %v5391_v40 }
 0xf36   :  { %5445 = vrot.lane.b32.xlu0 %v5390_v22, %s11825_s29  ;;  %v7193_v58 = vpack.c.bf16 %v11200_v57, %v11197_v35 }
 0xf38   :  { %5418 = vrot.lane.b32.xlu1 %v5391_v40, %s7867_s2 }
 0xf3a   :  { %5465 = vrot.lane.b32.xlu0 %v5390_v22, %s11826_s9 }
 0xf3c   :  { %5432 = vrot.lane.b32.xlu1 %v5391_v40, %s7868_s12 }
 0xf3e   :  { %5480 = vrot.lane.b32.xlu0 %v5390_v22, %s7869_s27 }
 0xf40   :  { %5447 = vrot.lane.b32.xlu1 %v5391_v40, %s11825_s29 }
 0xf42   :  { %5495 = vrot.lane.b32.xlu0 %v5390_v22, %s7870_s25 }
 0xf44   :  { %5467 = vrot.lane.b32.xlu1 %v5391_v40, %s11826_s9 }
 0xf46   :  { %200 = vrot.lane.b32.xlu0 %v11214_v56, %s7841_s24 }
 0xf48   :  { %5482 = vrot.lane.b32.xlu1 %v5391_v40, %s7869_s27 }
 0xf4a   :  { %5512 = vrot.lane.b32.xlu0 %v5391_v40, %s7855_s10 }
 0xf4c   :  { %5497 = vrot.lane.b32.xlu1 %v5391_v40, %s7870_s25 }
 0xf4e   :  { %5546 = vperm.xlu0 %7587, %v5528_v28  }
 0xf50   :  { %5510 = vrot.lane.b32.xlu1 %v5390_v22, %s7855_s10  ;;  %v11286_v22 = vrot.slane %v11186_v42, %v11743_v0  ;;  %v11298_v0 = vrot.slane %v11186_v42, %v11746_v13 }
 0xf52   :  { %5531 = vperm.xlu0 %7587, %v5525_v51  }
 0xf54   :  { %5541 = vperm.xlu1 %7588, %v5527_v1  }
 0xf58   :  { %5536 = vperm.xlu1 %7588, %v5526_v30  }
 0xf9c   :  { %v5403_v50 = vpop.permute.xlu0 %5402 }
 0xf9d   :  { %v5408_v41 = vsel %vm4041_vm1, 0.0, %v5403_v50 }
 0xf9e   :  { %v5414_v23 = vmul.f32 %v11241_v16, %v5408_v41 }
 0xfa0   :  { %v5417_v19 = vpop.permute.xlu0 %5416 }
 0xfa1   :  { %v5422_v48 = vsel %vm11828_vm9, 0.0, %v5417_v19 }
 0xfa2   :  { %v5428_v25 = vmul.f32 %v11248_v9, %v5422_v48  ;;  %v5396_v48 = vld [vmem:[%s11475_s16 + $0x20] sm:$0xff] }
 0xfa4   :  { %v5431_v7 = vpop.permute.xlu0 %5430 }
 0xfa5   :  { %v5437_v11 = vsel %vm5436_vm10, 0.0, %v5431_v7 }
 0xfa6   :  { %v5405_v55 = vpop.permute.xlu1 %5404  ;;  %v5443_v63 = vmul.f32 %v11256_v46, %v5437_v11 }
 0xfa7   :  { %v5409_v62 = vsel %vm4041_vm1, 0.0, %v5405_v55 }
 0xfa8   :  { %v5415_v2 = vmul.f32 %v11241_v16, %v5409_v62  ;;  %v5446_v26 = vpop.permute.xlu0 %5445 }
 0xfa9   :  { %v5451_v47 = vsel %vm11830_vm14, 0.0, %v5446_v26  ;;  %v5397_v26 = vld [vmem:[%s11475_s16 + $0x28] sm:$0xff] }
 0xfaa   :  { %v7181_v52 = vpack.c.bf16 %v5415_v2, %v5414_v23  ;;  %v5419_v61 = vpop.permute.xlu1 %5418  ;;  %v5457_v17 = vmul.f32 %v11268_v18, %v5451_v47  ;;  %v5395_v23 = vld [vmem:[%s11475_s16 + $0x18] sm:$0xff]  ;;  %v5394_v2 = vld [vmem:[%s11475_s16 + $0x10] sm:$0xff] }
 0xfab   :  { %v5423_v45 = vsel %vm11829_vm11, 0.0, %v5419_v61  ;;  %v5398_v61 = vld [vmem:[%s11475_s16 + $0x30] sm:$0xff] }
 0xfac   :  { %v5429_v3 = vmul.f32 %v11248_v9, %v5423_v45  ;;  %7182 = vmatpush1.bf16.msra.mxu0 %v7181_v52  ;;  %v5466_v59 = vpop.permute.xlu0 %5465  ;;  %v5399_v52 = vld [vmem:[%s11475_s16 + $0x38] sm:$0xff] }
 0xfad   :  { %7183 = vmatprep.subr.bf16.mxu0 %v7829_v60  ;;  %v5472_v36 = vsel %vm5471_vm4, %v5466_v59, 0.0 }
 0xfae   :  { %v7184_v33 = vpack.c.bf16 %v5429_v3, %v5428_v25  ;;  %v5433_v39 = vpop.permute.xlu1 %5432  ;;  %v5478_v31 = vmul.f32 %v11277_v53, %v5472_v36 }
 0xfaf   :  { %v5438_v24 = vsel %vm5436_vm10, 0.0, %v5433_v39 }
 0xfb0   :  { %v5444_v32 = vmul.f32 %v11256_v46, %v5438_v24  ;;  %7185 = vmatpush1.bf16.msra.mxu0 %v7184_v33  ;;  %v5481_v29 = vpop.permute.xlu0 %5480 }
 0xfb1   :  { %7186 = vmatprep.subr.bf16.mxu0 %v7829_v60  ;;  %v5487_v5 = vsel %vm5486_vm8, %v5481_v29, 0.0 }
 0xfb2   :  { %v7187_v43 = vpack.c.bf16 %v5444_v32, %v5443_v63  ;;  %v5448_v12 = vpop.permute.xlu1 %5447  ;;  %v5493_v51 = vmul.f32 %v11286_v22, %v5487_v5 }
 0xfb3   :  { %v5452_v4 = vsel %vm11831_vm15, 0.0, %v5448_v12 }
 0xfb4   :  { %v5458_v44 = vmul.f32 %v11268_v18, %v5452_v4  ;;  %7188 = vmatpush1.bf16.msra.mxu0 %v7187_v43  ;;  %v5496_v21 = vpop.permute.xlu0 %5495 }
 0xfb5   :  { %7189 = vmatprep.subr.bf16.mxu0 %v7829_v60  ;;  %v5502_v35 = vsel %vm5501_vm2, %v5496_v21, 0.0 }
 0xfb6   :  { %v7190_v6 = vpack.c.bf16 %v5458_v44, %v5457_v17  ;;  %v5468_v54 = vpop.permute.xlu1 %5467  ;;  %v5508_v7 = vmul.f32 %v11298_v0, %v5502_v35 }
 0xfb7   :  { %v5473_v34 = vsel %vm5471_vm4, %v5468_v54, 0.0 }
 0xfb8   :  { %7191 = vmatpush1.bf16.msra.mxu0 %v7190_v6  ;;  %v5479_v15 = vmul.f32 %v11277_v53, %v5473_v34  ;;  %v201_v49 = vpop.permute.xlu0 %200 }
 0xfb9   :  { %7192 = vmatprep.subr.bf16.mxu0 %v7829_v60  ;;  %v206_v57 = vsel %vm204_vm5, %v11214_v56, %v201_v49  ;;  %vm11832_vm5 = vmmov %vm11827_vm7 }
 0xfba   :  { %v5483_v20 = vpop.permute.xlu1 %5482  ;;  %v7196_v38 = vpack.c.bf16 %v5479_v15, %v5478_v31  ;;  %v11308_v13 = vrot.slane %v206_v57, %v11750_v10  ;;  %v5392_v10 = vld [vmem:[%s11475_s16] sm:$0xff]  ;;  %vm11833_vm6 = vmmov %vm11832_vm5 }
 0xfbb   :  { %v5488_v27 = vsel %vm5486_vm8, %v5483_v20, 0.0  ;;  %vm11834_vm0 = vmmov %vm11832_vm5 }
 0xfbc   :  { %7194 = vmatpush1.bf16.msra.mxu0 %v7193_v58  ;;  %v5494_v40 = vmul.f32 %v11286_v22, %v5488_v27  ;;  %v5513_v1 = vpop.permute.xlu0 %5512  ;;  %vm11835_vm7 = vmmov %vm11828_vm9 }
 0xfbd   :  { %7195 = vmatprep.subr.bf16.mxu0 %v7829_v60  ;;  %v5518_v42 = vsel %vm5516_vm3, %v5513_v1, 0.0  ;;  %vm11836_vm9 = vmmov %vm11830_vm14 }
 0xfbe   :  { %v5498_v28 = vpop.permute.xlu1 %5497  ;;  %v7199_v58 = vpack.c.bf16 %v5494_v40, %v5493_v51  ;;  %v5524_v55 = vmul.f32 %v11308_v13, %v5518_v42  ;;  %vm11837_vm11 = vmmov %vm11835_vm7 }
 0xfbf   :  { %v5503_v14 = vsel %vm5501_vm2, %v5498_v28, 0.0 }
 0xfc0   :  { %7197 = vmatpush1.bf16.msra.mxu0 %v7196_v38  ;;  %v5509_v30 = vmul.f32 %v11298_v0, %v5503_v14 }
 0xfc1   :  { %7198 = vmatprep.subr.bf16.mxu0 %v7829_v60 }
 0xfc2   :  { %v5511_v50 = vpop.permute.xlu1 %5510  ;;  %v7202_v56 = vpack.c.bf16 %v5509_v30, %v5508_v7 }
 0xfc3   :  { %v5517_v19 = vsel %vm5516_vm3, %v5511_v50, 0.0 }
 0xfc4   :  { %7200 = vmatpush1.bf16.msra.mxu0 %v7199_v58  ;;  %v5523_v41 = vmul.f32 %v11308_v13, %v5517_v19 }
 0xfc5   :  { %7201 = vmatprep.subr.bf16.mxu0 %v7829_v60 }
 0xfc6   :  { %v7205_v62 = vpack.c.bf16 %v5524_v55, %v5523_v41 }
 0xfc8   :  { %7203 = vmatpush1.bf16.msra.mxu0 %v7202_v56 }
 0xfc9   :  { %7204 = vmatprep.subr.bf16.mxu0 %v7829_v60 }
 0xfcc   :  { %7206 = vmatpush1.bf16.msra.mxu0 %v7205_v62 }
 0xfcd   :  { %7231 = vmatprep.subr.bf16.mxu0 %v7829_v60  ;;  %v5547_v45 = vpop.permute.xlu0 %5546 }
 0xfcf   :  { %5626 = vmatmul.mubr.f32.vlgmr.msra.gmra.mrb[32].mxu0 %v5392_v10  ;;  %v5678_v10 = vld [vmem:[%s11477_s18] sm:$0xf] }
 0xfd0   :  { %6091 = vmatprep.mubr.msk.f32.mxu0 %vm11832_vm5, %v5395_v23 }
 0xfd1   :  { %v5532_v11 = vpop.permute.xlu0 %5531 }
 0xfd3   :  { %5631 = vmatmul.mubr.f32.gmra.mrb[34].mxu0 %v5394_v2  ;;  %v5542_v25 = vpop.permute.xlu1 %5541 }
 0xfd4   :  { %6092 = vmatprep.mubr.msk.f32.mxu0 %vm11833_vm6, %v5397_v26 }
 0xfd7   :  { %5636 = vmatmul.mubr.f32.gmra.mrb[36].mxu0 %v5396_v48  ;;  %v5537_v39 = vpop.permute.xlu1 %5536 }
 0xfd8   :  { %6093 = vmatprep.mubr.msk.f32.mxu0 %vm11834_vm0, %v5399_v52 }
 0xfdb   :  { %5641 = vmatmul.mubr.f32.gmra.mrb[38].mxu0 %v5398_v61 }
 0xfdc   :  { %6449 = vmatprep.mubr.msk.f32.mxu0 %vm11819_vm12, %v11700_v37 }
0x10a2   :  { %v5627_v3 = vpop.f32.mrb[32].mxu0 }
0x10a3   :  { %v5629_v59 = vpop.f32.mrb[33].mxu0  ;;  %v5628_v33 = vadd.f32 %v5627_v3, %v5532_v11 }
0x10a5   :  { %v11343_v29 = vmul.f32 %v5628_v33, %v11191_v8 }
0x10a6   :  { %v5632_v24 = vpop.f32.mrb[34].mxu0 }
0x10a7   :  { %v5633_v63 = vadd.f32 %v5632_v24, %v5537_v39  ;;  %v5634_v32 = vpop.f32.mrb[35].mxu0 }
0x10a9   :  { %v11346_v47 = vmul.f32 %v5633_v63, %v11191_v8 }
0x10aa   :  { %v5637_v43 = vpop.f32.mrb[36].mxu0 }
0x10ab   :  { %v5638_v12 = vadd.f32 %v5637_v43, %v5542_v25  ;;  %v5639_v4 = vpop.f32.mrb[37].mxu0  ;;  %v11350_v17 = vpack.c.bf16 %v11346_v47, %v11343_v29 }
0x10ad   :  { %5653 = vrot.lane.b32.xlu0 %v5638_v12, %s7867_s2  ;;  %v11356_v54 = vmul.f32 %v5638_v12, %v11191_v8 }
0x10ae   :  { %v5642_v44 = vpop.f32.mrb[38].mxu0 }
0x10af   :  { %v5643_v6 = vadd.f32 %v5642_v44, %v5547_v45  ;;  %v5644_v21 = vpop.f32.mrb[39].mxu0 }
0x10b1   :  { %5664 = vrot.lane.b32.xlu0 %v5633_v63, %s11825_s29  ;;  %5647 = vrot.lane.b32.xlu1 %v5643_v6, %s7848_s5  ;;  %v11359_v34 = vmul.f32 %v5643_v6, %v11191_v8  ;;  %v5679_v8 = vld [vmem:[%s11476_s19] sm:$0xf] }
0x10b3   :  { %v11363_v36 = vpack.c.bf16 %v11359_v34, %v11356_v54 }
0x10b5   :  { %5764 = vrot.lane.b32.xlu0 %v5638_v12, %s7868_s12  ;;  %5658 = vrot.lane.b32.xlu1 %v5643_v6, %s7867_s2 }
0x10b9   :  { %5775 = vrot.lane.b32.xlu0 %v5638_v12, %s11826_s9  ;;  %5671 = vrot.lane.b32.xlu1 %v5643_v6, %s11825_s29 }
0x10bd   :  { %5866 = vrot.lane.b32.xlu0 %v5633_v63, %s7870_s25  ;;  %5770 = vrot.lane.b32.xlu1 %v5628_v33, %s11826_s9 }
0x10c1   :  { %5947 = vrot.lane.b32.xlu0 %v5628_v33, %s7855_s10  ;;  %5861 = vrot.lane.b32.xlu1 %v5628_v33, %s7870_s25 }
0x10c5   :  { %5856 = vrot.lane.b32.xlu1 %v5633_v63, %s7869_s27 }
0x10c9   :  { %5682 = vperm.xlu1 %7588, %v5679_v8  }
0x111f   :  { %v5654_v15 = vpop.permute.xlu0 %5653 }
0x1120   :  { %v5656_v20 = vsel %vm11835_vm7, 0.0, %v5654_v15 }
0x1121   :  { %v5657_v38 = vmul.f32 %v5656_v20, %v11248_v9 }
0x1123   :  { %v5648_v27 = vpop.permute.xlu1 %5647  ;;  %v5665_v31 = vpop.permute.xlu0 %5664 }
0x1124   :  { %v5650_v49 = vsel %vm4041_vm1, 0.0, %v5648_v27  ;;  %v5667_v5 = vsel %vm11836_vm9, 0.0, %v5665_v31  ;;  %vm11838_vm1 = vmmov %vm11836_vm9 }
0x1125   :  { %v5651_v40 = vmul.f32 %v5650_v49, %v11241_v16  ;;  %v5668_v28 = vmul.f32 %v5667_v5, %v11268_v18 }
0x1127   :  { %v7208_v14 = vpack.c.bf16 %v5657_v38, %v5651_v40  ;;  %v7232_v51 = vpack.c.bf16 %v11343_v29, %v5668_v28  ;;  %v5659_v35 = vpop.permute.xlu1 %5658  ;;  %v5765_v50 = vpop.permute.xlu0 %5764 }
0x1128   :  { %v5661_v57 = vsel %vm11837_vm11, 0.0, %v5659_v35 }
0x1129   :  { %v5662_v58 = vmul.f32 %v5661_v57, %v11248_v9  ;;  %7209 = vmatpush3.bf16.msra.mxu1 %v7208_v14  ;;  %7233 = vmatpush3.bf16.msra.mxu0 %v7232_v51 }
0x112a   :  { %7210 = vmatprep.subr.bf16.mxu1 %v7829_v60  ;;  %7234 = vmatprep.subr.bf16.mxu0 %v7829_v60 }
0x112b   :  { %v7211_v1 = vpack.c.bf16 %v5668_v28, %v5662_v58  ;;  %v5672_v30 = vpop.permute.xlu1 %5671  ;;  %v5776_v56 = vpop.permute.xlu0 %5775  ;;  %v7220_v2 = vpack.c.bf16 %v5662_v58, %v5657_v38 }
0x112c   :  { %v5674_v16 = vsel %vm11838_vm1, 0.0, %v5672_v30  ;;  %v5778_v33 = vsel %vm5471_vm4, %v5776_v56, 0.0 }
0x112d   :  { %v5675_v19 = vmul.f32 %v5674_v16, %v11268_v18  ;;  %7212 = vmatpush3.bf16.msra.mxu1 %v7211_v1  ;;  %v5767_v18 = vsel %vm5436_vm10, 0.0, %v5765_v50  ;;  %vm11839_vm10 = vcmask 588800   ;;  %v5779_v39 = vmul.f32 %v5778_v33, %v11277_v53 }
0x112e   :  { %7213 = vmatprep.subr.bf16.mxu1 %v7829_v60  ;;  %v5768_v26 = vmul.f32 %v5767_v18, %v11256_v46  ;;  %vm11840_vm14 = vmmov %vm11839_vm10 }
0x112f   :  { %v7235_v7 = vpack.c.bf16 %v5675_v19, %v11346_v47  ;;  %v5771_v42 = vpop.permute.xlu1 %5770  ;;  %v7217_v9 = vpack.c.bf16 %v11356_v54, %v5675_v19  ;;  %v5867_v48 = vpop.permute.xlu0 %5866  ;;  %vm11841_vm15 = vmmov %vm11839_vm10  ;;  %v7250_v24 = vpack.c.bf16 %v5779_v39, %v11359_v34 }
0x1130   :  { %v5773_v45 = vsel %vm5471_vm4, %v5771_v42, 0.0  ;;  %v5869_v46 = vsel %vm5501_vm2, %v5867_v48, 0.0  ;;  %v7223_v3 = vpack.c.bf16 %v11343_v29, %v5768_v26  ;;  %vm11843_vm4 = vcmask 801792  }
0x1131   :  { %7215 = vmatpush3.bf16.msra.mxu1 %v11350_v17  ;;  %7236 = vmatpush3.bf16.msra.mxu0 %v7235_v7  ;;  %v5870_v59 = vmul.f32 %v5869_v46, %v11298_v0 }
0x1132   :  { %7216 = vmatprep.subr.bf16.mxu1 %v7829_v60  ;;  %7237 = vmatprep.subr.bf16.mxu0 %v7829_v60 }
0x1133   :  { %v5862_v41 = vpop.permute.xlu1 %5861 }
0x1134   :  { %v5864_v55 = vsel %vm5501_vm2, %v5862_v41, 0.0 }
0x1135   :  { %7218 = vmatpush3.bf16.msra.mxu1 %v7217_v9  ;;  %7239 = vmatpush3.bf16.msra.mxu0 %v11363_v36  ;;  %v5865_v52 = vmul.f32 %v5864_v55, %v11298_v0 }
0x1136   :  { %6405 = vmatprep.subr.mxu1 %v11700_v37  ;;  %7240 = vmatprep.subr.bf16.mxu0 %v7829_v60 }
0x1137   :  { %v5857_v62 = vpop.permute.xlu1 %5856  ;;  %v7253_v63 = vpack.c.bf16 %v5870_v59, %v5865_v52 }
0x1138   :  { %v5859_v23 = vsel %vm5486_vm8, %v5857_v62, 0.0  ;;  %vm11844_vm8 = vmmov %vm11843_vm4 }
0x1139   :  { %v5860_v61 = vmul.f32 %v5859_v23, %v11286_v22  ;;  %6406 = vmatpush3.msra.mxu1 %v11359_v34  ;;  %v5774_v22 = vmul.f32 %v5773_v45, %v11277_v53  ;;  %v5948_v53 = vpop.permute.xlu0 %5947 }
0x113a   :  { %6408 = vmatmul.mubr.msk.f32.vlgmr.msra.gmra.mrb[24].mxu1 %vm11839_vm10, %v5678_v10  ;;  %7219 = vmatprep.subr.bf16.mxu1 %v7829_v60  ;;  %v5950_v32 = vsel %vm5516_vm3, %v5948_v53, 0.0 }
0x113b   :  { %v7241_v25 = vpack.c.bf16 %v5865_v52, %v5860_v61  ;;  %7221 = vmatpush3.bf16.msra.mxu1 %v7220_v2  ;;  %6428 = vmatprep.mubr.msk.f32.mxu1 %vm11819_vm12, %v11700_v37  ;;  %v7226_v11 = vpack.c.bf16 %v5774_v22, %v11346_v47  ;;  %v7247_v0 = vpack.c.bf16 %v11356_v54, %v5774_v22 }
0x113c   :  { %7222 = vmatprep.subr.bf16.mxu1 %v7829_v60  ;;  %v5951_v29 = vmul.f32 %v5950_v32, %v11308_v13 }
0x113d   :  { %7242 = vmatpush3.bf16.msra.mxu0 %v7241_v25 }
0x113e   :  { %6447 = vmatprep.subr.mxu0 %v11700_v37 }
0x113f   :  { %7224 = vmatpush3.bf16.msra.mxu1 %v7223_v3 }
0x1140   :  { %7225 = vmatprep.subr.bf16.mxu1 %v7829_v60 }
0x1141   :  { %6448 = vmatpush3.msra.mxu0 %v5870_v59 }
0x1142   :  { %6450 = vmatmul.mubr.msk.f32.vlgmr.msra.gmra.mrb[40].mxu0 %vm11840_vm14, %v5678_v10 }
0x1143   :  { %7227 = vmatpush3.bf16.msra.mxu1 %v7226_v11 }
0x1144   :  { %7228 = vmatprep.subr.bf16.mxu1 %v7829_v60 }
0x1147   :  { %7230 = vmatpush3.bf16.msra.mxu1 %v11363_v36 }
0x1148   :  { %6426 = vmatprep.subr.mxu1 %v11700_v37 }
0x114b   :  { %6427 = vmatpush3.msra.mxu1 %v5779_v39 }
0x114c   :  { %6429 = vmatmul.mubr.msk.f32.vlgmr.msra.gmra.mrb[26].mxu1 %vm11841_vm15, %v5678_v10  ;;  %7243 = vmatprep.subr.bf16.mxu1 %v7829_v60 }
0x114d   :  { %7245 = vmatpush3.bf16.msra.mxu1 %v11350_v17  ;;  %6470 = vmatprep.mubr.msk.f32.mxu1 %vm11819_vm12, %v11700_v37  ;;  %vm11842_vm12 = vmmov %vm11839_vm10  ;;  %v5683_v17 = vpop.permute.xlu1 %5682 }
0x114e   :  { %7246 = vmatprep.subr.bf16.mxu1 %v7829_v60 }
0x1151   :  { %7248 = vmatpush3.bf16.msra.mxu1 %v7247_v0 }
0x1152   :  { %7249 = vmatprep.subr.bf16.mxu1 %v7829_v60 }
0x1155   :  { %7251 = vmatpush3.bf16.msra.mxu1 %v7250_v24 }
0x1156   :  { %7252 = vmatprep.subr.bf16.mxu1 %v7829_v60 }
0x1159   :  { %7254 = vmatpush3.bf16.msra.mxu1 %v7253_v63 }
0x115a   :  { %6468 = vmatprep.subr.mxu1 %v11700_v37 }
0x115d   :  { %6469 = vmatpush3.msra.mxu1 %v5951_v29 }
0x115e   :  { %6471 = vmatmul.mubr.msk.f32.vlgmr.msra.gmra.mrb[28].mxu1 %vm11842_vm12, %v5678_v10 }
0x120d   :  { %v5754_v47 = vpop.f32.mrb[24].mxu1 }
0x120e   :  { %v6409_v43 = vpop.f32.mrb[25].mxu1  ;;  %v5755_v44 = vadd.f32 %v5754_v47, %v5683_v17 }
0x1210   :  { %v5758_v6 = vsub.f32 0.0, %v5755_v44 }
0x1212   :  { %v5759_v60 = vmul.f32 1.442695, %v5758_v6 }
0x1214   :  { %7801 = vpow2.f32 %v5759_v60 }
0x1215   :  { %v5937_v12 = vpop.f32.mrb[40].mxu0 }
0x1216   :  { %v6451_v4 = vpop.f32.mrb[41].mxu0  ;;  %v5938_v37 = vadd.f32 %v5937_v12, %v5683_v17 }
0x1218   :  { %v5941_v15 = vsub.f32 0.0, %v5938_v37 }
0x121a   :  { %v5942_v5 = vmul.f32 1.442695, %v5941_v15 }
0x121e   :  { %v7802_v13 = vpop.eup %7801 }
0x121f   :  { %v5846_v21 = vpop.f32.mrb[26].mxu1  ;;  %v5761_v27 = vadd.f32 1.0, %v7802_v13 }
0x1220   :  { %v5847_v54 = vadd.f32 %v5846_v21, %v5683_v17  ;;  %v6430_v34 = vpop.f32.mrb[27].mxu1 }
0x1222   :  { %v5850_v36 = vsub.f32 0.0, %v5847_v54 }
0x1224   :  { %v5851_v8 = vmul.f32 1.442695, %v5850_v36 }
0x1226   :  { %7803 = vpow2.f32 %v5851_v8 }
0x1230   :  { %v7804_v20 = vpop.eup %7803 }
0x1231   :  { %v5853_v31 = vadd.f32 1.0, %v7804_v20  ;;  %v6018_v49 = vpop.f32.mrb[28].mxu1 }
0x1232   :  { %v6019_v38 = vadd.f32 %v6018_v49, %v5683_v17  ;;  %v6472_v40 = vpop.f32.mrb[29].mxu1 }
0x1233   :  { %7805 = vrcp.f32 %v5853_v31 }
0x1234   :  { %v6022_v28 = vsub.f32 0.0, %v6019_v38  ;;  %7807 = vrcp.f32 %v5761_v27 }
0x1235   :  { %7809 = vpow2.f32 %v5942_v5 }
0x1236   :  { %v6023_v14 = vmul.f32 1.442695, %v6022_v28 }
0x1238   :  { %7811 = vpow2.f32 %v6023_v14 }
0x123d   :  { %v7806_v51 = vpop.eup %7805 }
0x123e   :  { %v6029_v35 = vrot.slane %v7806_v51, 4  ;;  %v7808_v57 = vpop.eup %7807 }
0x123f   :  { %v7810_v58 = vpop.eup %7809 }
0x1240   :  { %v6034_v1 = vsel %vm1733_vm13, %v7808_v57, %v6029_v35  ;;  %v5944_v16 = vadd.f32 1.0, %v7810_v58 }
0x1241   :  { %6036 = vst.msk [vmem:[%s11478_s26] sm:$0xff] %vm11843_vm4, %v6034_v1 }
0x1242   :  { %v7812_v30 = vpop.eup %7811 }
0x1243   :  { %v6025_v50 = vadd.f32 1.0, %v7812_v30 }
0x1245   :  { %7813 = vrcp.f32 %v6025_v50 }
0x1246   :  { %7815 = vrcp.f32 %v5944_v16 }
0x124f   :  { %v7814_v19 = vpop.eup %7813 }
0x1250   :  { %v6032_v7 = vrot.slane %v7814_v19, 4  ;;  %v7816_v42 = vpop.eup %7815 }
0x1252   :  { %v6035_v9 = vsel %vm1733_vm13, %v7816_v42, %v6032_v7 }
0x1253   :  { %6037 = vst.msk [vmem:[%s11478_s26 + $0x8] sm:$0xff] %vm11844_vm8, %v6035_v9 }

</bundles_post_ra>
